<compile_context>
chip_gen: v5e
topology: v5e:2x2
jax: 0.10.0
libtpu: 0.0.40
codegen_flags: <defaults>
</compile_context>

<pallas_src>
import functools

import jax
import jax.numpy as jnp
from jax.experimental import pallas as pl
from jax.experimental.pallas import tpu as pltpu

# Uniform weight-tile edge.  TK == TN is required because the same VMEM activation
# slots are written as a layer's output blocks and re-read as the next layer's
# input blocks.  2 MiB bf16 tiles keep the per-grid-step pipeline overhead
# (~0.35 us) under each tile's DMA time while padding the 169 MiB stream by <2%.
TILE = 1024
MLP_DIMS = (1024, 2048, 4096, 8192, 4096, 2048, 1024, 512)
MAX_BLOCKS = max(MLP_DIMS) // TILE      # activation slots per ping-pong half (8)

# Rows of the per-tile schedule table (scalar-prefetch SMEM).
_IN_SLOT, _OUT_SLOT, _FIRST_K, _LAST_K, _FINAL = range(5)


# -----------------------------------------------------------------------------
# Fused MLP kernel: one grid step == one (TILE, TILE) weight tile of some layer.
# -----------------------------------------------------------------------------
def _fused_mlp_kernel(bias_blk_ref, meta_ref, pooled_ref, w_ref, b_ref, o_ref,
                      h_ref, acc_ref, *, out_dim):
    del bias_blk_ref                      # consumed only by the bias index_map
    t = pl.program_id(0)

    # Before the first tile, drop the pooled embedding (already zero-padded to
    # (B_pad, TILE)) into layer 0's single input slot.
    @pl.when(t == 0)
    def _():
        h_ref[0] = pooled_ref[...]

    in_slot = meta_ref[_IN_SLOT, t]
    out_slot = meta_ref[_OUT_SLOT, t]
    first_k = meta_ref[_FIRST_K, t]
    last_k = meta_ref[_LAST_K, t]
    final = meta_ref[_FINAL, t]

    x = h_ref[in_slot].astype(jnp.bfloat16)                      # (B_pad, TILE)
    part = jnp.dot(x, w_ref[...], preferred_element_type=jnp.float32)

    @pl.when(first_k == 1)
    def _():
        acc_ref[...] = part

    @pl.when(first_k == 0)
    def _():
        acc_ref[...] += part

    # Hidden layers: bias + ReLU, written into the other ping-pong half.
    @pl.when(jnp.logical_and(last_k == 1, final == 0))
    def _():
        h_ref[out_slot] = jnp.maximum(acc_ref[...] + b_ref[...], 0.0)

    # Final layer: bias + Tanh; only the real (unpadded) columns go to the output.
    @pl.when(jnp.logical_and(last_k == 1, final == 1))
    def _():
        y = jnp.tanh(acc_ref[...] + b_ref[...])
        o_ref[...] = y[:, :out_dim]


# -----------------------------------------------------------------------------
# One-time host-side weight pre-blocking.
# -----------------------------------------------------------------------------
def pack_mlp(layers):
    """Pre-block all Linear layers into one contiguous bf16 tile stream.

    Returns (w_tiles (T, TILE, TILE) bf16, bias_tiles (NB, 1, TILE) f32,
             bias_blk (T,) i32, meta (5, T) i32).  Tiles are ordered layer-major,
    output-block(n)-major, input-block(k)-minor — exactly the order the flat grid
    consumes them, so the weight index_map is simply (t, 0, 0) and the HBM read is
    one long sequential DMA stream.
    """
    n_layers = len(layers)
    w_parts, b_parts, blk_cols, meta_cols = [], [], [], []
    bias_base = 0
    for li, (w, b) in enumerate(layers):
        din, dout = w.shape
        kb, nb = pl.cdiv(din, TILE), pl.cdiv(dout, TILE)
        assert kb <= MAX_BLOCKS and nb <= MAX_BLOCKS
        din_p, dout_p = kb * TILE, nb * TILE
        wp = jnp.zeros((din_p, dout_p), jnp.float32).at[:din, :dout].set(w)
        bp = jnp.zeros((dout_p,), jnp.float32).at[:dout].set(b)
        # (din_p, dout_p) -> (nb*kb, TILE, TILE), n-major / k-minor tile order.
        wt = wp.reshape(kb, TILE, nb, TILE).transpose(2, 0, 1, 3)
        w_parts.append(wt.reshape(-1, TILE, TILE).astype(jnp.bfloat16))
        b_parts.append(bp.reshape(nb, 1, TILE))
        final = 1 if li == n_layers - 1 else 0
        if final:
            assert nb == 1, "final layer must fit a single output tile"
        in_base = (li % 2) * MAX_BLOCKS
        out_base = ((li + 1) % 2) * MAX_BLOCKS
        for n in range(nb):
            for k in range(kb):
                blk_cols.append(bias_base + n)
                meta_cols.append((in_base + k, out_base + n,
                                  int(k == 0), int(k == kb - 1), final))
        bias_base += nb
    w_tiles = jnp.concatenate(w_parts, axis=0)
    bias_tiles = jnp.concatenate(b_parts, axis=0)
    bias_blk = jnp.asarray(blk_cols, dtype=jnp.int32)
    meta = jnp.asarray(meta_cols, dtype=jnp.int32).T
    return w_tiles, bias_tiles, bias_blk, meta


# -----------------------------------------------------------------------------
# Wrapper: single pallas_call streaming every layer's weights back to back.
# -----------------------------------------------------------------------------
def fused_mlp(pooled, packed):
    w_tiles, bias_tiles, bias_blk, meta = packed
    out_dim = MLP_DIMS[-1]
    B, e = pooled.shape
    assert e <= TILE
    b_pad = pl.cdiv(B, 8) * 8
    # Zero-pad batch to full sublanes and features to layer 0's TILE-wide input
    # slot.  Padded batch rows produce activation(bias) garbage — sliced off below.
    x0 = jnp.zeros((b_pad, TILE), jnp.float32).at[:B, :e].set(pooled)

    n_tiles = int(w_tiles.shape[0])
    cost = pl.CostEstimate(
        flops=2 * b_pad * TILE * TILE * n_tiles,
        transcendentals=b_pad * TILE,
        bytes_accessed=(w_tiles.size * 2 + bias_tiles.size * 4
                        + x0.size * 4 + b_pad * out_dim * 4),
    )

    out = pl.pallas_call(
        functools.partial(_fused_mlp_kernel, out_dim=out_dim),
        out_shape=jax.ShapeDtypeStruct((b_pad, out_dim), jnp.float32),
        grid_spec=pltpu.PrefetchScalarGridSpec(
            num_scalar_prefetch=2,                 # bias_blk, meta -> SMEM
            grid=(n_tiles,),
            in_specs=[
                # pooled embedding: one resident block, fetched once
                pl.BlockSpec((b_pad, TILE), lambda t, bias_blk, meta: (0, 0)),
                # weight tile stream: sequential & contiguous in HBM
                pl.BlockSpec((None, TILE, TILE),
                             lambda t, bias_blk, meta: (t, 0, 0)),
                # bias tile of the current output block (scalar-prefetch driven)
                pl.BlockSpec((None, 1, TILE),
                             lambda t, bias_blk, meta: (bias_blk[t], 0, 0)),
            ],
            out_specs=pl.BlockSpec((b_pad, out_dim),
                                   lambda t, bias_blk, meta: (0, 0)),
            scratch_shapes=[
                # ping-pong activation slots: h[(layer % 2) * MAX_BLOCKS + block]
                pltpu.VMEM((2 * MAX_BLOCKS, b_pad, TILE), jnp.float32),
                # f32 accumulator for the current output tile
                pltpu.VMEM((b_pad, TILE), jnp.float32),
            ],
        ),
        compiler_params=pltpu.CompilerParams(
            # Layers depend on each other sequentially -> one "arbitrary" axis.
            dimension_semantics=("arbitrary",),
            # Explicit: v5e's default scoped VMEM limit is only 16 MiB.
            vmem_limit_bytes=32 * 1024 * 1024,
        ),
        cost_estimate=cost,
    )(bias_blk, meta, x0, w_tiles, bias_tiles)
    return out[:B]


# -----------------------------------------------------------------------------
# Model wrapper / reference
# -----------------------------------------------------------------------------
def init_params(key, vocab_size, embed_dim):
    """f32 parameters matching PyTorch nn.Embedding / nn.Linear default init."""
    dims = (embed_dim,) + MLP_DIMS
    keys = jax.random.split(key, 1 + 2 * (len(dims) - 1))
    emb_table = jax.random.normal(keys[0], (vocab_size, embed_dim), jnp.float32)
    layers = []
    for i, (din, dout) in enumerate(zip(dims[:-1], dims[1:])):
        bound = 1.0 / float(din) ** 0.5
        w = jax.random.uniform(keys[1 + 2 * i], (din, dout), jnp.float32, -bound, bound)
        b = jax.random.uniform(keys[2 + 2 * i], (dout,), jnp.float32, -bound, bound)
        layers.append((w, b))
    return emb_table, layers


def simple_embedding_model(emb_table, packed, token_ids):
    # Embedding gather + mean over the sequence: tiny (2 KiB), data-dependent
    # glue — a dedicated pallas_call here would be pure launch overhead.
    pooled = jnp.take(emb_table, token_ids, axis=0).mean(axis=1)   # (B, E) f32
    return fused_mlp(pooled, packed)                               # (B, 512) f32


def reference_model(emb_table, layers, token_ids):
    # Mirrors the kernel's mixed precision (bf16 weights/activations into the MXU,
    # f32 accumulation / bias / nonlinearity) so the check stays tight.
    # NOTE: this validates self-consistency; a pure-f32 PyTorch forward differs at
    # the ~1e-3 relative level because of the bf16 weight stream.
    h = jnp.take(emb_table, token_ids, axis=0).mean(axis=1)
    n = len(layers)
    for i, (w, b) in enumerate(layers):
        h = jnp.dot(h.astype(jnp.bfloat16), w.astype(jnp.bfloat16),
                    preferred_element_type=jnp.float32) + b
        h = jnp.tanh(h) if i == n - 1 else jnp.maximum(h, 0.0)
    return h


if __name__ == "__main__":
    vocab_size, embed_dim = 100, 32
    batch, seq = 2, 8

    key = jax.random.PRNGKey(0)
    k_params, k_ids = jax.random.split(key)
    emb_table, layers = init_params(k_params, vocab_size, embed_dim)
    packed = pack_mlp(layers)          # one-time bf16 weight pre-blocking
    token_ids = jax.random.randint(k_ids, (batch, seq), 0, vocab_size,
                                   dtype=jnp.int32)

    fwd = jax.jit(simple_embedding_model)
    out = jax.block_until_ready(fwd(emb_table, packed, token_ids))
    assert out.shape == (batch, MLP_DIMS[-1]) and out.dtype == jnp.float32

    ref = jax.block_until_ready(reference_model(emb_table, layers, token_ids))
    assert jnp.allclose(out, ref, rtol=1e-2, atol=1e-2), \
        float(jnp.max(jnp.abs(out - ref)))

    print("KERNEL_OK")
</pallas_src>

<mosaic_0001>
module attributes {stable_mosaic.version = 11 : i64} {
  func.func @_fused_mlp_kernel(%arg0: i32, %arg1: memref<86xi32, #tpu.memory_space<smem>>, %arg2: memref<5x86xi32, #tpu.memory_space<smem>>, %arg3: memref<8x1024xf32, #tpu.memory_space<vmem>>, %arg4: memref<1x1024x1024xbf16, #tpu.memory_space<vmem>>, %arg5: memref<1x1x1024xf32, #tpu.memory_space<vmem>>, %arg6: memref<8x512xf32, #tpu.memory_space<vmem>>, %arg7: memref<16x8x1024xf32, #tpu.memory_space<vmem>>, %arg8: memref<8x1024xf32, #tpu.memory_space<vmem>>) attributes {dimension_semantics = [#tpu.dimension_semantics<arbitrary>], iteration_bounds = array<i64: 86>, scalar_prefetch = 2 : i64, scratch_operands = 2 : i64, tpu.core_type = #tpu.core_type<tc>, window_params = [{pipeline_mode = #tpu.pipeline_mode<synchronous>, transform_indices = @transform_0, window_bounds = array<i64: 8, 1024>}, {transform_indices = @transform_1, window_bounds = array<i64: 1, 1024, 1024>}, {transform_indices = @transform_2, window_bounds = array<i64: 1, 1, 1024>}, {pipeline_mode = #tpu.pipeline_mode<synchronous>, transform_indices = @transform_3, window_bounds = array<i64: 8, 512>}]} {
    %c0_i32 = arith.constant 0 : i32
    %0 = arith.cmpi eq, %arg0, %c0_i32 : i32
    %1 = arith.extui %0 : i1 to i32
    %c0_i32_0 = arith.constant 0 : i32
    %2 = arith.cmpi ne, %1, %c0_i32_0 : i32
    scf.if %2 {
      %c0_15 = arith.constant 0 : index
      %c0_16 = arith.constant 0 : index
      %36 = vector.load %arg3[%c0_15, %c0_16] : memref<8x1024xf32, #tpu.memory_space<vmem>>, vector<8x1024xf32>
      %c0_17 = arith.constant 0 : index
      %c0_18 = arith.constant 0 : index
      %c0_19 = arith.constant 0 : index
      %37 = vector.load %arg7[%c0_17, %c0_18, %c0_19] : memref<16x8x1024xf32, #tpu.memory_space<vmem>>, vector<1x8x1024xf32>
      %38 = vector.shape_cast %37 : vector<1x8x1024xf32> to vector<8x1024xf32>
      %39 = vector.shape_cast %36 : vector<8x1024xf32> to vector<1x8x1024xf32>
      tpu.vector_store %arg7[%c0_17, %c0_18, %c0_19], %39 {strides = array<i32>} : memref<16x8x1024xf32, #tpu.memory_space<vmem>>, vector<1x8x1024xf32>,
    } else {
    }
    %c0 = arith.constant 0 : index
    %3 = arith.index_cast %arg0 : i32 to index
    %4 = memref.load %arg2[%c0, %3] : memref<5x86xi32, #tpu.memory_space<smem>>
    %c1 = arith.constant 1 : index
    %5 = arith.index_cast %arg0 : i32 to index
    %6 = memref.load %arg2[%c1, %5] : memref<5x86xi32, #tpu.memory_space<smem>>
    %c2 = arith.constant 2 : index
    %7 = arith.index_cast %arg0 : i32 to index
    %8 = memref.load %arg2[%c2, %7] : memref<5x86xi32, #tpu.memory_space<smem>>
    %c3 = arith.constant 3 : index
    %9 = arith.index_cast %arg0 : i32 to index
    %10 = memref.load %arg2[%c3, %9] : memref<5x86xi32, #tpu.memory_space<smem>>
    %c4 = arith.constant 4 : index
    %11 = arith.index_cast %arg0 : i32 to index
    %12 = memref.load %arg2[%c4, %11] : memref<5x86xi32, #tpu.memory_space<smem>>
    %13 = arith.index_cast %4 : i32 to index
    %c0_1 = arith.constant 0 : index
    %c0_2 = arith.constant 0 : index
    %14 = vector.load %arg7[%13, %c0_1, %c0_2] : memref<16x8x1024xf32, #tpu.memory_space<vmem>>, vector<1x8x1024xf32>
    %15 = vector.shape_cast %14 : vector<1x8x1024xf32> to vector<8x1024xf32>
    %16 = arith.truncf %15 : vector<8x1024xf32> to vector<8x1024xbf16>
    %c0_3 = arith.constant 0 : index
    %c0_4 = arith.constant 0 : index
    %c0_5 = arith.constant 0 : index
    %17 = vector.load %arg4[%c0_3, %c0_4, %c0_5] : memref<1x1024x1024xbf16, #tpu.memory_space<vmem>>, vector<1x1024x1024xbf16>
    %18 = vector.shape_cast %17 : vector<1x1024x1024xbf16> to vector<1024x1024xbf16>
    %cst = arith.constant dense<0.000000e+00> : vector<8x1024xf32>
    %19 = tpu.matmul %16, %18, %cst {dimension_numbers = #tpu.dot_dimension_numbers<[1], [0], [0], [1], [0, 0, 1, 1], [], []>} : vector<8x1024xbf16>, vector<1024x1024xbf16>, vector<8x1024xf32> -> vector<8x1024xf32>
    %c1_i32 = arith.constant 1 : i32
    %20 = arith.cmpi eq, %8, %c1_i32 : i32
    %21 = arith.extui %20 : i1 to i32
    %c0_i32_6 = arith.constant 0 : i32
    %22 = arith.cmpi ne, %21, %c0_i32_6 : i32
    scf.if %22 {
      %c0_15 = arith.constant 0 : index
      %c0_16 = arith.constant 0 : index
      %36 = vector.load %arg8[%c0_15, %c0_16] : memref<8x1024xf32, #tpu.memory_space<vmem>>, vector<8x1024xf32>
      tpu.vector_store %arg8[%c0_15, %c0_16], %19 {strides = array<i32>} : memref<8x1024xf32, #tpu.memory_space<vmem>>, vector<8x1024xf32>,
    } else {
    }
    %c0_i32_7 = arith.constant 0 : i32
    %23 = arith.cmpi eq, %8, %c0_i32_7 : i32
    %24 = arith.extui %23 : i1 to i32
    %c0_i32_8 = arith.constant 0 : i32
    %25 = arith.cmpi ne, %24, %c0_i32_8 : i32
    scf.if %25 {
      %c0_15 = arith.constant 0 : index
      %c0_16 = arith.constant 0 : index
      %36 = vector.load %arg8[%c0_15, %c0_16] : memref<8x1024xf32, #tpu.memory_space<vmem>>, vector<8x1024xf32>
      %37 = arith.addf %36, %19 : vector<8x1024xf32>
      %c0_17 = arith.constant 0 : index
      %c0_18 = arith.constant 0 : index
      %38 = vector.load %arg8[%c0_17, %c0_18] : memref<8x1024xf32, #tpu.memory_space<vmem>>, vector<8x1024xf32>
      tpu.vector_store %arg8[%c0_17, %c0_18], %37 {strides = array<i32>} : memref<8x1024xf32, #tpu.memory_space<vmem>>, vector<8x1024xf32>,
    } else {
    }
    %c1_i32_9 = arith.constant 1 : i32
    %26 = arith.cmpi eq, %10, %c1_i32_9 : i32
    %c0_i32_10 = arith.constant 0 : i32
    %27 = arith.cmpi eq, %12, %c0_i32_10 : i32
    %28 = arith.andi %26, %27 : i1
    %29 = arith.extui %28 : i1 to i32
    %c0_i32_11 = arith.constant 0 : i32
    %30 = arith.cmpi ne, %29, %c0_i32_11 : i32
    scf.if %30 {
      %c0_15 = arith.constant 0 : index
      %c0_16 = arith.constant 0 : index
      %36 = vector.load %arg8[%c0_15, %c0_16] : memref<8x1024xf32, #tpu.memory_space<vmem>>, vector<8x1024xf32>
      %c0_17 = arith.constant 0 : index
      %c0_18 = arith.constant 0 : index
      %c0_19 = arith.constant 0 : index
      %37 = vector.load %arg5[%c0_17, %c0_18, %c0_19] : memref<1x1x1024xf32, #tpu.memory_space<vmem>>, vector<1x1x1024xf32>
      %38 = vector.shape_cast %37 : vector<1x1x1024xf32> to vector<1x1024xf32>
      %39 = vector.broadcast %38 : vector<1x1024xf32> to vector<8x1024xf32>
      %40 = arith.addf %36, %39 : vector<8x1024xf32>
      %cst_20 = arith.constant 0.000000e+00 : f32
      %41 = vector.broadcast %cst_20 : f32 to vector<8x1024xf32>
      %42 = arith.maximumf %40, %41 : vector<8x1024xf32>
      %43 = arith.index_cast %6 : i32 to index
      %c0_21 = arith.constant 0 : index
      %c0_22 = arith.constant 0 : index
      %44 = vector.load %arg7[%43, %c0_21, %c0_22] : memref<16x8x1024xf32, #tpu.memory_space<vmem>>, vector<1x8x1024xf32>
      %45 = vector.shape_cast %44 : vector<1x8x1024xf32> to vector<8x1024xf32>
      %46 = vector.shape_cast %42 : vector<8x1024xf32> to vector<1x8x1024xf32>
      tpu.vector_store %arg7[%43, %c0_21, %c0_22], %46 {strides = array<i32>} : memref<16x8x1024xf32, #tpu.memory_space<vmem>>, vector<1x8x1024xf32>,
    } else {
    }
    %c1_i32_12 = arith.constant 1 : i32
    %31 = arith.cmpi eq, %10, %c1_i32_12 : i32
    %c1_i32_13 = arith.constant 1 : i32
    %32 = arith.cmpi eq, %12, %c1_i32_13 : i32
    %33 = arith.andi %31, %32 : i1
    %34 = arith.extui %33 : i1 to i32
    %c0_i32_14 = arith.constant 0 : i32
    %35 = arith.cmpi ne, %34, %c0_i32_14 : i32
    scf.if %35 {
      %c0_15 = arith.constant 0 : index
      %c0_16 = arith.constant 0 : index
      %36 = vector.load %arg8[%c0_15, %c0_16] : memref<8x1024xf32, #tpu.memory_space<vmem>>, vector<8x1024xf32>
      %c0_17 = arith.constant 0 : index
      %c0_18 = arith.constant 0 : index
      %c0_19 = arith.constant 0 : index
      %37 = vector.load %arg5[%c0_17, %c0_18, %c0_19] : memref<1x1x1024xf32, #tpu.memory_space<vmem>>, vector<1x1x1024xf32>
      %38 = vector.shape_cast %37 : vector<1x1x1024xf32> to vector<1x1024xf32>
      %39 = vector.broadcast %38 : vector<1x1024xf32> to vector<8x1024xf32>
      %40 = arith.addf %36, %39 : vector<8x1024xf32>
      %41 = math.tanh %40 : vector<8x1024xf32>
      %42 = vector.extract_strided_slice %41 {offsets = [0, 0], sizes = [8, 512], strides = [1, 1]} : vector<8x1024xf32> to vector<8x512xf32>
      %c0_20 = arith.constant 0 : index
      %c0_21 = arith.constant 0 : index
      %43 = vector.load %arg6[%c0_20, %c0_21] : memref<8x512xf32, #tpu.memory_space<vmem>>, vector<8x512xf32>
      tpu.vector_store %arg6[%c0_20, %c0_21], %42 {strides = array<i32>} : memref<8x512xf32, #tpu.memory_space<vmem>>, vector<8x512xf32>,
    } else {
    }
    return
  }
  func.func @transform_0(%arg0: i32, %arg1: memref<86xi32, #tpu.memory_space<smem>>, %arg2: memref<5x86xi32, #tpu.memory_space<smem>>) -> (i32, i32) {
    %c0_i32 = arith.constant 0 : i32
    %c0_i32_0 = arith.constant 0 : i32
    %c0_i32_1 = arith.constant 0 : i32
    return %c0_i32, %c0_i32_0 : i32, i32
  }
  func.func @transform_1(%arg0: i32, %arg1: memref<86xi32, #tpu.memory_space<smem>>, %arg2: memref<5x86xi32, #tpu.memory_space<smem>>) -> (i32, i32, i32) {
    %c0_i32 = arith.constant 0 : i32
    %c0_i32_0 = arith.constant 0 : i32
    %c0_i32_1 = arith.constant 0 : i32
    return %arg0, %c0_i32, %c0_i32_0 : i32, i32, i32
  }
  func.func @transform_2(%arg0: i32, %arg1: memref<86xi32, #tpu.memory_space<smem>>, %arg2: memref<5x86xi32, #tpu.memory_space<smem>>) -> (i32, i32, i32) {
    %0 = arith.index_cast %arg0 : i32 to index
    %1 = memref.load %arg1[%0] : memref<86xi32, #tpu.memory_space<smem>>
    %c0_i32 = arith.constant 0 : i32
    %c0_i32_0 = arith.constant 0 : i32
    %c0_i32_1 = arith.constant 0 : i32
    return %1, %c0_i32, %c0_i32_0 : i32, i32, i32
  }
  func.func @transform_3(%arg0: i32, %arg1: memref<86xi32, #tpu.memory_space<smem>>, %arg2: memref<5x86xi32, #tpu.memory_space<smem>>) -> (i32, i32) {
    %c0_i32 = arith.constant 0 : i32
    %c0_i32_0 = arith.constant 0 : i32
    %c0_i32_1 = arith.constant 0 : i32
    return %c0_i32, %c0_i32_0 : i32, i32
  }
}

</mosaic_0001>

<bundles_post_ra>
// kernel: simple_embedding_model.1
= control target key start
LH: loop header
LB: loop body
LE: loop exit
PB: predicated region body
PF: predicated region fallthrough
CT: control target
= control target key end

     0   :  { %s7225_s24 = smov [#allocation5]   ;;  %s7226_s25 = smov [#allocation6]   ;;  %s8669_s0 = inlined_call_operand.hbm [shape: s32[86], index: 0, kind: input, shape index: {}]   ;;  %s8670_s2 = inlined_call_operand.vmem [shape: f32[8,1024], index: 2, kind: input, shape index: {}]   ;;  %s8671_s3 = inlined_call_operand.hbm [shape: bf16[86,1024,1024], index: 3, kind: input, shape index: {}]   ;;  %s8672_s4 = inlined_call_operand.hbm [shape: f32[23,1,1024], index: 4, kind: input, shape index: {}]   ;;  %s8673_s5 = inlined_call_operand.vmem [shape: f32[8,512], index: 5, kind: output, shape index: {}]   ;;  %s8674_s1 = inlined_call_operand.hbm [shape: s32[5,86], index: 1, kind: input, shape index: {}]  }
   0x1   :  { %8675 = sst [smem:[#allocation16_spill]] %s8671_s3  ;;  %s11_s20 = sshll.u32 %s8669_s0, 4  ;;  %s12_s20 = int_to_ptr.hbm [resolvable:$true] %s11_s20 }
   0x2   :  { %s16_s23 = sshll.u32 %s8674_s1, 4  ;;  %s17_s23 = int_to_ptr.hbm [resolvable:$true] %s16_s23 }
   0x3   :  { %14 = dma.hbm_to_smem %s12_s20, 16, %s7225_s24, [#allocation4] }
   0x4   :  { %19 = dma.hbm_to_smem %s17_s23, 128, %s7226_s25, [#allocation4] }
   0x5   :  { %7187 = dma.done.wait [#allocation4], 144 }
   0x6   :  { %7188 = vsyncadd [#allocation4], 4294967152 }
   0x7   :  { %22 = sfence }
   0x8   :  { %23 = vsyncpa [#allocation8], 0 }
   0x9   :  { %25 = vsyncpa [#allocation8 + $0x1], 0 }
   0xa   :  { %26 = vsyncpa [#allocation10], 0 }
   0xb   :  { %28 = vsyncpa [#allocation10 + $0x1], 0  ;;  %s7265_s26 = smov 0   ;;  %s7267_s0 = smov 0  }
   0xc   :  { %s7269_s27 = smov 0   ;;  %s7271_s1 = smov 0  }
   0xd   :  { %s7273_s28 = smov 0   ;;  %s7275_s29 = smov 0  }
   0xe   :  { %s7277_s30 = smov 0  }
   0xf LB: > { %s7301_s6 = sadd.s32 1, %s7223_s30   ;;  %s62_s7 = sadd.s32 1, %s7219_s29  ;;  %s7223_s30 = sphi %s7277_s30, %s8688_s30   ;;  %s7219_s29 = sphi %s7275_s29, %s8687_s29   ;;  %s7215_s28 = sphi %s7273_s28, %s8686_s28   ;;  %s7211_s1 = sphi %s7271_s1, %s8685_s1   ;;  %s7207_s27 = sphi %s7269_s27, %s8684_s27   ;;  %s7203_s0 = sphi %s7267_s0, %s8683_s0   ;;  %s7199_s26 = sphi %s7265_s26, %s8682_s26  }
  0x10   : > { %s59_s8 = ssub.s32 %s7223_s30, %s7301_s6  ;;  %p69_p0 = scmp.ne.s32.totalorder %s7219_s29, %s7215_s28 }
  0x11   : > { %p60_p1 = scmp.eq.s32.totalorder %s59_s8, 0  ;;  %p70_p2 = scmp.eq.s32.totalorder %s7223_s30, 0 }
  0x12   : > { %p75_p3 = scmp.ne.s32.totalorder %s7215_s28, %s7211_s1  ;;  %p7006_p5 = scmp.lt.s32.totalorder %s7223_s30, 86 }
  0x13   : > { %s7312_s9 = scalar_select %p60_p1, %s7219_s29, %s62_s7  }
  0x14   : > { %p71_p4 = por %p70_p2, %p69_p0  ;;  %s151_s10 = sand.u32 1, %s7219_s29  }
  0x15   : > { %s6468_s11 = sshll.u32 %s7223_s30, 12  ;;  %s4399_s12 = sshll.u32 %s151_s10, 12 }
  0x16   : > { %s8676_s3 = sld [smem:[#allocation16_spill]]  ;;  %s155_s17 = scalar_lea.vmem [#allocation7], %s4399_s12 }
  0x17   : > { %s163_s18 = sshll.u32 %s155_s17, 4  ;;  %p7324_p6 = pnand %p7006_p5, %p71_p4  ;;  %s164_s18 = int_to_ptr.vmem [resolvable:$true] %s163_s18 }
  0x18   : > { %p4404_p7 = scmp.ge.s32.totalorder %s7223_s30, 1  ;;  %p191_p8 = scmp.lt.s32.totalorder %s7223_s30, 87 }
  0x19   : > { %s152_s20 = scalar_lea.sflag [#allocation8], %s151_s10  ;;  %p7103_p10 = pneg %p7324_p6 }
  0x1c   : > { %s160_s15 = scalar_lea.hbm %s8676_s3, %s6468_s11  ;;  %s7106_s25 = scalar_lea.hbm %s8676_s3, 352256 }
  0x1d   : > { %s161_s16 = sshll.u32 %s160_s15, 4  ;;  %s162_s16 = int_to_ptr.hbm [resolvable:$true] %s161_s16 }
  0x1e   : > { %s7099_s21 = sshra.s32 %s162_s16, 4  ;;  %s7100_s21 = int_to_ptr.hbm [resolvable:$true] %s7099_s21 }
  0x1f   : > { %s7101_s22 = scalar_lea.hbm %s7100_s21, 4096  ;;  %p7107_p13 = scmp.lt.s32.totalorder %s7100_s21, %s8676_s3 }
  0x20   : > { %p7102_p9 = scmp.ne.s32.totalorder %s7100_s21, %s7101_s22  ;;  %p7108_p0 = scmp.lt.s32.totalorder %s7106_s25, %s7101_s22 }
  0x22   : > { %p7104_p11 = pnand %p7103_p10, %p7102_p9  ;;  %p7109_p1 = por %p7108_p0, %p7107_p13 }
  0x24   : > { %p7105_p12 = pneg %p7104_p11 }
  0x26   : > { %p7110_p4 = pnand %p7109_p1, %p7105_p12 }
  0x28   : > { %7113 = shalt.err (!%p7110_p4)
}
  0x29   : > { %s7227_s10 = smov 512   ;;  %s7228_s11 = smov 32  }
  0x2a   : > { %7000 = dma.hbm_to_vmem [thread:$0]  (!%p7324_p6), %s162_s16, 65536, %s164_s18, %s152_s20, %s7227_s10, %s7227_s10, %s7228_s11  }
  0x2b   : > { %p7344_p9 = pnand %p4404_p7, %p191_p8  ;;  %s7349_s13 = sadd.s32 4294967295, %s7223_s30  }
  0x2c   : > { %p76_p10 = scmp.eq.s32.totalorder %s7349_s13, 0  ;;  %s85_s14 = sld [smem:[#allocation5 + %s7223_s30]] }
  0x2d   : > { %s86_s15 = sld [smem:[#allocation5 + %s7301_s6]]  ;;  %p97_p6 = scmp.ne.s32.totalorder %s7207_s27, %s7203_s0 }
  0x2e   : > { %p7357_p11 = por %p76_p10, %p75_p3  ;;  %p103_p7 = scmp.ne.s32.totalorder %s7203_s0, %s7199_s26 }
  0x2f   : > { %s173_s17 = sand.u32 1, %s7207_s27   ;;  %p99_p8 = por %p97_p6, %p70_p2 }
  0x30   : > { %p7368_p12 = por %p103_p7, %p76_p10  ;;  %s90_s19 = sadd.s32 1, %s7207_s27 }
  0x31   : > { %s4402_s21 = sshll.u32 %s173_s17, 3  ;;  %p7375_p0 = pnand %p7006_p5, %p99_p8 }
  0x32   : > { %s6992_s22 = scalar_select %p99_p8, [#allocation5], [#allocation11] }
  0x33   : > { %s87_s20 = ssub.s32 %s85_s14, %s86_s15  ;;  %s177_s25 = scalar_lea.vmem [#allocation9], %s4402_s21 }
  0x34   : > { %p88_p13 = scmp.eq.s32.totalorder %s87_s20, 0  ;;  %s8690_s22 = smov (!%p7006_p5, %s6992_s22), [#allocation12] }
  0x35   : > { %s6993_s26 = scalar_select %p99_p8, %s7223_s30, 0 }
  0x36   : > { %s7380_s23 = scalar_select %p88_p13, %s7207_s27, %s90_s19  }
  0x37   : > { %s8692_s26 = smov (!%p7006_p5, %s6993_s26), 0  ;;  %s186_s7 = sshll.u32 %s177_s25, 4  ;;  %s187_s7 = int_to_ptr.vmem [resolvable:$true] %s186_s7 }
  0x38   : > { %s178_s24 = sld [smem:[%s8690_s22 + %s8692_s26]]  ;;  %s174_s20 = scalar_lea.sflag [#allocation10], %s173_s17 }
  0x39   : > { %p7133_p3 = pneg %p7375_p0  ;;  %s7136_s22 = scalar_lea.hbm %s8672_s4, 184 }
  0x3e   : > { %s4403_s8 = sshll.u32 %s178_s24, 3 }
  0x3f   : > { %s182_s14 = scalar_lea.hbm %s8672_s4, %s4403_s8 }
  0x40   : > { %s184_s15 = sshll.u32 %s182_s14, 4  ;;  %s185_s15 = int_to_ptr.hbm [resolvable:$true] %s184_s15 }
  0x41   : > { %s7129_s19 = sshra.s32 %s185_s15, 4  ;;  %s7130_s19 = int_to_ptr.hbm [resolvable:$true] %s7129_s19 }
  0x42   : > { %s7131_s3 = scalar_lea.hbm %s7130_s19, 8  ;;  %p7137_p4 = scmp.lt.s32.totalorder %s7130_s19, %s8672_s4 }
  0x43   : > { %p7132_p2 = scmp.ne.s32.totalorder %s7130_s19, %s7131_s3  ;;  %p7138_p10 = scmp.lt.s32.totalorder %s7136_s22, %s7131_s3 }
  0x45   : > { %p7134_p1 = pnand %p7133_p3, %p7132_p2  ;;  %p7139_p6 = por %p7138_p10, %p7137_p4 }
  0x47   : > { %p7135_p5 = pneg %p7134_p1 }
  0x49   : > { %p7140_p7 = pnand %p7139_p6, %p7135_p5 }
  0x4b   : > { %7143 = shalt.err (!%p7140_p7)
}
  0x4c   : > { %7005 = dma.hbm_to_vmem [thread:$0]  (!%p7375_p0), %s185_s15, 128, %s187_s7, %s174_s20  }
  0x4d   : > { %195 = sbr.rel (%p7344_p9) target bundleno = 1095 (0x447), region = 32  ;;  %s197_s17 = sand.u32 (!%p7344_p9), 1, %s7215_s28  }
  0x4e   : > { %s4405_s25 = sshll.u32 (!%p7344_p9), %s197_s17, 12  ;;  %s198_s8 = scalar_lea.sflag (!%p7344_p9), [#allocation8], %s197_s17 }
  0x4f   : > { %s7403_s10 = scalar_lea.vmem (!%p7344_p9), [#allocation7], %s4405_s25 }
  0x52   : > { %7190 = dma.done.wait (%p7357_p11), %s198_s8, 65536  }
  0x53   : > { %7192 = vsyncadd (%p7357_p11), %s198_s8, 4294901760  ;;  %s207_s3 = sand.u32 1, %s7203_s0  }
  0x54   : > { %s7410_s1 = sshll.u32 %s207_s3, 3  ;;  %s208_s12 = scalar_lea.sflag [#allocation10], %s207_s3 }
  0x55   : > { %s211_s7 = scalar_lea.vmem [#allocation9], %s7410_s1 }
  0x56   : > { %7194 = dma.done.wait (%p7368_p12), %s208_s12, 128  }
  0x57   : > { %7196 = vsyncadd (%p7368_p12), %s208_s12, 4294967168  ;;  %p4407_p9 = scmp.ne.s32.totalorder %s7349_s13, 0 }
  0x59   : > { %239 = sbr.rel (%p4407_p9) target bundleno = 103 (0x67), region = 44 }
  0x5e   : > { %v240_v0 = vld [vmem:[%s8670_s2] sm:$0xff]  ;;  %v241_v1 = vld [vmem:[%s8670_s2 + $0x8] sm:$0xff]  ;;  %v242_v2 = vld [vmem:[%s8670_s2 + $0x10] sm:$0xff] }
  0x5f   : > { %248 = vst [vmem:[#allocation2] sm:$0xff] %v240_v0  ;;  %v243_v3 = vld [vmem:[%s8670_s2 + $0x18] sm:$0xff]  ;;  %v244_v4 = vld [vmem:[%s8670_s2 + $0x20] sm:$0xff]  ;;  %v245_v5 = vld [vmem:[%s8670_s2 + $0x28] sm:$0xff] }
  0x60   : > { %249 = vst [vmem:[#allocation2 + $0x8] sm:$0xff] %v241_v1  ;;  %v246_v6 = vld [vmem:[%s8670_s2 + $0x30] sm:$0xff]  ;;  %v247_v7 = vld [vmem:[%s8670_s2 + $0x38] sm:$0xff] }
  0x61   : > { %250 = vst [vmem:[#allocation2 + $0x10] sm:$0xff] %v242_v2 }
  0x62   : > { %251 = vst [vmem:[#allocation2 + $0x18] sm:$0xff] %v243_v3 }
  0x63   : > { %252 = vst [vmem:[#allocation2 + $0x20] sm:$0xff] %v244_v4 }
  0x64   : > { %253 = vst [vmem:[#allocation2 + $0x28] sm:$0xff] %v245_v5 }
  0x65   : > { %254 = vst [vmem:[#allocation2 + $0x30] sm:$0xff] %v246_v6 }
  0x66   : > { %255 = vst [vmem:[#allocation2 + $0x38] sm:$0xff] %v247_v7 }
  0x67 PF: > { %s257_s12 = sshra.s32 %s7349_s13, 7  ;;  %s7444_s11 = sand.u32 127, %s7349_s13  ;;  %v4640_v8 = vld [vmem:[%s7403_s10 + $0x1c0] sm:$0xf] }
  0x68   : > { %v6538_v9 = vld [vmem:[%s7403_s10 + $0x1dc] sm:$0xf0]  ;;  %s7448_s14 = sshll.u32 %s257_s12, 7  ;;  %s7517_s8 = sld [smem:[#allocation6 + %s7349_s13]] }
  0x69   : > { %v4641_v10 = vor.u32 %v6538_v9, %v4640_v8  ;;  %v4896_v11 = vld [vmem:[%s7403_s10 + $0x3c0] sm:$0xf]  ;;  %s6470_s16 = sadd.s32 128, %s7448_s14  ;;  %s6472_s15 = sadd.s32 256, %s7448_s14 }
  0x6a   : > { %v6602_v12 = vld [vmem:[%s7403_s10 + $0x3dc] sm:$0xf0]  ;;  %s263_s20 = sadd.s32 %s6470_s16, %s7444_s11  ;;  %s267_s19 = sadd.s32 %s6472_s15, %s7444_s11 }
  0x6b   : > { %v4897_v13 = vor.u32 %v6602_v12, %v4896_v11  ;;  %v5152_v14 = vld [vmem:[%s7403_s10 + $0x5c0] sm:$0xf]  ;;  %3368 = vmatpush.bf16.msra.mxu0 %v4641_v10  ;;  %s7461_s30 = sld [smem:[#allocation6 + %s263_s20]]  ;;  %s6474_s21 = sadd.s32 384, %s7448_s14 }
  0x6c   : > { %v6666_v15 = vld [vmem:[%s7403_s10 + $0x5dc] sm:$0xf0]  ;;  %s7466_s18 = sld [smem:[#allocation6 + %s267_s19]]  ;;  %s271_s22 = sadd.s32 %s6474_s21, %s7444_s11 }
  0x6d   : > { %v5153_v16 = vor.u32 %v6666_v15, %v5152_v14  ;;  %v5408_v17 = vld [vmem:[%s7403_s10 + $0x7c0] sm:$0xf]  ;;  %3381 = vmatpush.bf16.msra.mxu1 %v4897_v13  ;;  %s7471_s26 = sld [smem:[#allocation6 + %s271_s22]]  ;;  %s6476_s24 = sadd.s32 512, %s7448_s14 }
  0x6e   : > { %v6730_v18 = vld [vmem:[%s7403_s10 + $0x7dc] sm:$0xf0]  ;;  %s275_s17 = sadd.s32 %s6476_s24, %s7444_s11  ;;  %s6477_s13 = sshll.u32 %s7517_s8, 6 }
  0x6f   : > { %v4608_v19 = vld [vmem:[%s7403_s10 + $0x180] sm:$0xf]  ;;  %v5409_v20 = vor.u32 %v6730_v18, %v5408_v17  ;;  %3394 = vmatpush.bf16.msra.mxu2 %v5153_v16  ;;  %s7480_s25 = sld [smem:[#allocation6 + %s275_s17]]  ;;  %s7560_s3 = scalar_lea.vmem [#allocation2], %s6477_s13 }
  0x70   : > { %v6530_v21 = vld [vmem:[%s7403_s10 + $0x19c] sm:$0xf0] }
  0x71   : > { %v4864_v22 = vld [vmem:[%s7403_s10 + $0x380] sm:$0xf]  ;;  %v4609_v23 = vor.u32 %v6530_v21, %v4608_v19  ;;  %3407 = vmatpush.bf16.msra.mxu3 %v5409_v20 }
  0x72   : > { %v6594_v24 = vld [vmem:[%s7403_s10 + $0x39c] sm:$0xf0]  ;;  %p6462_p11 = scmp.ne.s32.totalorder %s7466_s18, 1 }
  0x73   : > { %v5120_v25 = vld [vmem:[%s7403_s10 + $0x580] sm:$0xf]  ;;  %v4865_v26 = vor.u32 %v6594_v24, %v4864_v22  ;;  %3369 = vmatpush.bf16.msra.mxu0 %v4609_v23 }
  0x74   : > { %v6658_v27 = vld [vmem:[%s7403_s10 + $0x59c] sm:$0xf0] }
  0x75   : > { %v5376_v28 = vld [vmem:[%s7403_s10 + $0x780] sm:$0xf]  ;;  %v5121_v29 = vor.u32 %v6658_v27, %v5120_v25  ;;  %3382 = vmatpush.bf16.msra.mxu1 %v4865_v26 }
  0x76   : > { %v6722_v30 = vld [vmem:[%s7403_s10 + $0x79c] sm:$0xf0] }
  0x77   : > { %v4576_v31 = vld [vmem:[%s7403_s10 + $0x140] sm:$0xf]  ;;  %v5377_v33 = vor.u32 %v6722_v30, %v5376_v28  ;;  %3395 = vmatpush.bf16.msra.mxu2 %v5121_v29 }
  0x78   : > { %v6522_v32 = vld [vmem:[%s7403_s10 + $0x15c] sm:$0xf0] }
  0x79   : > { %v4577_v34 = vor.u32 %v6522_v32, %v4576_v31  ;;  %v4832_v35 = vld [vmem:[%s7403_s10 + $0x340] sm:$0xf]  ;;  %3408 = vmatpush.bf16.msra.mxu3 %v5377_v33 }
  0x7a   : > { %v6586_v36 = vld [vmem:[%s7403_s10 + $0x35c] sm:$0xf0] }
  0x7b   : > { %v4833_v37 = vor.u32 %v6586_v36, %v4832_v35  ;;  %v5088_v38 = vld [vmem:[%s7403_s10 + $0x540] sm:$0xf]  ;;  %3370 = vmatpush.bf16.msra.mxu0 %v4577_v34 }
  0x7c   : > { %v6650_v39 = vld [vmem:[%s7403_s10 + $0x55c] sm:$0xf0] }
  0x7d   : > { %v5344_v40 = vld [vmem:[%s7403_s10 + $0x740] sm:$0xf]  ;;  %v5089_v41 = vor.u32 %v6650_v39, %v5088_v38  ;;  %3383 = vmatpush.bf16.msra.mxu1 %v4833_v37 }
  0x7e   : > { %v6714_v42 = vld [vmem:[%s7403_s10 + $0x75c] sm:$0xf0] }
  0x7f   : > { %v4544_v43 = vld [vmem:[%s7403_s10 + $0x100] sm:$0xf]  ;;  %v5345_v45 = vor.u32 %v6714_v42, %v5344_v40  ;;  %3396 = vmatpush.bf16.msra.mxu2 %v5089_v41 }
  0x80   : > { %v6514_v44 = vld [vmem:[%s7403_s10 + $0x11c] sm:$0xf0] }
  0x81   : > { %v4545_v46 = vor.u32 %v6514_v44, %v4544_v43  ;;  %v4800_v47 = vld [vmem:[%s7403_s10 + $0x300] sm:$0xf]  ;;  %3409 = vmatpush.bf16.msra.mxu3 %v5345_v45 }
  0x82   : > { %v6578_v48 = vld [vmem:[%s7403_s10 + $0x31c] sm:$0xf0] }
  0x83   : > { %v5056_v49 = vld [vmem:[%s7403_s10 + $0x500] sm:$0xf]  ;;  %v4801_v50 = vor.u32 %v6578_v48, %v4800_v47  ;;  %3371 = vmatpush.bf16.msra.mxu0 %v4545_v46 }
  0x84   : > { %v6642_v51 = vld [vmem:[%s7403_s10 + $0x51c] sm:$0xf0] }
  0x85   : > { %v5312_v52 = vld [vmem:[%s7403_s10 + $0x700] sm:$0xf]  ;;  %v5057_v54 = vor.u32 %v6642_v51, %v5056_v49  ;;  %3384 = vmatpush.bf16.msra.mxu1 %v4801_v50 }
  0x86   : > { %v6706_v53 = vld [vmem:[%s7403_s10 + $0x71c] sm:$0xf0] }
  0x87   : > { %v4512_v55 = vld [vmem:[%s7403_s10 + $0xc0] sm:$0xf]  ;;  %v5313_v58 = vor.u32 %v6706_v53, %v5312_v52  ;;  %3397 = vmatpush.bf16.msra.mxu2 %v5057_v54 }
  0x88   : > { %v6506_v56 = vld [vmem:[%s7403_s10 + $0xdc] sm:$0xf0] }
  0x89   : > { %v4768_v57 = vld [vmem:[%s7403_s10 + $0x2c0] sm:$0xf]  ;;  %v4513_v62 = vor.u32 %v6506_v56, %v4512_v55  ;;  %3410 = vmatpush.bf16.msra.mxu3 %v5313_v58 }
  0x8a   : > { %v6570_v59 = vld [vmem:[%s7403_s10 + $0x2dc] sm:$0xf0] }
  0x8b   : > { %v5024_v60 = vld [vmem:[%s7403_s10 + $0x4c0] sm:$0xf]  ;;  %v4769_v1 = vor.u32 %v6570_v59, %v4768_v57  ;;  %3372 = vmatpush.bf16.msra.mxu0 %v4513_v62 }
  0x8c   : > { %v6634_v61 = vld [vmem:[%s7403_s10 + $0x4dc] sm:$0xf0] }
  0x8d   : > { %v5280_v63 = vld [vmem:[%s7403_s10 + $0x6c0] sm:$0xf]  ;;  %v5025_v4 = vor.u32 %v6634_v61, %v5024_v60  ;;  %3385 = vmatpush.bf16.msra.mxu1 %v4769_v1 }
  0x8e   : > { %v6698_v0 = vld [vmem:[%s7403_s10 + $0x6dc] sm:$0xf0] }
  0x8f   : > { %v4480_v2 = vld [vmem:[%s7403_s10 + $0x80] sm:$0xf]  ;;  %v5281_v7 = vor.u32 %v6698_v0, %v5280_v63  ;;  %3398 = vmatpush.bf16.msra.mxu2 %v5025_v4 }
  0x90   : > { %v6498_v3 = vld [vmem:[%s7403_s10 + $0x9c] sm:$0xf0] }
  0x91   : > { %v4736_v5 = vld [vmem:[%s7403_s10 + $0x280] sm:$0xf]  ;;  %v4481_v10 = vor.u32 %v6498_v3, %v4480_v2  ;;  %3411 = vmatpush.bf16.msra.mxu3 %v5281_v7 }
  0x92   : > { %v6562_v6 = vld [vmem:[%s7403_s10 + $0x29c] sm:$0xf0] }
  0x93   : > { %v4992_v8 = vld [vmem:[%s7403_s10 + $0x480] sm:$0xf]  ;;  %v4737_v13 = vor.u32 %v6562_v6, %v4736_v5  ;;  %3373 = vmatpush.bf16.msra.mxu0 %v4481_v10 }
  0x94   : > { %v6626_v9 = vld [vmem:[%s7403_s10 + $0x49c] sm:$0xf0] }
  0x95   : > { %v5248_v11 = vld [vmem:[%s7403_s10 + $0x680] sm:$0xf]  ;;  %v4993_v16 = vor.u32 %v6626_v9, %v4992_v8  ;;  %3386 = vmatpush.bf16.msra.mxu1 %v4737_v13 }
  0x96   : > { %v6690_v12 = vld [vmem:[%s7403_s10 + $0x69c] sm:$0xf0] }
  0x97   : > { %v4448_v14 = vld [vmem:[%s7403_s10 + $0x40] sm:$0xf]  ;;  %v5249_v19 = vor.u32 %v6690_v12, %v5248_v11  ;;  %3399 = vmatpush.bf16.msra.mxu2 %v4993_v16 }
  0x98   : > { %v6490_v15 = vld [vmem:[%s7403_s10 + $0x5c] sm:$0xf0] }
  0x99   : > { %v4704_v17 = vld [vmem:[%s7403_s10 + $0x240] sm:$0xf]  ;;  %v4449_v23 = vor.u32 %v6490_v15, %v4448_v14  ;;  %3412 = vmatpush.bf16.msra.mxu3 %v5249_v19  ;;  %v282_v15 = vld [vmem:[%s7560_s3 + $0x10] sm:$0xff] }
  0x9a   : > { %v6554_v18 = vld [vmem:[%s7403_s10 + $0x25c] sm:$0xf0] }
  0x9b   : > { %v4960_v20 = vld [vmem:[%s7403_s10 + $0x440] sm:$0xf]  ;;  %v4705_v27 = vor.u32 %v6554_v18, %v4704_v17  ;;  %3374 = vmatpush.bf16.msra.mxu0 %v4449_v23 }
  0x9c   : > { %v6618_v21 = vld [vmem:[%s7403_s10 + $0x45c] sm:$0xf0] }
  0x9d   : > { %v5216_v22 = vld [vmem:[%s7403_s10 + $0x640] sm:$0xf]  ;;  %v4961_v31 = vor.u32 %v6618_v21, %v4960_v20  ;;  %3387 = vmatpush.bf16.msra.mxu1 %v4705_v27  ;;  %v7566_v20 = vpack.c.bf16 %v282_v15, %v282_v15 }
  0x9e   : > { %v6682_v24 = vld [vmem:[%s7403_s10 + $0x65c] sm:$0xf0] }
  0x9f   : > { %v4416_v25 = vld [vmem:[%s7403_s10] sm:$0xf]  ;;  %v5217_v35 = vor.u32 %v6682_v24, %v5216_v22  ;;  %3400 = vmatpush.bf16.msra.mxu2 %v4961_v31  ;;  %v283_v24 = vld [vmem:[%s7560_s3 + $0x18] sm:$0xff] }
  0xa0   : > { %v6482_v26 = vld [vmem:[%s7403_s10 + $0x1c] sm:$0xf0] }
  0xa1   : > { %v4672_v28 = vld [vmem:[%s7403_s10 + $0x200] sm:$0xf]  ;;  %v4417_v39 = vor.u32 %v6482_v26, %v4416_v25  ;;  %3413 = vmatpush.bf16.msra.mxu3 %v5217_v35 }
  0xa2   : > { %v6546_v29 = vld [vmem:[%s7403_s10 + $0x21c] sm:$0xf0] }
  0xa3   : > { %v4928_v30 = vld [vmem:[%s7403_s10 + $0x400] sm:$0xf]  ;;  %v4673_v43 = vor.u32 %v6546_v29, %v4672_v28  ;;  %3375 = vmatpush.bf16.msra.mxu0 %v4417_v39  ;;  %v7576_v29 = vpack.c.bf16 %v283_v24, %v283_v24 }
  0xa4   : > { %v6610_v32 = vld [vmem:[%s7403_s10 + $0x41c] sm:$0xf0] }
  0xa5   : > { %v5664_v33 = vld [vmem:[%s7403_s10 + $0x9c0] sm:$0xf]  ;;  %v4929_v47 = vor.u32 %v6610_v32, %v4928_v30  ;;  %3388 = vmatpush.bf16.msra.mxu1 %v4673_v43  ;;  %v281_v30 = vld [vmem:[%s7560_s3 + $0x8] sm:$0xff] }
  0xa6   : > { %v6794_v34 = vld [vmem:[%s7403_s10 + $0x9dc] sm:$0xf0] }
  0xa7   : > { %v5184_v36 = vld [vmem:[%s7403_s10 + $0x600] sm:$0xf]  ;;  %v5665_v44 = vor.u32 %v6794_v34, %v5664_v33  ;;  %3401 = vmatpush.bf16.msra.mxu2 %v4929_v47  ;;  %v7581_v34 = vpack.c.bf16 %v281_v30, %v281_v30  ;;  %v4610_v30 = vld [vmem:[%s7403_s10 + $0x1a0] sm:$0xf0] }
  0xa8   : > { %v5920_v37 = vld [vmem:[%s7403_s10 + $0xbc0] sm:$0xf] }
  0xa9   : > { %v6858_v38 = vld [vmem:[%s7403_s10 + $0xbdc] sm:$0xf0]  ;;  %3420 = vmatpush.bf16.msrb.mxu0 %v5665_v44  ;;  %3389 = vmatmul.bf16.vlgmr.msra.gmra.mxu1 %v7581_v34 }
  0xaa   : > { %v6674_v40 = vld [vmem:[%s7403_s10 + $0x61c] sm:$0xf0]  ;;  %v5921_v48 = vor.u32 %v6858_v38, %v5920_v37  ;;  %3402 = vmatmul.bf16.vlgmr.msra.gmra.mxu2 %v7566_v20 }
  0xab   : > { %v6176_v41 = vld [vmem:[%s7403_s10 + $0xdc0] sm:$0xf]  ;;  %v5185_v51 = vor.u32 %v6674_v40, %v5184_v36 }
  0xac   : > { %v6922_v42 = vld [vmem:[%s7403_s10 + $0xddc] sm:$0xf0]  ;;  %3433 = vmatpush.bf16.msrb.mxu1 %v5921_v48 }
  0xad   : > { %v6432_v45 = vld [vmem:[%s7403_s10 + $0xfc0] sm:$0xf]  ;;  %v6177_v52 = vor.u32 %v6922_v42, %v6176_v41  ;;  %3414 = vmatpush.bf16.msra.mxu3 %v5185_v51 }
  0xae   : > { %v6986_v46 = vld [vmem:[%s7403_s10 + $0xfdc] sm:$0xf0] }
  0xaf   : > { %v5632_v49 = vld [vmem:[%s7403_s10 + $0x980] sm:$0xf]  ;;  %v6433_v55 = vor.u32 %v6986_v46, %v6432_v45  ;;  %3446 = vmatpush.bf16.msrb.mxu2 %v6177_v52 }
  0xb0   : > { %v6786_v50 = vld [vmem:[%s7403_s10 + $0x99c] sm:$0xf0]  ;;  %3415 = vmatmul.bf16.vlgmr.msra.gmra.mxu3 %v7576_v29 }
  0xb1   : > { %v5888_v53 = vld [vmem:[%s7403_s10 + $0xb80] sm:$0xf]  ;;  %v5633_v58 = vor.u32 %v6786_v50, %v5632_v49  ;;  %3459 = vmatpush.bf16.msrb.mxu3 %v6433_v55 }
  0xb2   : > { %v6850_v54 = vld [vmem:[%s7403_s10 + $0xb9c] sm:$0xf0] }
  0xb3   : > { %v6144_v56 = vld [vmem:[%s7403_s10 + $0xd80] sm:$0xf]  ;;  %v5889_v61 = vor.u32 %v6850_v54, %v5888_v53  ;;  %3421 = vmatpush.bf16.msrb.mxu0 %v5633_v58 }
  0xb4   : > { %v6914_v57 = vld [vmem:[%s7403_s10 + $0xd9c] sm:$0xf0] }
  0xb5   : > { %v6400_v59 = vld [vmem:[%s7403_s10 + $0xf80] sm:$0xf]  ;;  %v6145_v0 = vor.u32 %v6914_v57, %v6144_v56  ;;  %3434 = vmatpush.bf16.msrb.mxu1 %v5889_v61 }
  0xb6   : > { %v6978_v60 = vld [vmem:[%s7403_s10 + $0xf9c] sm:$0xf0] }
  0xb7   : > { %v5600_v62 = vld [vmem:[%s7403_s10 + $0x940] sm:$0xf]  ;;  %v6401_v3 = vor.u32 %v6978_v60, %v6400_v59  ;;  %3447 = vmatpush.bf16.msrb.mxu2 %v6145_v0 }
  0xb8   : > { %v6778_v63 = vld [vmem:[%s7403_s10 + $0x95c] sm:$0xf0] }
  0xb9   : > { %v5856_v1 = vld [vmem:[%s7403_s10 + $0xb40] sm:$0xf]  ;;  %v5601_v6 = vor.u32 %v6778_v63, %v5600_v62  ;;  %3460 = vmatpush.bf16.msrb.mxu3 %v6401_v3 }
  0xba   : > { %v6842_v2 = vld [vmem:[%s7403_s10 + $0xb5c] sm:$0xf0] }
  0xbb   : > { %v6112_v4 = vld [vmem:[%s7403_s10 + $0xd40] sm:$0xf]  ;;  %v5857_v9 = vor.u32 %v6842_v2, %v5856_v1  ;;  %3422 = vmatpush.bf16.msrb.mxu0 %v5601_v6 }
  0xbc   : > { %v6906_v5 = vld [vmem:[%s7403_s10 + $0xd5c] sm:$0xf0] }
  0xbd   : > { %v6368_v7 = vld [vmem:[%s7403_s10 + $0xf40] sm:$0xf]  ;;  %v6113_v12 = vor.u32 %v6906_v5, %v6112_v4  ;;  %3435 = vmatpush.bf16.msrb.mxu1 %v5857_v9  ;;  %v6534_v9 = vld [vmem:[%s7403_s10 + $0x1c4] sm:$0xf] }
  0xbe   : > { %v6970_v8 = vld [vmem:[%s7403_s10 + $0xf5c] sm:$0xf0] }
  0xbf   : > { %v5568_v10 = vld [vmem:[%s7403_s10 + $0x900] sm:$0xf]  ;;  %v6369_v16 = vor.u32 %v6970_v8, %v6368_v7  ;;  %3448 = vmatpush.bf16.msrb.mxu2 %v6113_v12 }
  0xc0   : > { %v6770_v11 = vld [vmem:[%s7403_s10 + $0x91c] sm:$0xf0] }
  0xc1   : > { %v5824_v13 = vld [vmem:[%s7403_s10 + $0xb00] sm:$0xf]  ;;  %v5569_v21 = vor.u32 %v6770_v11, %v5568_v10  ;;  %3461 = vmatpush.bf16.msrb.mxu3 %v6369_v16  ;;  %v4642_v10 = vld [vmem:[%s7403_s10 + $0x1e0] sm:$0xf0] }
  0xc2   : > { %v6834_v14 = vld [vmem:[%s7403_s10 + $0xb1c] sm:$0xf0] }
  0xc3   : > { %v6080_v17 = vld [vmem:[%s7403_s10 + $0xd00] sm:$0xf]  ;;  %v5825_v25 = vor.u32 %v6834_v14, %v5824_v13  ;;  %3423 = vmatpush.bf16.msrb.mxu0 %v5569_v21  ;;  %v6598_v13 = vld [vmem:[%s7403_s10 + $0x3c4] sm:$0xf]  ;;  %v4645_v21 = vor.u32 %v6534_v9, %v4642_v10 }
  0xc4   : > { %v6898_v18 = vld [vmem:[%s7403_s10 + $0xd1c] sm:$0xf0]  ;;  %v4898_v14 = vld [vmem:[%s7403_s10 + $0x3e0] sm:$0xf0] }
  0xc5   : > { %v6336_v19 = vld [vmem:[%s7403_s10 + $0xf00] sm:$0xf]  ;;  %v6081_v31 = vor.u32 %v6898_v18, %v6080_v17  ;;  %3436 = vmatpush.bf16.msrb.mxu1 %v5825_v25  ;;  %v6662_v17 = vld [vmem:[%s7403_s10 + $0x5c4] sm:$0xf] }
  0xc6   : > { %v6962_v22 = vld [vmem:[%s7403_s10 + $0xf1c] sm:$0xf0]  ;;  %v5154_v18 = vld [vmem:[%s7403_s10 + $0x5e0] sm:$0xf0] }
  0xc7   : > { %v280_v23 = vld [vmem:[%s7560_s3] sm:$0xff]  ;;  %v6337_v35 = vor.u32 %v6962_v22, %v6336_v19  ;;  %3449 = vmatpush.bf16.msrb.mxu2 %v6081_v31  ;;  %v286_v31 = vld [vmem:[%s7560_s3 + $0x30] sm:$0xff] }
  0xc8   : > { %v5536_v26 = vld [vmem:[%s7403_s10 + $0x8c0] sm:$0xf]  ;;  %v7574_v28 = vpack.c.bf16 %v280_v23, %v280_v23  ;;  %v6726_v22 = vld [vmem:[%s7403_s10 + $0x7c4] sm:$0xf] }
  0xc9   : > { %v6762_v27 = vld [vmem:[%s7403_s10 + $0x8dc] sm:$0xf0]  ;;  %3462 = vmatpush.bf16.msrb.mxu3 %v6337_v35  ;;  %v5410_v23 = vld [vmem:[%s7403_s10 + $0x7e0] sm:$0xf0] }
  0xca   : > { %v5792_v32 = vld [vmem:[%s7403_s10 + $0xac0] sm:$0xf]  ;;  %3376 = vmatmul.bf16.vlgmr.msra.gmra.mxu0 %v7574_v28  ;;  %v5537_v38 = vor.u32 %v6762_v27, %v5536_v26  ;;  %v4901_v26 = vor.u32 %v6598_v13, %v4898_v14  ;;  %v6526_v27 = vld [vmem:[%s7403_s10 + $0x184] sm:$0xf] }
  0xcb   : > { %v6826_v33 = vld [vmem:[%s7403_s10 + $0xadc] sm:$0xf0]  ;;  %v6590_v35 = vld [vmem:[%s7403_s10 + $0x384] sm:$0xf] }
  0xcc   : > { %v6048_v36 = vld [vmem:[%s7403_s10 + $0xcc0] sm:$0xf]  ;;  %v5793_v41 = vor.u32 %v6826_v33, %v5792_v32  ;;  %3424 = vmatpush.bf16.msrb.mxu0 %v5537_v38  ;;  %v5157_v33 = vor.u32 %v6662_v17, %v5154_v18  ;;  %v5413_v38 = vor.u32 %v6726_v22, %v5410_v23  ;;  %v6502_v10 = vld [vmem:[%s7403_s10 + $0xc4] sm:$0xf] }
  0xcd   : > { %v6890_v37 = vld [vmem:[%s7403_s10 + $0xcdc] sm:$0xf0]  ;;  %v6566_v13 = vld [vmem:[%s7403_s10 + $0x2c4] sm:$0xf] }
  0xce   : > { %v6304_v39 = vld [vmem:[%s7403_s10 + $0xec0] sm:$0xf]  ;;  %v6049_v44 = vor.u32 %v6890_v37, %v6048_v36  ;;  %3437 = vmatpush.bf16.msrb.mxu1 %v5793_v41  ;;  %v4866_v36 = vld [vmem:[%s7403_s10 + $0x3a0] sm:$0xf0]  ;;  %v287_v37 = vld [vmem:[%s7560_s3 + $0x38] sm:$0xff] }
  0xcf   : > { %v6954_v40 = vld [vmem:[%s7403_s10 + $0xedc] sm:$0xf0]  ;;  %v4770_v14 = vld [vmem:[%s7403_s10 + $0x2e0] sm:$0xf0] }
  0xd0   : > { %v5504_v42 = vld [vmem:[%s7403_s10 + $0x880] sm:$0xf]  ;;  %v6305_v47 = vor.u32 %v6954_v40, %v6304_v39  ;;  %3450 = vmatpush.bf16.msrb.mxu2 %v6049_v44  ;;  %v6654_v39 = vld [vmem:[%s7403_s10 + $0x584] sm:$0xf]  ;;  %v4773_v22 = vor.u32 %v6566_v13, %v4770_v14 }
  0xd1   : > { %v6754_v43 = vld [vmem:[%s7403_s10 + $0x89c] sm:$0xf0]  ;;  %v5122_v40 = vld [vmem:[%s7403_s10 + $0x5a0] sm:$0xf0] }
  0xd2   : > { %v5760_v45 = vld [vmem:[%s7403_s10 + $0xa80] sm:$0xf]  ;;  %v5505_v50 = vor.u32 %v6754_v43, %v5504_v42  ;;  %3463 = vmatpush.bf16.msrb.mxu3 %v6305_v47  ;;  %v285_v42 = vld [vmem:[%s7560_s3 + $0x28] sm:$0xff]  ;;  %v4613_v43 = vor.u32 %v6526_v27, %v4610_v30  ;;  %v6718_v44 = vld [vmem:[%s7403_s10 + $0x784] sm:$0xf]  ;;  %v4869_v47 = vor.u32 %v6590_v35, %v4866_v36 }
  0xd3   : > { %v6818_v46 = vld [vmem:[%s7403_s10 + $0xa9c] sm:$0xf0]  ;;  %v5026_v17 = vld [vmem:[%s7403_s10 + $0x4e0] sm:$0xf0] }
  0xd4   : > { %v6016_v48 = vld [vmem:[%s7403_s10 + $0xc80] sm:$0xf]  ;;  %v5761_v53 = vor.u32 %v6818_v46, %v5760_v45  ;;  %3425 = vmatpush.bf16.msrb.mxu0 %v5505_v50  ;;  %v5378_v45 = vld [vmem:[%s7403_s10 + $0x7a0] sm:$0xf0]  ;;  %v7636_v46 = vpack.c.bf16 %v286_v31, %v286_v31 }
  0xd5   : > { %v6882_v49 = vld [vmem:[%s7403_s10 + $0xc9c] sm:$0xf0]  ;;  %v4578_v50 = vld [vmem:[%s7403_s10 + $0x160] sm:$0xf0] }
  0xd6   : > { %v6272_v51 = vld [vmem:[%s7403_s10 + $0xe80] sm:$0xf]  ;;  %v6017_v56 = vor.u32 %v6882_v49, %v6016_v48  ;;  %3438 = vmatpush.bf16.msrb.mxu1 %v5761_v53  ;;  %v7638_v48 = vpack.c.bf16 %v287_v37, %v287_v37  ;;  %v6518_v49 = vld [vmem:[%s7403_s10 + $0x144] sm:$0xf] }
  0xd7   : > { %v6946_v52 = vld [vmem:[%s7403_s10 + $0xe9c] sm:$0xf0]  ;;  %v4834_v53 = vld [vmem:[%s7403_s10 + $0x360] sm:$0xf0] }
  0xd8   : > { %v5472_v54 = vld [vmem:[%s7403_s10 + $0x840] sm:$0xf]  ;;  %v6273_v59 = vor.u32 %v6946_v52, %v6272_v51  ;;  %3451 = vmatpush.bf16.msrb.mxu2 %v6017_v56  ;;  %v5125_v51 = vor.u32 %v6654_v39, %v5122_v40  ;;  %v6582_v52 = vld [vmem:[%s7403_s10 + $0x344] sm:$0xf] }
  0xd9   : > { %v6746_v55 = vld [vmem:[%s7403_s10 + $0x85c] sm:$0xf0]  ;;  %v6646_v56 = vld [vmem:[%s7403_s10 + $0x544] sm:$0xf] }
  0xda   : > { %v5728_v57 = vld [vmem:[%s7403_s10 + $0xa40] sm:$0xf]  ;;  %v5473_v63 = vor.u32 %v6746_v55, %v5472_v54  ;;  %3464 = vmatpush.bf16.msrb.mxu3 %v6273_v59  ;;  %v7644_v54 = vpack.c.bf16 %v285_v42, %v285_v42  ;;  %v5381_v55 = vor.u32 %v6718_v44, %v5378_v45  ;;  %v6710_v59 = vld [vmem:[%s7403_s10 + $0x744] sm:$0xf] }
  0xdb   : > { %v6810_v58 = vld [vmem:[%s7403_s10 + $0xa5c] sm:$0xf0]  ;;  %v6494_v23 = vld [vmem:[%s7403_s10 + $0x84] sm:$0xf] }
  0xdc   : > { %v5984_v60 = vld [vmem:[%s7403_s10 + $0xc40] sm:$0xf]  ;;  %v5729_v3 = vor.u32 %v6810_v58, %v5728_v57  ;;  %3426 = vmatpush.bf16.msrb.mxu0 %v5473_v63  ;;  %v5090_v57 = vld [vmem:[%s7403_s10 + $0x560] sm:$0xf0]  ;;  %v4581_v58 = vor.u32 %v6518_v49, %v4578_v50 }
  0xdd   : > { %v6874_v61 = vld [vmem:[%s7403_s10 + $0xc5c] sm:$0xf0]  ;;  %v4546_v63 = vld [vmem:[%s7403_s10 + $0x120] sm:$0xf0] }
  0xde   : > { %v6240_v62 = vld [vmem:[%s7403_s10 + $0xe40] sm:$0xf]  ;;  %v5985_v7 = vor.u32 %v6874_v61, %v5984_v60  ;;  %3439 = vmatpush.bf16.msrb.mxu1 %v5729_v3  ;;  %v5346_v60 = vld [vmem:[%s7403_s10 + $0x760] sm:$0xf0]  ;;  %v4837_v61 = vor.u32 %v6582_v52, %v4834_v53 }
  0xdf   : > { %v6938_v0 = vld [vmem:[%s7403_s10 + $0xe5c] sm:$0xf0]  ;;  %v5349_v3 = vor.u32 %v6710_v59, %v5346_v60  ;;  %v4738_v27 = vld [vmem:[%s7403_s10 + $0x2a0] sm:$0xf0] }
  0xe0   : > { %v5440_v1 = vld [vmem:[%s7403_s10 + $0x800] sm:$0xf]  ;;  %v6241_v11 = vor.u32 %v6938_v0, %v6240_v62  ;;  %3452 = vmatpush.bf16.msrb.mxu2 %v5985_v7  ;;  %v6510_v62 = vld [vmem:[%s7403_s10 + $0x104] sm:$0xf]  ;;  %v5093_v0 = vor.u32 %v6646_v56, %v5090_v57 }
  0xe1   : > { %v6738_v2 = vld [vmem:[%s7403_s10 + $0x81c] sm:$0xf0]  ;;  %v6702_v7 = vld [vmem:[%s7403_s10 + $0x704] sm:$0xf] }
  0xe2   : > { %v5696_v4 = vld [vmem:[%s7403_s10 + $0xa00] sm:$0xf]  ;;  %v5441_v15 = vor.u32 %v6738_v2, %v5440_v1  ;;  %3465 = vmatpush.bf16.msrb.mxu3 %v6241_v11  ;;  %v6574_v1 = vld [vmem:[%s7403_s10 + $0x304] sm:$0xf] }
  0xe3   : > { %v6802_v5 = vld [vmem:[%s7403_s10 + $0xa1c] sm:$0xf0]  ;;  %v4802_v2 = vld [vmem:[%s7403_s10 + $0x320] sm:$0xf0] }
  0xe4   : > { %v5952_v6 = vld [vmem:[%s7403_s10 + $0xc00] sm:$0xf]  ;;  %v5697_v19 = vor.u32 %v6802_v5, %v5696_v4  ;;  %3427 = vmatpush.bf16.msrb.mxu0 %v5441_v15  ;;  %v6638_v4 = vld [vmem:[%s7403_s10 + $0x504] sm:$0xf]  ;;  %v4805_v9 = vor.u32 %v6574_v1, %v4802_v2 }
  0xe5   : > { %v6866_v8 = vld [vmem:[%s7403_s10 + $0xc1c] sm:$0xf0]  ;;  %v5058_v5 = vld [vmem:[%s7403_s10 + $0x520] sm:$0xf0] }
  0xe6   : > { %v6208_v12 = vld [vmem:[%s7403_s10 + $0xe00] sm:$0xf]  ;;  %v5953_v25 = vor.u32 %v6866_v8, %v5952_v6  ;;  %3440 = vmatpush.bf16.msrb.mxu1 %v5697_v19  ;;  %v4549_v6 = vor.u32 %v6510_v62, %v4546_v63  ;;  %v5314_v8 = vld [vmem:[%s7403_s10 + $0x720] sm:$0xf0] }
  0xe7   : > { %v6930_v16 = vld [vmem:[%s7403_s10 + $0xe1c] sm:$0xf0]  ;;  %v4514_v11 = vld [vmem:[%s7403_s10 + $0xe0] sm:$0xf0]  ;;  %v5317_v15 = vor.u32 %v6702_v7, %v5314_v8 }
  0xe8   : > { %v284_v24 = vld [vmem:[%s7560_s3 + $0x20] sm:$0xff]  ;;  %v6209_v32 = vor.u32 %v6930_v16, %v6208_v12  ;;  %3472 = vmatpush.bf16.msra.mxu0 %v4645_v21  ;;  %3453 = vmatpush.bf16.msrb.mxu2 %v5953_v25  ;;  %v5061_v12 = vor.u32 %v6638_v4, %v5058_v5  ;;  %v4517_v18 = vor.u32 %v6502_v10, %v4514_v11 }
  0xe9   : > { %v7631_v41 = vpack.c.bf16 %v284_v24, %v284_v24  ;;  %3441 = vmatmul.bf16.vlgmr.msrb.gmra.mxu1 %v7644_v54  ;;  %v6630_v16 = vld [vmem:[%s7403_s10 + $0x4c4] sm:$0xf] }
  0xea   : > { %3485 = vmatpush.bf16.msra.mxu1 %v4901_v26  ;;  %3466 = vmatpush.bf16.msrb.mxu3 %v6209_v32  ;;  %v6694_v19 = vld [vmem:[%s7403_s10 + $0x6c4] sm:$0xf]  ;;  %v5029_v25 = vor.u32 %v6630_v16, %v5026_v17 }
  0xeb   : > { %3428 = vmatmul.bf16.vlgmr.msrb.gmra.mxu0 %v7631_v41  ;;  %3454 = vmatmul.bf16.vlgmr.msrb.gmra.mxu2 %v7636_v46  ;;  %v5282_v21 = vld [vmem:[%s7403_s10 + $0x6e0] sm:$0xf0] }
  0xec   : > { %3498 = vmatpush.bf16.msra.mxu2 %v5157_v33  ;;  %3473 = vmatpush.bf16.msra.mxu0 %v4613_v43  ;;  %v4482_v24 = vld [vmem:[%s7403_s10 + $0xa0] sm:$0xf0]  ;;  %v5285_v30 = vor.u32 %v6694_v19, %v5282_v21 }
  0xed   : > { %3467 = vmatmul.bf16.vlgmr.msrb.gmra.mxu3 %v7638_v48  ;;  %v6558_v26 = vld [vmem:[%s7403_s10 + $0x284] sm:$0xf]  ;;  %v4485_v33 = vor.u32 %v6494_v23, %v4482_v24 }
  0xee   : > { %3511 = vmatpush.bf16.msra.mxu3 %v5413_v38  ;;  %3486 = vmatpush.bf16.msra.mxu1 %v4869_v47  ;;  %v6622_v31 = vld [vmem:[%s7403_s10 + $0x484] sm:$0xf]  ;;  %v4741_v37 = vor.u32 %v6558_v26, %v4738_v27 }
  0xef   : > { %v4994_v32 = vld [vmem:[%s7403_s10 + $0x4a0] sm:$0xf0] }
  0xf0   : > { %3499 = vmatpush.bf16.msra.mxu2 %v5125_v51  ;;  %3474 = vmatpush.bf16.msra.mxu0 %v4581_v58  ;;  %v6686_v35 = vld [vmem:[%s7403_s10 + $0x684] sm:$0xf]  ;;  %v4997_v40 = vor.u32 %v6622_v31, %v4994_v32 }
  0xf1   : > { %v5250_v36 = vld [vmem:[%s7403_s10 + $0x6a0] sm:$0xf0] }
  0xf2   : > { %3512 = vmatpush.bf16.msra.mxu3 %v5381_v55  ;;  %3487 = vmatpush.bf16.msra.mxu1 %v4837_v61  ;;  %v6486_v38 = vld [vmem:[%s7403_s10 + $0x44] sm:$0xf]  ;;  %v5253_v44 = vor.u32 %v6686_v35, %v5250_v36 }
  0xf3   : > { %v4450_v39 = vld [vmem:[%s7403_s10 + $0x60] sm:$0xf0] }
  0xf4   : > { %3500 = vmatpush.bf16.msra.mxu2 %v5093_v0  ;;  %3475 = vmatpush.bf16.msra.mxu0 %v4549_v6  ;;  %v6550_v42 = vld [vmem:[%s7403_s10 + $0x244] sm:$0xf]  ;;  %v4453_v50 = vor.u32 %v6486_v38, %v4450_v39 }
  0xf5   : > { %v4706_v43 = vld [vmem:[%s7403_s10 + $0x260] sm:$0xf0] }
  0xf6   : > { %3513 = vmatpush.bf16.msra.mxu3 %v5349_v3  ;;  %3488 = vmatpush.bf16.msra.mxu1 %v4805_v9  ;;  %v6614_v45 = vld [vmem:[%s7403_s10 + $0x444] sm:$0xf]  ;;  %v4709_v55 = vor.u32 %v6550_v42, %v4706_v43 }
  0xf7   : > { %v4962_v47 = vld [vmem:[%s7403_s10 + $0x460] sm:$0xf0] }
  0xf8   : > { %3501 = vmatpush.bf16.msra.mxu2 %v5061_v12  ;;  %3476 = vmatpush.bf16.msra.mxu0 %v4517_v18  ;;  %v6678_v49 = vld [vmem:[%s7403_s10 + $0x644] sm:$0xf]  ;;  %v4965_v59 = vor.u32 %v6614_v45, %v4962_v47 }
  0xf9   : > { %v5218_v51 = vld [vmem:[%s7403_s10 + $0x660] sm:$0xf0] }
  0xfa   : > { %3514 = vmatpush.bf16.msra.mxu3 %v5317_v15  ;;  %3489 = vmatpush.bf16.msra.mxu1 %v4773_v22  ;;  %v6478_v52 = vld [vmem:[%s7403_s10 + $0x4] sm:$0xf]  ;;  %v5221_v63 = vor.u32 %v6678_v49, %v5218_v51 }
  0xfb   : > { %v4418_v53 = vld [vmem:[%s7403_s10 + $0x20] sm:$0xf0] }
  0xfc   : > { %3502 = vmatpush.bf16.msra.mxu2 %v5029_v25  ;;  %3477 = vmatpush.bf16.msra.mxu0 %v4485_v33  ;;  %v6542_v56 = vld [vmem:[%s7403_s10 + $0x204] sm:$0xf]  ;;  %v4421_v3 = vor.u32 %v6478_v52, %v4418_v53 }
  0xfd   : > { %v4674_v57 = vld [vmem:[%s7403_s10 + $0x220] sm:$0xf0] }
  0xfe   : > { %3515 = vmatpush.bf16.msra.mxu3 %v5285_v30  ;;  %3490 = vmatpush.bf16.msra.mxu1 %v4741_v37  ;;  %v6606_v58 = vld [vmem:[%s7403_s10 + $0x404] sm:$0xf]  ;;  %v4677_v7 = vor.u32 %v6542_v56, %v4674_v57 }
  0xff   : > { %v4930_v60 = vld [vmem:[%s7403_s10 + $0x420] sm:$0xf0] }
 0x100   : > { %3503 = vmatpush.bf16.msra.mxu2 %v4997_v40  ;;  %v6790_v61 = vld [vmem:[%s7403_s10 + $0x9c4] sm:$0xf]  ;;  %3478 = vmatpush.bf16.msra.mxu0 %v4453_v50  ;;  %v4933_v11 = vor.u32 %v6606_v58, %v4930_v60 }
 0x101   : > { %v5666_v62 = vld [vmem:[%s7403_s10 + $0x9e0] sm:$0xf0] }
 0x102   : > { %3516 = vmatpush.bf16.msra.mxu3 %v5253_v44  ;;  %v6670_v0 = vld [vmem:[%s7403_s10 + $0x604] sm:$0xf]  ;;  %3491 = vmatpush.bf16.msra.mxu1 %v4709_v55  ;;  %v5669_v8 = vor.u32 %v6790_v61, %v5666_v62 }
 0x103   : > { %v6854_v1 = vld [vmem:[%s7403_s10 + $0xbc4] sm:$0xf] }
 0x104   : > { %v5922_v2 = vld [vmem:[%s7403_s10 + $0xbe0] sm:$0xf0]  ;;  %3504 = vmatpush.bf16.msra.mxu2 %v4965_v59  ;;  %3479 = vmatpush.bf16.msra.mxu0 %v4421_v3 }
 0x105   : > { %v5186_v4 = vld [vmem:[%s7403_s10 + $0x620] sm:$0xf0]  ;;  %v5925_v12 = vor.u32 %v6854_v1, %v5922_v2 }
 0x106   : > { %v6918_v5 = vld [vmem:[%s7403_s10 + $0xdc4] sm:$0xf]  ;;  %3517 = vmatpush.bf16.msra.mxu3 %v5221_v63  ;;  %v5189_v15 = vor.u32 %v6670_v0, %v5186_v4  ;;  %3492 = vmatpush.bf16.msra.mxu1 %v4677_v7 }
 0x107   : > { %v6178_v6 = vld [vmem:[%s7403_s10 + $0xde0] sm:$0xf0]  ;;  %3480 = vmatmul.bf16.vlgmr.msra.gmra.mxu0 %v7574_v28 }
 0x108   : > { %v6982_v9 = vld [vmem:[%s7403_s10 + $0xfc4] sm:$0xf]  ;;  %v6181_v16 = vor.u32 %v6918_v5, %v6178_v6  ;;  %3524 = vmatpush.bf16.msrb.mxu0 %v5669_v8  ;;  %3505 = vmatpush.bf16.msra.mxu2 %v4933_v11 }
 0x109   : > { %v6434_v10 = vld [vmem:[%s7403_s10 + $0xfe0] sm:$0xf0]  ;;  %3493 = vmatmul.bf16.vlgmr.msra.gmra.mxu1 %v7581_v34 }
 0x10a   : > { %v6782_v13 = vld [vmem:[%s7403_s10 + $0x984] sm:$0xf]  ;;  %v6437_v19 = vor.u32 %v6982_v9, %v6434_v10  ;;  %3537 = vmatpush.bf16.msrb.mxu1 %v5925_v12  ;;  %3518 = vmatpush.bf16.msra.mxu3 %v5189_v15 }
 0x10b   : > { %v5634_v14 = vld [vmem:[%s7403_s10 + $0x9a0] sm:$0xf0]  ;;  %3506 = vmatmul.bf16.vlgmr.msra.gmra.mxu2 %v7566_v20 }
 0x10c   : > { %v6846_v17 = vld [vmem:[%s7403_s10 + $0xb84] sm:$0xf]  ;;  %v5637_v23 = vor.u32 %v6782_v13, %v5634_v14  ;;  %3550 = vmatpush.bf16.msrb.mxu2 %v6181_v16 }
 0x10d   : > { %v5890_v18 = vld [vmem:[%s7403_s10 + $0xba0] sm:$0xf0]  ;;  %3519 = vmatmul.bf16.vlgmr.msra.gmra.mxu3 %v7576_v29 }
 0x10e   : > { %v6910_v21 = vld [vmem:[%s7403_s10 + $0xd84] sm:$0xf]  ;;  %v5893_v26 = vor.u32 %v6846_v17, %v5890_v18  ;;  %3563 = vmatpush.bf16.msrb.mxu3 %v6437_v19  ;;  %3525 = vmatpush.bf16.msrb.mxu0 %v5637_v23 }
 0x10f   : > { %v6146_v22 = vld [vmem:[%s7403_s10 + $0xda0] sm:$0xf0] }
 0x110   : > { %v6974_v24 = vld [vmem:[%s7403_s10 + $0xf84] sm:$0xf]  ;;  %v6149_v31 = vor.u32 %v6910_v21, %v6146_v22  ;;  %3538 = vmatpush.bf16.msrb.mxu1 %v5893_v26 }
 0x111   : > { %v6402_v25 = vld [vmem:[%s7403_s10 + $0xfa0] sm:$0xf0] }
 0x112   : > { %v6774_v27 = vld [vmem:[%s7403_s10 + $0x944] sm:$0xf]  ;;  %v6405_v35 = vor.u32 %v6974_v24, %v6402_v25  ;;  %3551 = vmatpush.bf16.msrb.mxu2 %v6149_v31 }
 0x113   : > { %v5602_v30 = vld [vmem:[%s7403_s10 + $0x960] sm:$0xf0] }
 0x114   : > { %v6838_v32 = vld [vmem:[%s7403_s10 + $0xb44] sm:$0xf]  ;;  %v5605_v38 = vor.u32 %v6774_v27, %v5602_v30  ;;  %3564 = vmatpush.bf16.msrb.mxu3 %v6405_v35 }
 0x115   : > { %v5858_v33 = vld [vmem:[%s7403_s10 + $0xb60] sm:$0xf0] }
 0x116   : > { %v6902_v36 = vld [vmem:[%s7403_s10 + $0xd44] sm:$0xf]  ;;  %v5861_v42 = vor.u32 %v6838_v32, %v5858_v33  ;;  %3526 = vmatpush.bf16.msrb.mxu0 %v5605_v38 }
 0x117   : > { %v6114_v37 = vld [vmem:[%s7403_s10 + $0xd60] sm:$0xf0] }
 0x118   : > { %v6966_v39 = vld [vmem:[%s7403_s10 + $0xf44] sm:$0xf]  ;;  %v6117_v45 = vor.u32 %v6902_v36, %v6114_v37  ;;  %3539 = vmatpush.bf16.msrb.mxu1 %v5861_v42  ;;  %v4648_v42 = vld [vmem:[%s7403_s10 + $0x1c8] sm:$0xf] }
 0x119   : > { %v6370_v40 = vld [vmem:[%s7403_s10 + $0xf60] sm:$0xf0] }
 0x11a   : > { %v6766_v43 = vld [vmem:[%s7403_s10 + $0x904] sm:$0xf]  ;;  %v6373_v50 = vor.u32 %v6966_v39, %v6370_v40  ;;  %3552 = vmatpush.bf16.msrb.mxu2 %v6117_v45 }
 0x11b   : > { %v5570_v44 = vld [vmem:[%s7403_s10 + $0x920] sm:$0xf0] }
 0x11c   : > { %v6830_v47 = vld [vmem:[%s7403_s10 + $0xb04] sm:$0xf]  ;;  %v5573_v53 = vor.u32 %v6766_v43, %v5570_v44  ;;  %3565 = vmatpush.bf16.msrb.mxu3 %v6373_v50  ;;  %v6539_v43 = vld [vmem:[%s7403_s10 + $0x1e4] sm:$0xf0] }
 0x11d   : > { %v5826_v49 = vld [vmem:[%s7403_s10 + $0xb20] sm:$0xf0] }
 0x11e   : > { %v6894_v51 = vld [vmem:[%s7403_s10 + $0xd04] sm:$0xf]  ;;  %v5829_v57 = vor.u32 %v6830_v47, %v5826_v49  ;;  %3527 = vmatpush.bf16.msrb.mxu0 %v5573_v53  ;;  %v4904_v47 = vld [vmem:[%s7403_s10 + $0x3c8] sm:$0xf] }
 0x11f   : > { %v6082_v52 = vld [vmem:[%s7403_s10 + $0xd20] sm:$0xf0]  ;;  %v6603_v49 = vld [vmem:[%s7403_s10 + $0x3e4] sm:$0xf0] }
 0x120   : > { %v6958_v55 = vld [vmem:[%s7403_s10 + $0xf04] sm:$0xf]  ;;  %v6085_v60 = vor.u32 %v6894_v51, %v6082_v52  ;;  %3540 = vmatpush.bf16.msrb.mxu1 %v5829_v57  ;;  %v5160_v52 = vld [vmem:[%s7403_s10 + $0x5c8] sm:$0xf] }
 0x121   : > { %v6338_v56 = vld [vmem:[%s7403_s10 + $0xf20] sm:$0xf0]  ;;  %v6667_v53 = vld [vmem:[%s7403_s10 + $0x5e4] sm:$0xf0] }
 0x122   : > { %v6758_v58 = vld [vmem:[%s7403_s10 + $0x8c4] sm:$0xf]  ;;  %v6341_v63 = vor.u32 %v6958_v55, %v6338_v56  ;;  %3553 = vmatpush.bf16.msrb.mxu2 %v6085_v60  ;;  %v4649_v56 = vor.u32 %v6539_v43, %v4648_v42  ;;  %v5416_v57 = vld [vmem:[%s7403_s10 + $0x7c8] sm:$0xf]  ;;  %v4905_v60 = vor.u32 %v6603_v49, %v4904_v47 }
 0x123   : > { %v5538_v59 = vld [vmem:[%s7403_s10 + $0x8e0] sm:$0xf0]  ;;  %v4776_v42 = vld [vmem:[%s7403_s10 + $0x2c8] sm:$0xf] }
 0x124   : > { %v6822_v61 = vld [vmem:[%s7403_s10 + $0xac4] sm:$0xf]  ;;  %v5541_v2 = vor.u32 %v6758_v58, %v5538_v59  ;;  %3566 = vmatpush.bf16.msrb.mxu3 %v6341_v63  ;;  %v6731_v58 = vld [vmem:[%s7403_s10 + $0x7e4] sm:$0xf0] }
 0x125   : > { %v5794_v62 = vld [vmem:[%s7403_s10 + $0xae0] sm:$0xf0]  ;;  %v6571_v43 = vld [vmem:[%s7403_s10 + $0x2e4] sm:$0xf0] }
 0x126   : > { %v6886_v0 = vld [vmem:[%s7403_s10 + $0xcc4] sm:$0xf]  ;;  %v5797_v5 = vor.u32 %v6822_v61, %v5794_v62  ;;  %3528 = vmatpush.bf16.msrb.mxu0 %v5541_v2  ;;  %v4616_v61 = vld [vmem:[%s7403_s10 + $0x188] sm:$0xf] }
 0x127   : > { %v6050_v1 = vld [vmem:[%s7403_s10 + $0xce0] sm:$0xf0]  ;;  %v6531_v62 = vld [vmem:[%s7403_s10 + $0x1a4] sm:$0xf0] }
 0x128   : > { %v6950_v3 = vld [vmem:[%s7403_s10 + $0xec4] sm:$0xf]  ;;  %v6053_v8 = vor.u32 %v6886_v0, %v6050_v1  ;;  %3541 = vmatpush.bf16.msrb.mxu1 %v5797_v5  ;;  %v5161_v0 = vor.u32 %v6667_v53, %v5160_v52  ;;  %v4872_v1 = vld [vmem:[%s7403_s10 + $0x388] sm:$0xf]  ;;  %v4777_v52 = vor.u32 %v6571_v43, %v4776_v42 }
 0x129   : > { %v6306_v4 = vld [vmem:[%s7403_s10 + $0xee0] sm:$0xf0]  ;;  %v6595_v2 = vld [vmem:[%s7403_s10 + $0x3a4] sm:$0xf0] }
 0x12a   : > { %v6750_v6 = vld [vmem:[%s7403_s10 + $0x884] sm:$0xf]  ;;  %v6309_v11 = vor.u32 %v6950_v3, %v6306_v4  ;;  %3554 = vmatpush.bf16.msrb.mxu2 %v6053_v8  ;;  %v5417_v3 = vor.u32 %v6731_v58, %v5416_v57  ;;  %v5128_v4 = vld [vmem:[%s7403_s10 + $0x588] sm:$0xf] }
 0x12b   : > { %v5506_v7 = vld [vmem:[%s7403_s10 + $0x8a0] sm:$0xf0]  ;;  %v6659_v5 = vld [vmem:[%s7403_s10 + $0x5a4] sm:$0xf0] }
 0x12c   : > { %v6814_v9 = vld [vmem:[%s7403_s10 + $0xa84] sm:$0xf]  ;;  %v5509_v14 = vor.u32 %v6750_v6, %v5506_v7  ;;  %3567 = vmatpush.bf16.msrb.mxu3 %v6309_v11  ;;  %v4617_v6 = vor.u32 %v6531_v62, %v4616_v61  ;;  %v5384_v7 = vld [vmem:[%s7403_s10 + $0x788] sm:$0xf] }
 0x12d   : > { %v5762_v10 = vld [vmem:[%s7403_s10 + $0xaa0] sm:$0xf0]  ;;  %v6723_v8 = vld [vmem:[%s7403_s10 + $0x7a4] sm:$0xf0] }
 0x12e   : > { %v6878_v12 = vld [vmem:[%s7403_s10 + $0xc84] sm:$0xf]  ;;  %v5765_v17 = vor.u32 %v6814_v9, %v5762_v10  ;;  %3529 = vmatpush.bf16.msrb.mxu0 %v5509_v14  ;;  %v4873_v9 = vor.u32 %v6595_v2, %v4872_v1  ;;  %v4584_v10 = vld [vmem:[%s7403_s10 + $0x148] sm:$0xf] }
 0x12f   : > { %v6018_v13 = vld [vmem:[%s7403_s10 + $0xca0] sm:$0xf0]  ;;  %v6523_v11 = vld [vmem:[%s7403_s10 + $0x164] sm:$0xf0] }
 0x130   : > { %v6942_v15 = vld [vmem:[%s7403_s10 + $0xe84] sm:$0xf]  ;;  %v6021_v21 = vor.u32 %v6878_v12, %v6018_v13  ;;  %3542 = vmatpush.bf16.msrb.mxu1 %v5765_v17  ;;  %v5129_v12 = vor.u32 %v6659_v5, %v5128_v4  ;;  %v4840_v13 = vld [vmem:[%s7403_s10 + $0x348] sm:$0xf] }
 0x131   : > { %v6274_v16 = vld [vmem:[%s7403_s10 + $0xea0] sm:$0xf0]  ;;  %v6587_v14 = vld [vmem:[%s7403_s10 + $0x364] sm:$0xf0] }
 0x132   : > { %v6742_v18 = vld [vmem:[%s7403_s10 + $0x844] sm:$0xf]  ;;  %v6277_v24 = vor.u32 %v6942_v15, %v6274_v16  ;;  %3555 = vmatpush.bf16.msrb.mxu2 %v6021_v21  ;;  %v5385_v15 = vor.u32 %v6723_v8, %v5384_v7  ;;  %v5096_v16 = vld [vmem:[%s7403_s10 + $0x548] sm:$0xf] }
 0x133   : > { %v5474_v19 = vld [vmem:[%s7403_s10 + $0x860] sm:$0xf0]  ;;  %v6651_v17 = vld [vmem:[%s7403_s10 + $0x564] sm:$0xf0] }
 0x134   : > { %v6806_v22 = vld [vmem:[%s7403_s10 + $0xa44] sm:$0xf]  ;;  %v5477_v30 = vor.u32 %v6742_v18, %v5474_v19  ;;  %3568 = vmatpush.bf16.msrb.mxu3 %v6277_v24  ;;  %v4585_v18 = vor.u32 %v6523_v11, %v4584_v10  ;;  %v5352_v19 = vld [vmem:[%s7403_s10 + $0x748] sm:$0xf] }
 0x135   : > { %v5730_v23 = vld [vmem:[%s7403_s10 + $0xa60] sm:$0xf0]  ;;  %v6715_v21 = vld [vmem:[%s7403_s10 + $0x764] sm:$0xf0] }
 0x136   : > { %v6870_v25 = vld [vmem:[%s7403_s10 + $0xc44] sm:$0xf]  ;;  %v5733_v35 = vor.u32 %v6806_v22, %v5730_v23  ;;  %3530 = vmatpush.bf16.msrb.mxu0 %v5477_v30  ;;  %v4841_v22 = vor.u32 %v6587_v14, %v4840_v13  ;;  %v4552_v23 = vld [vmem:[%s7403_s10 + $0x108] sm:$0xf]  ;;  %v5353_v30 = vor.u32 %v6715_v21, %v5352_v19 }
 0x137   : > { %v5986_v26 = vld [vmem:[%s7403_s10 + $0xc60] sm:$0xf0]  ;;  %v6515_v24 = vld [vmem:[%s7403_s10 + $0x124] sm:$0xf0] }
 0x138   : > { %v6934_v27 = vld [vmem:[%s7403_s10 + $0xe44] sm:$0xf]  ;;  %v5989_v39 = vor.u32 %v6870_v25, %v5986_v26  ;;  %3543 = vmatpush.bf16.msrb.mxu1 %v5733_v35  ;;  %v5097_v25 = vor.u32 %v6651_v17, %v5096_v16  ;;  %v4808_v26 = vld [vmem:[%s7403_s10 + $0x308] sm:$0xf] }
 0x139   : > { %v6242_v31 = vld [vmem:[%s7403_s10 + $0xe60] sm:$0xf0]  ;;  %v5320_v35 = vld [vmem:[%s7403_s10 + $0x708] sm:$0xf] }
 0x13a   : > { %v6734_v32 = vld [vmem:[%s7403_s10 + $0x804] sm:$0xf]  ;;  %v6245_v44 = vor.u32 %v6934_v27, %v6242_v31  ;;  %3556 = vmatpush.bf16.msrb.mxu2 %v5989_v39  ;;  %v6579_v27 = vld [vmem:[%s7403_s10 + $0x324] sm:$0xf0] }
 0x13b   : > { %v5442_v33 = vld [vmem:[%s7403_s10 + $0x820] sm:$0xf0]  ;;  %v5064_v31 = vld [vmem:[%s7403_s10 + $0x508] sm:$0xf] }
 0x13c   : > { %v6798_v36 = vld [vmem:[%s7403_s10 + $0xa04] sm:$0xf]  ;;  %v5445_v50 = vor.u32 %v6734_v32, %v5442_v33  ;;  %3569 = vmatpush.bf16.msrb.mxu3 %v6245_v44  ;;  %v6643_v32 = vld [vmem:[%s7403_s10 + $0x524] sm:$0xf0]  ;;  %v4553_v33 = vor.u32 %v6515_v24, %v4552_v23 }
 0x13d   : > { %v5698_v37 = vld [vmem:[%s7403_s10 + $0xa20] sm:$0xf0]  ;;  %v6507_v39 = vld [vmem:[%s7403_s10 + $0xe4] sm:$0xf0] }
 0x13e   : > { %v6862_v38 = vld [vmem:[%s7403_s10 + $0xc04] sm:$0xf]  ;;  %v5701_v55 = vor.u32 %v6798_v36, %v5698_v37  ;;  %3531 = vmatpush.bf16.msrb.mxu0 %v5445_v50  ;;  %v6707_v36 = vld [vmem:[%s7403_s10 + $0x724] sm:$0xf0]  ;;  %v4809_v37 = vor.u32 %v6579_v27, %v4808_v26 }
 0x13f   : > { %v5954_v40 = vld [vmem:[%s7403_s10 + $0xc20] sm:$0xf0]  ;;  %v5321_v44 = vor.u32 %v6707_v36, %v5320_v35  ;;  %v6635_v47 = vld [vmem:[%s7403_s10 + $0x4e4] sm:$0xf0] }
 0x140   : > { %v6926_v45 = vld [vmem:[%s7403_s10 + $0xe04] sm:$0xf]  ;;  %v5957_v59 = vor.u32 %v6862_v38, %v5954_v40  ;;  %3544 = vmatpush.bf16.msrb.mxu1 %v5701_v55  ;;  %v4520_v38 = vld [vmem:[%s7403_s10 + $0xc8] sm:$0xf]  ;;  %v5065_v40 = vor.u32 %v6643_v32, %v5064_v31 }
 0x141   : > { %v6210_v51 = vld [vmem:[%s7403_s10 + $0xe20] sm:$0xf0]  ;;  %3532 = vmatmul.bf16.vlgmr.msrb.gmra.mxu0 %v7631_v41  ;;  %v4521_v49 = vor.u32 %v6507_v39, %v4520_v38  ;;  %v5288_v50 = vld [vmem:[%s7403_s10 + $0x6c8] sm:$0xf] }
 0x142   : > { %v6213_v63 = vor.u32 %v6926_v45, %v6210_v51  ;;  %3576 = vmatpush.bf16.msra.mxu0 %v4649_v56  ;;  %3557 = vmatpush.bf16.msrb.mxu2 %v5957_v59  ;;  %v5032_v45 = vld [vmem:[%s7403_s10 + $0x4c8] sm:$0xf] }
 0x143   : > { %3545 = vmatmul.bf16.vlgmr.msrb.gmra.mxu1 %v7644_v54  ;;  %v6699_v51 = vld [vmem:[%s7403_s10 + $0x6e4] sm:$0xf0]  ;;  %v5033_v56 = vor.u32 %v6635_v47, %v5032_v45 }
 0x144   : > { %3589 = vmatpush.bf16.msra.mxu1 %v4905_v60  ;;  %3570 = vmatpush.bf16.msrb.mxu3 %v6213_v63  ;;  %v4488_v53 = vld [vmem:[%s7403_s10 + $0x88] sm:$0xf]  ;;  %v5289_v59 = vor.u32 %v6699_v51, %v5288_v50 }
 0x145   : > { %3558 = vmatmul.bf16.vlgmr.msrb.gmra.mxu2 %v7636_v46  ;;  %v6499_v55 = vld [vmem:[%s7403_s10 + $0xa4] sm:$0xf0] }
 0x146   : > { %3602 = vmatpush.bf16.msra.mxu2 %v5161_v0  ;;  %3577 = vmatpush.bf16.msra.mxu0 %v4617_v6  ;;  %v4744_v57 = vld [vmem:[%s7403_s10 + $0x288] sm:$0xf]  ;;  %v4489_v62 = vor.u32 %v6499_v55, %v4488_v53 }
 0x147   : > { %3571 = vmatmul.bf16.vlgmr.msrb.gmra.mxu3 %v7638_v48  ;;  %v6563_v58 = vld [vmem:[%s7403_s10 + $0x2a4] sm:$0xf0] }
 0x148   : > { %3615 = vmatpush.bf16.msra.mxu3 %v5417_v3  ;;  %3590 = vmatpush.bf16.msra.mxu1 %v4873_v9  ;;  %v5000_v60 = vld [vmem:[%s7403_s10 + $0x488] sm:$0xf]  ;;  %v4745_v1 = vor.u32 %v6563_v58, %v4744_v57 }
 0x149   : > { %v6627_v61 = vld [vmem:[%s7403_s10 + $0x4a4] sm:$0xf0] }
 0x14a   : > { %3603 = vmatpush.bf16.msra.mxu2 %v5129_v12  ;;  %3578 = vmatpush.bf16.msra.mxu0 %v4585_v18  ;;  %v5256_v63 = vld [vmem:[%s7403_s10 + $0x688] sm:$0xf]  ;;  %v5001_v4 = vor.u32 %v6627_v61, %v5000_v60 }
 0x14b   : > { %v6691_v0 = vld [vmem:[%s7403_s10 + $0x6a4] sm:$0xf0] }
 0x14c   : > { %3616 = vmatpush.bf16.msra.mxu3 %v5385_v15  ;;  %3591 = vmatpush.bf16.msra.mxu1 %v4841_v22  ;;  %v4456_v2 = vld [vmem:[%s7403_s10 + $0x48] sm:$0xf]  ;;  %v5257_v7 = vor.u32 %v6691_v0, %v5256_v63 }
 0x14d   : > { %v6491_v3 = vld [vmem:[%s7403_s10 + $0x64] sm:$0xf0] }
 0x14e   : > { %3604 = vmatpush.bf16.msra.mxu2 %v5097_v25  ;;  %3579 = vmatpush.bf16.msra.mxu0 %v4553_v33  ;;  %v4712_v5 = vld [vmem:[%s7403_s10 + $0x248] sm:$0xf]  ;;  %v4457_v11 = vor.u32 %v6491_v3, %v4456_v2 }
 0x14f   : > { %v6555_v6 = vld [vmem:[%s7403_s10 + $0x264] sm:$0xf0] }
 0x150   : > { %3617 = vmatpush.bf16.msra.mxu3 %v5353_v30  ;;  %3592 = vmatpush.bf16.msra.mxu1 %v4809_v37  ;;  %v4968_v8 = vld [vmem:[%s7403_s10 + $0x448] sm:$0xf]  ;;  %v4713_v15 = vor.u32 %v6555_v6, %v4712_v5 }
 0x151   : > { %v6619_v9 = vld [vmem:[%s7403_s10 + $0x464] sm:$0xf0] }
 0x152   : > { %3605 = vmatpush.bf16.msra.mxu2 %v5065_v40  ;;  %3580 = vmatpush.bf16.msra.mxu0 %v4521_v49  ;;  %v5224_v10 = vld [vmem:[%s7403_s10 + $0x648] sm:$0xf]  ;;  %v4969_v19 = vor.u32 %v6619_v9, %v4968_v8 }
 0x153   : > { %v6683_v12 = vld [vmem:[%s7403_s10 + $0x664] sm:$0xf0] }
 0x154   : > { %3618 = vmatpush.bf16.msra.mxu3 %v5321_v44  ;;  %3593 = vmatpush.bf16.msra.mxu1 %v4777_v52  ;;  %v4424_v13 = vld [vmem:[%s7403_s10 + $0x8] sm:$0xf]  ;;  %v5225_v24 = vor.u32 %v6683_v12, %v5224_v10 }
 0x155   : > { %v6483_v14 = vld [vmem:[%s7403_s10 + $0x24] sm:$0xf0] }
 0x156   : > { %3606 = vmatpush.bf16.msra.mxu2 %v5033_v56  ;;  %3581 = vmatpush.bf16.msra.mxu0 %v4489_v62  ;;  %v4680_v16 = vld [vmem:[%s7403_s10 + $0x208] sm:$0xf]  ;;  %v4425_v30 = vor.u32 %v6483_v14, %v4424_v13 }
 0x157   : > { %v6547_v17 = vld [vmem:[%s7403_s10 + $0x224] sm:$0xf0] }
 0x158   : > { %3619 = vmatpush.bf16.msra.mxu3 %v5289_v59  ;;  %3594 = vmatpush.bf16.msra.mxu1 %v4745_v1  ;;  %v4936_v18 = vld [vmem:[%s7403_s10 + $0x408] sm:$0xf]  ;;  %v4681_v35 = vor.u32 %v6547_v17, %v4680_v16 }
 0x159   : > { %v6611_v21 = vld [vmem:[%s7403_s10 + $0x424] sm:$0xf0] }
 0x15a   : > { %3607 = vmatpush.bf16.msra.mxu2 %v5001_v4  ;;  %v5672_v22 = vld [vmem:[%s7403_s10 + $0x9c8] sm:$0xf]  ;;  %3582 = vmatpush.bf16.msra.mxu0 %v4457_v11  ;;  %v4937_v39 = vor.u32 %v6611_v21, %v4936_v18 }
 0x15b   : > { %v6795_v23 = vld [vmem:[%s7403_s10 + $0x9e4] sm:$0xf0] }
 0x15c   : > { %3620 = vmatpush.bf16.msra.mxu3 %v5257_v7  ;;  %v5192_v25 = vld [vmem:[%s7403_s10 + $0x608] sm:$0xf]  ;;  %3595 = vmatpush.bf16.msra.mxu1 %v4713_v15  ;;  %v5673_v36 = vor.u32 %v6795_v23, %v5672_v22 }
 0x15d   : > { %v5928_v26 = vld [vmem:[%s7403_s10 + $0xbc8] sm:$0xf] }
 0x15e   : > { %v6859_v27 = vld [vmem:[%s7403_s10 + $0xbe4] sm:$0xf0]  ;;  %3608 = vmatpush.bf16.msra.mxu2 %v4969_v19  ;;  %3583 = vmatpush.bf16.msra.mxu0 %v4425_v30 }
 0x15f   : > { %v6675_v31 = vld [vmem:[%s7403_s10 + $0x624] sm:$0xf0]  ;;  %v5929_v40 = vor.u32 %v6859_v27, %v5928_v26 }
 0x160   : > { %v6184_v32 = vld [vmem:[%s7403_s10 + $0xdc8] sm:$0xf]  ;;  %3621 = vmatpush.bf16.msra.mxu3 %v5225_v24  ;;  %v5193_v44 = vor.u32 %v6675_v31, %v5192_v25  ;;  %3596 = vmatpush.bf16.msra.mxu1 %v4681_v35 }
 0x161   : > { %v6923_v33 = vld [vmem:[%s7403_s10 + $0xde4] sm:$0xf0]  ;;  %3584 = vmatmul.bf16.vlgmr.msra.gmra.mxu0 %v7574_v28 }
 0x162   : > { %v6440_v37 = vld [vmem:[%s7403_s10 + $0xfc8] sm:$0xf]  ;;  %v6185_v45 = vor.u32 %v6923_v33, %v6184_v32  ;;  %3628 = vmatpush.bf16.msrb.mxu0 %v5673_v36  ;;  %3609 = vmatpush.bf16.msra.mxu2 %v4937_v39 }
 0x163   : > { %v6987_v38 = vld [vmem:[%s7403_s10 + $0xfe4] sm:$0xf0]  ;;  %3597 = vmatmul.bf16.vlgmr.msra.gmra.mxu1 %v7581_v34 }
 0x164   : > { %v5640_v42 = vld [vmem:[%s7403_s10 + $0x988] sm:$0xf]  ;;  %v6441_v50 = vor.u32 %v6987_v38, %v6440_v37  ;;  %3641 = vmatpush.bf16.msrb.mxu1 %v5929_v40  ;;  %3622 = vmatpush.bf16.msra.mxu3 %v5193_v44 }
 0x165   : > { %v6787_v43 = vld [vmem:[%s7403_s10 + $0x9a4] sm:$0xf0]  ;;  %3610 = vmatmul.bf16.vlgmr.msra.gmra.mxu2 %v7566_v20 }
 0x166   : > { %v5896_v47 = vld [vmem:[%s7403_s10 + $0xb88] sm:$0xf]  ;;  %v5641_v53 = vor.u32 %v6787_v43, %v5640_v42  ;;  %3654 = vmatpush.bf16.msrb.mxu2 %v6185_v45 }
 0x167   : > { %v6851_v49 = vld [vmem:[%s7403_s10 + $0xba4] sm:$0xf0]  ;;  %3623 = vmatmul.bf16.vlgmr.msra.gmra.mxu3 %v7576_v29 }
 0x168   : > { %v6152_v51 = vld [vmem:[%s7403_s10 + $0xd88] sm:$0xf]  ;;  %v5897_v57 = vor.u32 %v6851_v49, %v5896_v47  ;;  %3667 = vmatpush.bf16.msrb.mxu3 %v6441_v50  ;;  %3629 = vmatpush.bf16.msrb.mxu0 %v5641_v53 }
 0x169   : > { %v6915_v52 = vld [vmem:[%s7403_s10 + $0xda4] sm:$0xf0] }
 0x16a   : > { %v6408_v55 = vld [vmem:[%s7403_s10 + $0xf88] sm:$0xf]  ;;  %v6153_v60 = vor.u32 %v6915_v52, %v6152_v51  ;;  %3642 = vmatpush.bf16.msrb.mxu1 %v5897_v57 }
 0x16b   : > { %v6979_v56 = vld [vmem:[%s7403_s10 + $0xfa4] sm:$0xf0] }
 0x16c   : > { %v5608_v58 = vld [vmem:[%s7403_s10 + $0x948] sm:$0xf]  ;;  %v6409_v63 = vor.u32 %v6979_v56, %v6408_v55  ;;  %3655 = vmatpush.bf16.msrb.mxu2 %v6153_v60 }
 0x16d   : > { %v6779_v59 = vld [vmem:[%s7403_s10 + $0x964] sm:$0xf0] }
 0x16e   : > { %v5864_v61 = vld [vmem:[%s7403_s10 + $0xb48] sm:$0xf]  ;;  %v5609_v2 = vor.u32 %v6779_v59, %v5608_v58  ;;  %3668 = vmatpush.bf16.msrb.mxu3 %v6409_v63  ;;  %v3377_v63 = vpop.f32.mrf.mxu0 }
 0x16f   : > { %v6843_v62 = vld [vmem:[%s7403_s10 + $0xb64] sm:$0xf0] }
 0x170   : > { %v6120_v0 = vld [vmem:[%s7403_s10 + $0xd48] sm:$0xf]  ;;  %v5865_v5 = vor.u32 %v6843_v62, %v5864_v61  ;;  %3630 = vmatpush.bf16.msrb.mxu0 %v5609_v2 }
 0x171   : > { %v6907_v1 = vld [vmem:[%s7403_s10 + $0xd64] sm:$0xf0] }
 0x172   : > { %v6376_v3 = vld [vmem:[%s7403_s10 + $0xf48] sm:$0xf]  ;;  %v6121_v8 = vor.u32 %v6907_v1, %v6120_v0  ;;  %3643 = vmatpush.bf16.msrb.mxu1 %v5865_v5 }
 0x173   : > { %v6971_v4 = vld [vmem:[%s7403_s10 + $0xf64] sm:$0xf0] }
 0x174   : > { %v5576_v6 = vld [vmem:[%s7403_s10 + $0x908] sm:$0xf]  ;;  %v6377_v11 = vor.u32 %v6971_v4, %v6376_v3  ;;  %3656 = vmatpush.bf16.msrb.mxu2 %v6121_v8 }
 0x175   : > { %v6771_v7 = vld [vmem:[%s7403_s10 + $0x924] sm:$0xf0] }
 0x176   : > { %v5832_v9 = vld [vmem:[%s7403_s10 + $0xb08] sm:$0xf]  ;;  %v5577_v14 = vor.u32 %v6771_v7, %v5576_v6  ;;  %3669 = vmatpush.bf16.msrb.mxu3 %v6377_v11  ;;  %v6535_v6 = vld [vmem:[%s7403_s10 + $0x1cc] sm:$0xf] }
 0x177   : > { %v6835_v10 = vld [vmem:[%s7403_s10 + $0xb24] sm:$0xf0]  ;;  %v4650_v7 = vld [vmem:[%s7403_s10 + $0x1e8] sm:$0xf0] }
 0x178   : > { %v6088_v12 = vld [vmem:[%s7403_s10 + $0xd08] sm:$0xf]  ;;  %v5833_v17 = vor.u32 %v6835_v10, %v5832_v9  ;;  %3631 = vmatpush.bf16.msrb.mxu0 %v5577_v14  ;;  %v6599_v10 = vld [vmem:[%s7403_s10 + $0x3cc] sm:$0xf] }
 0x179   : > { %v6899_v13 = vld [vmem:[%s7403_s10 + $0xd24] sm:$0xf0]  ;;  %v4906_v11 = vld [vmem:[%s7403_s10 + $0x3e8] sm:$0xf0] }
 0x17a   : > { %v6344_v15 = vld [vmem:[%s7403_s10 + $0xf08] sm:$0xf]  ;;  %v6089_v21 = vor.u32 %v6899_v13, %v6088_v12  ;;  %3644 = vmatpush.bf16.msrb.mxu1 %v5833_v17  ;;  %v3390_v12 = vpop.f32.mrf.mxu1 }
 0x17b   : > { %v6963_v16 = vld [vmem:[%s7403_s10 + $0xf24] sm:$0xf0]  ;;  %v3391_v17 = vadd.f32 %v3390_v12, %v3377_v63 }
 0x17c   : > { %v5544_v18 = vld [vmem:[%s7403_s10 + $0x8c8] sm:$0xf]  ;;  %v6345_v24 = vor.u32 %v6963_v16, %v6344_v15  ;;  %3657 = vmatpush.bf16.msrb.mxu2 %v6089_v21  ;;  %v6663_v15 = vld [vmem:[%s7403_s10 + $0x5cc] sm:$0xf]  ;;  %v4653_v21 = vor.u32 %v6535_v6, %v4650_v7 }
 0x17d   : > { %v6763_v19 = vld [vmem:[%s7403_s10 + $0x8e4] sm:$0xf0]  ;;  %v5162_v16 = vld [vmem:[%s7403_s10 + $0x5e8] sm:$0xf0] }
 0x17e   : > { %v5800_v22 = vld [vmem:[%s7403_s10 + $0xac8] sm:$0xf]  ;;  %v5545_v27 = vor.u32 %v6763_v19, %v5544_v18  ;;  %3670 = vmatpush.bf16.msrb.mxu3 %v6345_v24  ;;  %v3403_v18 = vpop.f32.mrf.mxu2  ;;  %v6639_v7 = vld [vmem:[%s7403_s10 + $0x50c] sm:$0xf] }
 0x17f   : > { %v6827_v23 = vld [vmem:[%s7403_s10 + $0xae4] sm:$0xf0] }
 0x180   : > { %v6056_v25 = vld [vmem:[%s7403_s10 + $0xcc8] sm:$0xf]  ;;  %v5801_v32 = vor.u32 %v6827_v23, %v5800_v22  ;;  %3632 = vmatpush.bf16.msrb.mxu0 %v5545_v27  ;;  %v6727_v22 = vld [vmem:[%s7403_s10 + $0x7cc] sm:$0xf] }
 0x181   : > { %v6891_v26 = vld [vmem:[%s7403_s10 + $0xce4] sm:$0xf0]  ;;  %v5418_v23 = vld [vmem:[%s7403_s10 + $0x7e8] sm:$0xf0] }
 0x182   : > { %v6312_v30 = vld [vmem:[%s7403_s10 + $0xec8] sm:$0xf]  ;;  %v6057_v36 = vor.u32 %v6891_v26, %v6056_v25  ;;  %3645 = vmatpush.bf16.msrb.mxu1 %v5801_v32  ;;  %v4909_v25 = vor.u32 %v6599_v10, %v4906_v11  ;;  %v6527_v26 = vld [vmem:[%s7403_s10 + $0x18c] sm:$0xf]  ;;  %v5165_v32 = vor.u32 %v6663_v15, %v5162_v16 }
 0x183   : > { %v6955_v31 = vld [vmem:[%s7403_s10 + $0xee4] sm:$0xf0]  ;;  %v4618_v27 = vld [vmem:[%s7403_s10 + $0x1a8] sm:$0xf0] }
 0x184   : > { %v5512_v33 = vld [vmem:[%s7403_s10 + $0x888] sm:$0xf]  ;;  %v6313_v39 = vor.u32 %v6955_v31, %v6312_v30  ;;  %3658 = vmatpush.bf16.msrb.mxu2 %v6057_v36  ;;  %v3404_v30 = vadd.f32 %v3403_v18, %v3391_v17  ;;  %v3416_v36 = vpop.f32.mrf.mxu3  ;;  %v6703_v10 = vld [vmem:[%s7403_s10 + $0x70c] sm:$0xf] }
 0x185   : > { %v6755_v35 = vld [vmem:[%s7403_s10 + $0x8a4] sm:$0xf0]  ;;  %v5322_v11 = vld [vmem:[%s7403_s10 + $0x728] sm:$0xf0] }
 0x186   : > { %v5768_v37 = vld [vmem:[%s7403_s10 + $0xa88] sm:$0xf]  ;;  %v5513_v43 = vor.u32 %v6755_v35, %v5512_v33  ;;  %3671 = vmatpush.bf16.msrb.mxu3 %v6313_v39  ;;  %v6591_v33 = vld [vmem:[%s7403_s10 + $0x38c] sm:$0xf]  ;;  %v5325_v18 = vor.u32 %v6703_v10, %v5322_v11 }
 0x187   : > { %v6819_v38 = vld [vmem:[%s7403_s10 + $0xaa4] sm:$0xf0]  ;;  %v4874_v35 = vld [vmem:[%s7403_s10 + $0x3a8] sm:$0xf0] }
 0x188   : > { %v6024_v40 = vld [vmem:[%s7403_s10 + $0xc88] sm:$0xf]  ;;  %v5769_v47 = vor.u32 %v6819_v38, %v5768_v37  ;;  %3633 = vmatpush.bf16.msrb.mxu0 %v5513_v43  ;;  %v5421_v37 = vor.u32 %v6727_v22, %v5418_v23  ;;  %v6655_v38 = vld [vmem:[%s7403_s10 + $0x58c] sm:$0xf]  ;;  %v4621_v43 = vor.u32 %v6527_v26, %v4618_v27 }
 0x189   : > { %v6883_v42 = vld [vmem:[%s7403_s10 + $0xca4] sm:$0xf0]  ;;  %v5130_v39 = vld [vmem:[%s7403_s10 + $0x5a8] sm:$0xf0] }
 0x18a   : > { %v6280_v44 = vld [vmem:[%s7403_s10 + $0xe88] sm:$0xf]  ;;  %v6025_v51 = vor.u32 %v6883_v42, %v6024_v40  ;;  %3646 = vmatpush.bf16.msrb.mxu1 %v5769_v47  ;;  %v7912_v40 = vadd.f32 %v3416_v36, %v3404_v30  ;;  %v3379_v42 = vpop.f32.mrf.mxu0  ;;  %v4877_v47 = vor.u32 %v6591_v33, %v4874_v35  ;;  %v6567_v16 = vld [vmem:[%s7403_s10 + $0x2cc] sm:$0xf] }
 0x18b   : > { %v6947_v45 = vld [vmem:[%s7403_s10 + $0xea4] sm:$0xf0]  ;;  %v4778_v17 = vld [vmem:[%s7403_s10 + $0x2e8] sm:$0xf0] }
 0x18c   : > { %v5480_v49 = vld [vmem:[%s7403_s10 + $0x848] sm:$0xf]  ;;  %v6281_v55 = vor.u32 %v6947_v45, %v6280_v44  ;;  %3659 = vmatpush.bf16.msrb.mxu2 %v6025_v51  ;;  %v6719_v44 = vld [vmem:[%s7403_s10 + $0x78c] sm:$0xf]  ;;  %v5133_v51 = vor.u32 %v6655_v38, %v5130_v39  ;;  %v4781_v26 = vor.u32 %v6567_v16, %v4778_v17 }
 0x18d   : > { %v6747_v50 = vld [vmem:[%s7403_s10 + $0x864] sm:$0xf0]  ;;  %v5386_v45 = vld [vmem:[%s7403_s10 + $0x7a8] sm:$0xf0] }
 0x18e   : > { %v5736_v52 = vld [vmem:[%s7403_s10 + $0xa48] sm:$0xf]  ;;  %v5481_v59 = vor.u32 %v6747_v50, %v5480_v49  ;;  %3672 = vmatpush.bf16.msrb.mxu3 %v6281_v55  ;;  %v6519_v49 = vld [vmem:[%s7403_s10 + $0x14c] sm:$0xf]  ;;  %v3392_v55 = vpop.f32.mrf.mxu1 }
 0x18f   : > { %v6811_v53 = vld [vmem:[%s7403_s10 + $0xa64] sm:$0xf0]  ;;  %v4586_v50 = vld [vmem:[%s7403_s10 + $0x168] sm:$0xf0] }
 0x190   : > { %v5992_v56 = vld [vmem:[%s7403_s10 + $0xc48] sm:$0xf]  ;;  %v5737_v0 = vor.u32 %v6811_v53, %v5736_v52  ;;  %3634 = vmatpush.bf16.msrb.mxu0 %v5481_v59  ;;  %v6583_v52 = vld [vmem:[%s7403_s10 + $0x34c] sm:$0xf]  ;;  %v3405_v59 = vpop.f32.mrf.mxu2 }
 0x191   : > { %v6875_v57 = vld [vmem:[%s7403_s10 + $0xc64] sm:$0xf0]  ;;  %v4842_v53 = vld [vmem:[%s7403_s10 + $0x368] sm:$0xf0] }
 0x192   : > { %v6248_v58 = vld [vmem:[%s7403_s10 + $0xe48] sm:$0xf]  ;;  %v5993_v4 = vor.u32 %v6875_v57, %v5992_v56  ;;  %3647 = vmatpush.bf16.msrb.mxu1 %v5737_v0  ;;  %v5389_v56 = vor.u32 %v6719_v44, %v5386_v45  ;;  %v6647_v57 = vld [vmem:[%s7403_s10 + $0x54c] sm:$0xf]  ;;  %v4845_v63 = vor.u32 %v6583_v52, %v4842_v53 }
 0x193   : > { %v6939_v60 = vld [vmem:[%s7403_s10 + $0xe64] sm:$0xf0]  ;;  %v6511_v0 = vld [vmem:[%s7403_s10 + $0x10c] sm:$0xf] }
 0x194   : > { %v5448_v61 = vld [vmem:[%s7403_s10 + $0x808] sm:$0xf]  ;;  %v6249_v8 = vor.u32 %v6939_v60, %v6248_v58  ;;  %3660 = vmatpush.bf16.msrb.mxu2 %v5993_v4  ;;  %v5098_v58 = vld [vmem:[%s7403_s10 + $0x568] sm:$0xf0]  ;;  %v4589_v60 = vor.u32 %v6519_v49, %v4586_v50 }
 0x195   : > { %v6739_v62 = vld [vmem:[%s7403_s10 + $0x824] sm:$0xf0]  ;;  %v4810_v4 = vld [vmem:[%s7403_s10 + $0x328] sm:$0xf0] }
 0x196   : > { %v5704_v1 = vld [vmem:[%s7403_s10 + $0xa08] sm:$0xf]  ;;  %v5449_v13 = vor.u32 %v6739_v62, %v5448_v61  ;;  %3673 = vmatpush.bf16.msrb.mxu3 %v6249_v8  ;;  %v6711_v61 = vld [vmem:[%s7403_s10 + $0x74c] sm:$0xf] }
 0x197   : > { %v6803_v2 = vld [vmem:[%s7403_s10 + $0xa24] sm:$0xf0]  ;;  %v5354_v62 = vld [vmem:[%s7403_s10 + $0x768] sm:$0xf0] }
 0x198   : > { %v5960_v3 = vld [vmem:[%s7403_s10 + $0xc08] sm:$0xf]  ;;  %v5705_v19 = vor.u32 %v6803_v2, %v5704_v1  ;;  %3635 = vmatpush.bf16.msrb.mxu0 %v5449_v13  ;;  %v4554_v1 = vld [vmem:[%s7403_s10 + $0x128] sm:$0xf0]  ;;  %v5101_v2 = vor.u32 %v6647_v57, %v5098_v58  ;;  %v5357_v6 = vor.u32 %v6711_v61, %v5354_v62  ;;  %v3455_v55 = vpop.f32.mrf.mxu2 }
 0x199   : > { %v6867_v5 = vld [vmem:[%s7403_s10 + $0xc24] sm:$0xf0]  ;;  %v5066_v8 = vld [vmem:[%s7403_s10 + $0x528] sm:$0xf0] }
 0x19a   : > { %v6216_v9 = vld [vmem:[%s7403_s10 + $0xe08] sm:$0xf]  ;;  %v5961_v24 = vor.u32 %v6867_v5, %v5960_v3  ;;  %3648 = vmatpush.bf16.msrb.mxu1 %v5705_v19  ;;  %v6575_v3 = vld [vmem:[%s7403_s10 + $0x30c] sm:$0xf]  ;;  %v3418_v5 = vpop.f32.mrf.mxu3  ;;  %v5069_v15 = vor.u32 %v6639_v7, %v5066_v8 }
 0x19b   : > { %v6931_v14 = vld [vmem:[%s7403_s10 + $0xe24] sm:$0xf0]  ;;  %3636 = vmatmul.bf16.vlgmr.msrb.gmra.mxu0 %v7631_v41  ;;  %v4813_v12 = vor.u32 %v6575_v3, %v4810_v4  ;;  %v6503_v13 = vld [vmem:[%s7403_s10 + $0xcc] sm:$0xf] }
 0x19c   : > { %v6217_v31 = vor.u32 %v6931_v14, %v6216_v9  ;;  %3680 = vmatpush.bf16.msra.mxu0 %v4653_v21  ;;  %3661 = vmatpush.bf16.msrb.mxu2 %v5961_v24  ;;  %v4557_v9 = vor.u32 %v6511_v0, %v4554_v1  ;;  %v4522_v14 = vld [vmem:[%s7403_s10 + $0xe8] sm:$0xf0] }
 0x19d   : > { %3649 = vmatmul.bf16.vlgmr.msrb.gmra.mxu1 %v7644_v54  ;;  %v6631_v19 = vld [vmem:[%s7403_s10 + $0x4cc] sm:$0xf]  ;;  %v4525_v22 = vor.u32 %v6503_v13, %v4522_v14 }
 0x19e   : > { %3693 = vmatpush.bf16.msra.mxu1 %v4909_v25  ;;  %3674 = vmatpush.bf16.msrb.mxu3 %v6217_v31  ;;  %v5034_v21 = vld [vmem:[%s7403_s10 + $0x4e8] sm:$0xf0]  ;;  %v3429_v25 = vpop.f32.mrf.mxu0 }
 0x19f   : > { %3662 = vmatmul.bf16.vlgmr.msrb.gmra.mxu2 %v7636_v46  ;;  %v6695_v23 = vld [vmem:[%s7403_s10 + $0x6cc] sm:$0xf]  ;;  %v3430_v27 = vadd.f32 %v3429_v25, %v7912_v40 }
 0x1a0   : > { %3706 = vmatpush.bf16.msra.mxu2 %v5165_v32  ;;  %3681 = vmatpush.bf16.msra.mxu0 %v4621_v43  ;;  %v5290_v24 = vld [vmem:[%s7403_s10 + $0x6e8] sm:$0xf0]  ;;  %v5037_v32 = vor.u32 %v6631_v19, %v5034_v21 }
 0x1a1   : > { %3675 = vmatmul.bf16.vlgmr.msrb.gmra.mxu3 %v7638_v48  ;;  %v6495_v30 = vld [vmem:[%s7403_s10 + $0x8c] sm:$0xf]  ;;  %v5293_v36 = vor.u32 %v6695_v23, %v5290_v24 }
 0x1a2   : > { %3719 = vmatpush.bf16.msra.mxu3 %v5421_v37  ;;  %3694 = vmatpush.bf16.msra.mxu1 %v4877_v47  ;;  %v4490_v31 = vld [vmem:[%s7403_s10 + $0xa8] sm:$0xf0]  ;;  %v3442_v37 = vpop.f32.mrf.mxu1 }
 0x1a3   : > { %v6559_v33 = vld [vmem:[%s7403_s10 + $0x28c] sm:$0xf]  ;;  %v3443_v42 = vadd.f32 %v3442_v37, %v3430_v27  ;;  %v4493_v40 = vor.u32 %v6495_v30, %v4490_v31 }
 0x1a4   : > { %3707 = vmatpush.bf16.msra.mxu2 %v5133_v51  ;;  %3682 = vmatpush.bf16.msra.mxu0 %v4589_v60  ;;  %v4746_v35 = vld [vmem:[%s7403_s10 + $0x2a8] sm:$0xf0]  ;;  %v3468_v60 = vpop.f32.mrf.mxu3 }
 0x1a5   : > { %v6623_v38 = vld [vmem:[%s7403_s10 + $0x48c] sm:$0xf]  ;;  %v4749_v45 = vor.u32 %v6559_v33, %v4746_v35  ;;  %v3456_v59 = vadd.f32 %v3455_v55, %v3443_v42 }
 0x1a6   : > { %3720 = vmatpush.bf16.msra.mxu3 %v5389_v56  ;;  %3695 = vmatpush.bf16.msra.mxu1 %v4845_v63  ;;  %v5002_v39 = vld [vmem:[%s7403_s10 + $0x4a8] sm:$0xf0]  ;;  %v3431_v1 = vpop.f32.mrf.mxu0 }
 0x1a7   : > { %v6687_v43 = vld [vmem:[%s7403_s10 + $0x68c] sm:$0xf]  ;;  %v5005_v50 = vor.u32 %v6623_v38, %v5002_v39 }
 0x1a8   : > { %3708 = vmatpush.bf16.msra.mxu2 %v5101_v2  ;;  %3683 = vmatpush.bf16.msra.mxu0 %v4557_v9  ;;  %v5258_v44 = vld [vmem:[%s7403_s10 + $0x6a8] sm:$0xf0] }
 0x1a9   : > { %v6487_v47 = vld [vmem:[%s7403_s10 + $0x4c] sm:$0xf]  ;;  %v5261_v53 = vor.u32 %v6687_v43, %v5258_v44 }
 0x1aa   : > { %3721 = vmatpush.bf16.msra.mxu3 %v5357_v6  ;;  %3696 = vmatpush.bf16.msra.mxu1 %v4813_v12  ;;  %v4458_v49 = vld [vmem:[%s7403_s10 + $0x68] sm:$0xf0]  ;;  %v7966_v6 = vadd.f32 %v3468_v60, %v3456_v59 }
 0x1ab   : > { %v6551_v51 = vld [vmem:[%s7403_s10 + $0x24c] sm:$0xf]  ;;  %v4461_v61 = vor.u32 %v6487_v47, %v4458_v49 }
 0x1ac   : > { %3709 = vmatpush.bf16.msra.mxu2 %v5069_v15  ;;  %3684 = vmatpush.bf16.msra.mxu0 %v4525_v22  ;;  %v4714_v52 = vld [vmem:[%s7403_s10 + $0x268] sm:$0xf0]  ;;  %v3444_v15 = vpop.f32.mrf.mxu1  ;;  %v3470_v42 = vpop.f32.mrf.mxu3 }
 0x1ad   : > { %v6615_v56 = vld [vmem:[%s7403_s10 + $0x44c] sm:$0xf]  ;;  %v4717_v2 = vor.u32 %v6551_v51, %v4714_v52 }
 0x1ae   : > { %3722 = vmatpush.bf16.msra.mxu3 %v5325_v18  ;;  %3697 = vmatpush.bf16.msra.mxu1 %v4781_v26  ;;  %v4970_v57 = vld [vmem:[%s7403_s10 + $0x468] sm:$0xf0] }
 0x1af   : > { %v6679_v58 = vld [vmem:[%s7403_s10 + $0x64c] sm:$0xf]  ;;  %v4973_v7 = vor.u32 %v6615_v56, %v4970_v57 }
 0x1b0   : > { %3710 = vmatpush.bf16.msra.mxu2 %v5037_v32  ;;  %3685 = vmatpush.bf16.msra.mxu0 %v4493_v40  ;;  %v5226_v62 = vld [vmem:[%s7403_s10 + $0x668] sm:$0xf0] }
 0x1b1   : > { %v6479_v63 = vld [vmem:[%s7403_s10 + $0xc] sm:$0xf]  ;;  %v5229_v11 = vor.u32 %v6679_v58, %v5226_v62 }
 0x1b2   : > { %3723 = vmatpush.bf16.msra.mxu3 %v5293_v36  ;;  %v4426_v0 = vld [vmem:[%s7403_s10 + $0x28] sm:$0xf0]  ;;  %3698 = vmatpush.bf16.msra.mxu1 %v4749_v45  ;;  %v3457_v36 = vpop.f32.mrf.mxu2 }
 0x1b3   : > { %v6543_v3 = vld [vmem:[%s7403_s10 + $0x20c] sm:$0xf]  ;;  %v4429_v16 = vor.u32 %v6479_v63, %v4426_v0 }
 0x1b4   : > { %v4682_v4 = vld [vmem:[%s7403_s10 + $0x228] sm:$0xf0]  ;;  %3711 = vmatpush.bf16.msra.mxu2 %v5005_v50  ;;  %3686 = vmatpush.bf16.msra.mxu0 %v4461_v61 }
 0x1b5   : > { %v6607_v5 = vld [vmem:[%s7403_s10 + $0x40c] sm:$0xf]  ;;  %v4685_v21 = vor.u32 %v6543_v3, %v4682_v4 }
 0x1b6   : > { %v4938_v8 = vld [vmem:[%s7403_s10 + $0x428] sm:$0xf0]  ;;  %3724 = vmatpush.bf16.msra.mxu3 %v5261_v53  ;;  %3699 = vmatpush.bf16.msra.mxu1 %v4717_v2 }
 0x1b7   : > { %v6791_v9 = vld [vmem:[%s7403_s10 + $0x9cc] sm:$0xf]  ;;  %v4941_v25 = vor.u32 %v6607_v5, %v4938_v8 }
 0x1b8   : > { %v5674_v10 = vld [vmem:[%s7403_s10 + $0x9e8] sm:$0xf0]  ;;  %3712 = vmatpush.bf16.msra.mxu2 %v4973_v7  ;;  %3687 = vmatpush.bf16.msra.mxu0 %v4429_v16 }
 0x1b9   : > { %v6671_v12 = vld [vmem:[%s7403_s10 + $0x60c] sm:$0xf]  ;;  %v5677_v22 = vor.u32 %v6791_v9, %v5674_v10 }
 0x1ba   : > { %v6855_v13 = vld [vmem:[%s7403_s10 + $0xbcc] sm:$0xf]  ;;  %3725 = vmatpush.bf16.msra.mxu3 %v5229_v11  ;;  %3700 = vmatpush.bf16.msra.mxu1 %v4685_v21 }
 0x1bb   : > { %v5930_v14 = vld [vmem:[%s7403_s10 + $0xbe8] sm:$0xf0]  ;;  %3688 = vmatmul.bf16.vlgmr.msra.gmra.mxu0 %v7574_v28 }
 0x1bc   : > { %v5194_v17 = vld [vmem:[%s7403_s10 + $0x628] sm:$0xf0]  ;;  %v5933_v26 = vor.u32 %v6855_v13, %v5930_v14  ;;  %3732 = vmatpush.bf16.msrb.mxu0 %v5677_v22  ;;  %3713 = vmatpush.bf16.msra.mxu2 %v4941_v25  ;;  %v3481_v22 = vpop.f32.mrf.mxu0 }
 0x1bd   : > { %v6919_v18 = vld [vmem:[%s7403_s10 + $0xdcc] sm:$0xf]  ;;  %v5197_v31 = vor.u32 %v6671_v12, %v5194_v17  ;;  %3701 = vmatmul.bf16.vlgmr.msra.gmra.mxu1 %v7581_v34 }
 0x1be   : > { %v6186_v19 = vld [vmem:[%s7403_s10 + $0xde8] sm:$0xf0]  ;;  %3745 = vmatpush.bf16.msrb.mxu1 %v5933_v26 }
 0x1bf   : > { %v6983_v23 = vld [vmem:[%s7403_s10 + $0xfcc] sm:$0xf]  ;;  %v6189_v32 = vor.u32 %v6919_v18, %v6186_v19  ;;  %3726 = vmatpush.bf16.msra.mxu3 %v5197_v31  ;;  %3714 = vmatmul.bf16.vlgmr.msra.gmra.mxu2 %v7566_v20 }
 0x1c0   : > { %v6442_v24 = vld [vmem:[%s7403_s10 + $0xfe8] sm:$0xf0] }
 0x1c1   : > { %v6783_v27 = vld [vmem:[%s7403_s10 + $0x98c] sm:$0xf]  ;;  %v6445_v37 = vor.u32 %v6983_v23, %v6442_v24  ;;  %3758 = vmatpush.bf16.msrb.mxu2 %v6189_v32 }
 0x1c2   : > { %v5642_v30 = vld [vmem:[%s7403_s10 + $0x9a8] sm:$0xf0]  ;;  %3727 = vmatmul.bf16.vlgmr.msra.gmra.mxu3 %v7576_v29 }
 0x1c3   : > { %v6847_v33 = vld [vmem:[%s7403_s10 + $0xb8c] sm:$0xf]  ;;  %v5645_v40 = vor.u32 %v6783_v27, %v5642_v30  ;;  %3771 = vmatpush.bf16.msrb.mxu3 %v6445_v37 }
 0x1c4   : > { %v5898_v35 = vld [vmem:[%s7403_s10 + $0xba8] sm:$0xf0] }
 0x1c5   : > { %v6911_v38 = vld [vmem:[%s7403_s10 + $0xd8c] sm:$0xf]  ;;  %v5901_v45 = vor.u32 %v6847_v33, %v5898_v35  ;;  %3733 = vmatpush.bf16.msrb.mxu0 %v5645_v40  ;;  %v3494_v35 = vpop.f32.mrf.mxu1 }
 0x1c6   : > { %v6154_v39 = vld [vmem:[%s7403_s10 + $0xda8] sm:$0xf0] }
 0x1c7   : > { %v6975_v43 = vld [vmem:[%s7403_s10 + $0xf8c] sm:$0xf]  ;;  %v6157_v50 = vor.u32 %v6911_v38, %v6154_v39  ;;  %3746 = vmatpush.bf16.msrb.mxu1 %v5901_v45  ;;  %v3495_v39 = vadd.f32 %v3494_v35, %v3481_v22  ;;  %v5136_v35 = vld [vmem:[%s7403_s10 + $0x590] sm:$0xf] }
 0x1c8   : > { %v6410_v44 = vld [vmem:[%s7403_s10 + $0xfa8] sm:$0xf0] }
 0x1c9   : > { %v6775_v47 = vld [vmem:[%s7403_s10 + $0x94c] sm:$0xf]  ;;  %v6413_v53 = vor.u32 %v6975_v43, %v6410_v44  ;;  %3759 = vmatpush.bf16.msrb.mxu2 %v6157_v50 }
 0x1ca   : > { %v5610_v49 = vld [vmem:[%s7403_s10 + $0x968] sm:$0xf0] }
 0x1cb   : > { %v6839_v51 = vld [vmem:[%s7403_s10 + $0xb4c] sm:$0xf]  ;;  %v5613_v57 = vor.u32 %v6775_v47, %v5610_v49  ;;  %3772 = vmatpush.bf16.msrb.mxu3 %v6413_v53  ;;  %v3507_v53 = vpop.f32.mrf.mxu2 }
 0x1cc   : > { %v5866_v52 = vld [vmem:[%s7403_s10 + $0xb68] sm:$0xf0] }
 0x1cd   : > { %v6903_v55 = vld [vmem:[%s7403_s10 + $0xd4c] sm:$0xf]  ;;  %v5869_v60 = vor.u32 %v6839_v51, %v5866_v52  ;;  %3734 = vmatpush.bf16.msrb.mxu0 %v5613_v57 }
 0x1ce   : > { %v6122_v56 = vld [vmem:[%s7403_s10 + $0xd68] sm:$0xf0] }
 0x1cf   : > { %v6967_v58 = vld [vmem:[%s7403_s10 + $0xf4c] sm:$0xf]  ;;  %v6125_v63 = vor.u32 %v6903_v55, %v6122_v56  ;;  %3747 = vmatpush.bf16.msrb.mxu1 %v5869_v60  ;;  %v3520_v60 = vpop.f32.mrf.mxu3 }
 0x1d0   : > { %v6378_v59 = vld [vmem:[%s7403_s10 + $0xf68] sm:$0xf0] }
 0x1d1   : > { %v6767_v61 = vld [vmem:[%s7403_s10 + $0x90c] sm:$0xf]  ;;  %v6381_v2 = vor.u32 %v6967_v58, %v6378_v59  ;;  %3760 = vmatpush.bf16.msrb.mxu2 %v6125_v63  ;;  %v3508_v59 = vadd.f32 %v3507_v53, %v3495_v39  ;;  %v5392_v39 = vld [vmem:[%s7403_s10 + $0x790] sm:$0xf] }
 0x1d2   : > { %v5578_v62 = vld [vmem:[%s7403_s10 + $0x928] sm:$0xf0] }
 0x1d3   : > { %v6831_v0 = vld [vmem:[%s7403_s10 + $0xb0c] sm:$0xf]  ;;  %v5581_v5 = vor.u32 %v6767_v61, %v5578_v62  ;;  %3773 = vmatpush.bf16.msrb.mxu3 %v6381_v2  ;;  %v3483_v61 = vpop.f32.mrf.mxu0 }
 0x1d4   : > { %v5834_v1 = vld [vmem:[%s7403_s10 + $0xb28] sm:$0xf0]  ;;  %v4816_v61 = vld [vmem:[%s7403_s10 + $0x310] sm:$0xf] }
 0x1d5   : > { %v6895_v3 = vld [vmem:[%s7403_s10 + $0xd0c] sm:$0xf]  ;;  %v5837_v9 = vor.u32 %v6831_v0, %v5834_v1  ;;  %3735 = vmatpush.bf16.msrb.mxu0 %v5581_v5  ;;  %v6540_v5 = vld [vmem:[%s7403_s10 + $0x1ec] sm:$0xf0] }
 0x1d6   : > { %v6090_v4 = vld [vmem:[%s7403_s10 + $0xd28] sm:$0xf0] }
 0x1d7   : > { %v6959_v7 = vld [vmem:[%s7403_s10 + $0xf0c] sm:$0xf]  ;;  %v6093_v12 = vor.u32 %v6895_v3, %v6090_v4  ;;  %3748 = vmatpush.bf16.msrb.mxu1 %v5837_v9  ;;  %v4656_v4 = vld [vmem:[%s7403_s10 + $0x1d0] sm:$0xf] }
 0x1d8   : > { %v6346_v8 = vld [vmem:[%s7403_s10 + $0xf28] sm:$0xf0] }
 0x1d9   : > { %v6759_v10 = vld [vmem:[%s7403_s10 + $0x8cc] sm:$0xf]  ;;  %v6349_v15 = vor.u32 %v6959_v7, %v6346_v8  ;;  %3761 = vmatpush.bf16.msrb.mxu2 %v6093_v12  ;;  %v8039_v7 = vadd.f32 %v3520_v60, %v3508_v59  ;;  %v3496_v12 = vpop.f32.mrf.mxu1  ;;  %v6516_v59 = vld [vmem:[%s7403_s10 + $0x12c] sm:$0xf0] }
 0x1da   : > { %v5546_v11 = vld [vmem:[%s7403_s10 + $0x8e8] sm:$0xf0]  ;;  %v6572_v12 = vld [vmem:[%s7403_s10 + $0x2ec] sm:$0xf0] }
 0x1db   : > { %v6823_v13 = vld [vmem:[%s7403_s10 + $0xacc] sm:$0xf]  ;;  %v5549_v18 = vor.u32 %v6759_v10, %v5546_v11  ;;  %3774 = vmatpush.bf16.msrb.mxu3 %v6349_v15  ;;  %v4912_v10 = vld [vmem:[%s7403_s10 + $0x3d0] sm:$0xf] }
 0x1dc   : > { %v5802_v14 = vld [vmem:[%s7403_s10 + $0xae8] sm:$0xf0]  ;;  %v6604_v11 = vld [vmem:[%s7403_s10 + $0x3ec] sm:$0xf0] }
 0x1dd   : > { %v6887_v16 = vld [vmem:[%s7403_s10 + $0xccc] sm:$0xf]  ;;  %v5805_v23 = vor.u32 %v6823_v13, %v5802_v14  ;;  %3736 = vmatpush.bf16.msrb.mxu0 %v5549_v18  ;;  %v5168_v15 = vld [vmem:[%s7403_s10 + $0x5d0] sm:$0xf]  ;;  %v4657_v18 = vor.u32 %v6540_v5, %v4656_v4 }
 0x1de   : > { %v6058_v17 = vld [vmem:[%s7403_s10 + $0xce8] sm:$0xf0]  ;;  %v6708_v4 = vld [vmem:[%s7403_s10 + $0x72c] sm:$0xf0] }
 0x1df   : > { %v6951_v19 = vld [vmem:[%s7403_s10 + $0xecc] sm:$0xf]  ;;  %v6061_v26 = vor.u32 %v6887_v16, %v6058_v17  ;;  %3749 = vmatpush.bf16.msrb.mxu1 %v5805_v23  ;;  %v6668_v16 = vld [vmem:[%s7403_s10 + $0x5ec] sm:$0xf0]  ;;  %v4913_v23 = vor.u32 %v6604_v11, %v4912_v10 }
 0x1e0   : > { %v6314_v21 = vld [vmem:[%s7403_s10 + $0xee8] sm:$0xf0]  ;;  %v4784_v11 = vld [vmem:[%s7403_s10 + $0x2d0] sm:$0xf] }
 0x1e1   : > { %v6751_v24 = vld [vmem:[%s7403_s10 + $0x88c] sm:$0xf]  ;;  %v6317_v31 = vor.u32 %v6951_v19, %v6314_v21  ;;  %3762 = vmatpush.bf16.msrb.mxu2 %v6061_v26  ;;  %v5424_v19 = vld [vmem:[%s7403_s10 + $0x7d0] sm:$0xf] }
 0x1e2   : > { %v5514_v25 = vld [vmem:[%s7403_s10 + $0x8a8] sm:$0xf0]  ;;  %v6732_v21 = vld [vmem:[%s7403_s10 + $0x7ec] sm:$0xf0] }
 0x1e3   : > { %v6815_v27 = vld [vmem:[%s7403_s10 + $0xa8c] sm:$0xf]  ;;  %v5517_v36 = vor.u32 %v6751_v24, %v5514_v25  ;;  %3775 = vmatpush.bf16.msrb.mxu3 %v6317_v31  ;;  %v4624_v24 = vld [vmem:[%s7403_s10 + $0x190] sm:$0xf] }
 0x1e4   : > { %v5770_v30 = vld [vmem:[%s7403_s10 + $0xaa8] sm:$0xf0]  ;;  %v6532_v25 = vld [vmem:[%s7403_s10 + $0x1ac] sm:$0xf0] }
 0x1e5   : > { %v6879_v32 = vld [vmem:[%s7403_s10 + $0xc8c] sm:$0xf]  ;;  %v5773_v42 = vor.u32 %v6815_v27, %v5770_v30  ;;  %3737 = vmatpush.bf16.msrb.mxu0 %v5517_v36  ;;  %v5169_v27 = vor.u32 %v6668_v16, %v5168_v15  ;;  %v4880_v30 = vld [vmem:[%s7403_s10 + $0x390] sm:$0xf] }
 0x1e6   : > { %v6026_v33 = vld [vmem:[%s7403_s10 + $0xca8] sm:$0xf0]  ;;  %v6596_v31 = vld [vmem:[%s7403_s10 + $0x3ac] sm:$0xf0] }
 0x1e7   : > { %v6943_v37 = vld [vmem:[%s7403_s10 + $0xe8c] sm:$0xf]  ;;  %v6029_v44 = vor.u32 %v6879_v32, %v6026_v33  ;;  %3750 = vmatpush.bf16.msrb.mxu1 %v5773_v42  ;;  %v3509_v32 = vpop.f32.mrf.mxu2  ;;  %v5425_v33 = vor.u32 %v6732_v21, %v5424_v19  ;;  %v6660_v36 = vld [vmem:[%s7403_s10 + $0x5ac] sm:$0xf0]  ;;  %v3533_v19 = vpop.f32.mrf.mxu0  ;;  %v4785_v21 = vor.u32 %v6572_v12, %v4784_v11 }
 0x1e8   : > { %v6282_v38 = vld [vmem:[%s7403_s10 + $0xea8] sm:$0xf0]  ;;  %v6724_v42 = vld [vmem:[%s7403_s10 + $0x7ac] sm:$0xf0] }
 0x1e9   : > { %v6743_v40 = vld [vmem:[%s7403_s10 + $0x84c] sm:$0xf]  ;;  %v6285_v49 = vor.u32 %v6943_v37, %v6282_v38  ;;  %3763 = vmatpush.bf16.msrb.mxu2 %v6029_v44  ;;  %v3522_v37 = vpop.f32.mrf.mxu3  ;;  %v4625_v38 = vor.u32 %v6532_v25, %v4624_v24  ;;  %v6524_v44 = vld [vmem:[%s7403_s10 + $0x16c] sm:$0xf0] }
 0x1ea   : > { %v5482_v43 = vld [vmem:[%s7403_s10 + $0x868] sm:$0xf0]  ;;  %v6636_v15 = vld [vmem:[%s7403_s10 + $0x4ec] sm:$0xf0] }
 0x1eb   : > { %v6807_v45 = vld [vmem:[%s7403_s10 + $0xa4c] sm:$0xf]  ;;  %v5485_v55 = vor.u32 %v6743_v40, %v5482_v43  ;;  %3776 = vmatpush.bf16.msrb.mxu3 %v6285_v49  ;;  %v4881_v40 = vor.u32 %v6596_v31, %v4880_v30  ;;  %v4592_v43 = vld [vmem:[%s7403_s10 + $0x150] sm:$0xf]  ;;  %v3546_v31 = vpop.f32.mrf.mxu1 }
 0x1ec   : > { %v5738_v47 = vld [vmem:[%s7403_s10 + $0xa68] sm:$0xf0]  ;;  %v6588_v49 = vld [vmem:[%s7403_s10 + $0x36c] sm:$0xf0]  ;;  %v4593_v53 = vor.u32 %v6524_v44, %v4592_v43 }
 0x1ed   : > { %v6871_v50 = vld [vmem:[%s7403_s10 + $0xc4c] sm:$0xf]  ;;  %v5741_v62 = vor.u32 %v6807_v45, %v5738_v47  ;;  %3738 = vmatpush.bf16.msrb.mxu0 %v5485_v55  ;;  %v5137_v45 = vor.u32 %v6660_v36, %v5136_v35  ;;  %v4848_v47 = vld [vmem:[%s7403_s10 + $0x350] sm:$0xf] }
 0x1ee   : > { %v5994_v51 = vld [vmem:[%s7403_s10 + $0xc68] sm:$0xf0]  ;;  %v5360_v55 = vld [vmem:[%s7403_s10 + $0x750] sm:$0xf] }
 0x1ef   : > { %v6935_v52 = vld [vmem:[%s7403_s10 + $0xe4c] sm:$0xf]  ;;  %v5997_v2 = vor.u32 %v6871_v50, %v5994_v51  ;;  %3751 = vmatpush.bf16.msrb.mxu1 %v5741_v62  ;;  %v5393_v50 = vor.u32 %v6724_v42, %v5392_v39  ;;  %v5104_v51 = vld [vmem:[%s7403_s10 + $0x550] sm:$0xf] }
 0x1f0   : > { %v6250_v56 = vld [vmem:[%s7403_s10 + $0xe68] sm:$0xf0]  ;;  %v6580_v62 = vld [vmem:[%s7403_s10 + $0x32c] sm:$0xf0] }
 0x1f1   : > { %v6735_v57 = vld [vmem:[%s7403_s10 + $0x80c] sm:$0xf]  ;;  %v6253_v8 = vor.u32 %v6935_v52, %v6250_v56  ;;  %3764 = vmatpush.bf16.msrb.mxu2 %v5997_v2  ;;  %v6652_v52 = vld [vmem:[%s7403_s10 + $0x56c] sm:$0xf0]  ;;  %v4817_v5 = vor.u32 %v6580_v62, %v4816_v61 }
 0x1f2   : > { %v5450_v58 = vld [vmem:[%s7403_s10 + $0x828] sm:$0xf0]  ;;  %v6716_v56 = vld [vmem:[%s7403_s10 + $0x76c] sm:$0xf0]  ;;  %v5105_v60 = vor.u32 %v6652_v52, %v5104_v51 }
 0x1f3   : > { %v6799_v63 = vld [vmem:[%s7403_s10 + $0xa0c] sm:$0xf]  ;;  %v5453_v13 = vor.u32 %v6735_v57, %v5450_v58  ;;  %3777 = vmatpush.bf16.msrb.mxu3 %v6253_v8  ;;  %v4849_v57 = vor.u32 %v6588_v49, %v4848_v47  ;;  %v4560_v58 = vld [vmem:[%s7403_s10 + $0x110] sm:$0xf]  ;;  %v3559_v47 = vpop.f32.mrf.mxu2  ;;  %v3548_v11 = vpop.f32.mrf.mxu1 }
 0x1f4   : > { %v5706_v0 = vld [vmem:[%s7403_s10 + $0xa28] sm:$0xf0]  ;;  %v4561_v2 = vor.u32 %v6516_v59, %v4560_v58  ;;  %v4528_v8 = vld [vmem:[%s7403_s10 + $0xd0] sm:$0xf]  ;;  %v3535_v59 = vpop.f32.mrf.mxu0 }
 0x1f5   : > { %v6863_v1 = vld [vmem:[%s7403_s10 + $0xc0c] sm:$0xf]  ;;  %v5709_v17 = vor.u32 %v6799_v63, %v5706_v0  ;;  %3739 = vmatpush.bf16.msrb.mxu0 %v5453_v13  ;;  %v5361_v63 = vor.u32 %v6716_v56, %v5360_v55  ;;  %v5072_v0 = vld [vmem:[%s7403_s10 + $0x510] sm:$0xf] }
 0x1f6   : > { %v5962_v3 = vld [vmem:[%s7403_s10 + $0xc28] sm:$0xf0]  ;;  %v6500_v24 = vld [vmem:[%s7403_s10 + $0xac] sm:$0xf0] }
 0x1f7   : > { %v6927_v9 = vld [vmem:[%s7403_s10 + $0xe0c] sm:$0xf]  ;;  %v5965_v22 = vor.u32 %v6863_v1, %v5962_v3  ;;  %3752 = vmatpush.bf16.msrb.mxu1 %v5709_v17  ;;  %v6644_v1 = vld [vmem:[%s7403_s10 + $0x52c] sm:$0xf0] }
 0x1f8   : > { %v6218_v14 = vld [vmem:[%s7403_s10 + $0xe28] sm:$0xf0]  ;;  %3740 = vmatmul.bf16.vlgmr.msrb.gmra.mxu0 %v7631_v41  ;;  %v5328_v3 = vld [vmem:[%s7403_s10 + $0x710] sm:$0xf]  ;;  %v5073_v10 = vor.u32 %v6644_v1, %v5072_v0 }
 0x1f9   : > { %v6221_v26 = vor.u32 %v6927_v9, %v6218_v14  ;;  %3784 = vmatpush.bf16.msra.mxu0 %v4657_v18  ;;  %3765 = vmatpush.bf16.msrb.mxu2 %v5965_v22  ;;  %v6508_v9 = vld [vmem:[%s7403_s10 + $0xec] sm:$0xf0]  ;;  %v5329_v13 = vor.u32 %v6708_v4, %v5328_v3  ;;  %v3534_v22 = vadd.f32 %v3533_v19, %v8039_v7 }
 0x1fa   : > { %3753 = vmatmul.bf16.vlgmr.msrb.gmra.mxu1 %v7644_v54  ;;  %v5040_v14 = vld [vmem:[%s7403_s10 + $0x4d0] sm:$0xf]  ;;  %v4529_v16 = vor.u32 %v6508_v9, %v4528_v8 }
 0x1fb   : > { %3797 = vmatpush.bf16.msra.mxu1 %v4913_v23  ;;  %3778 = vmatpush.bf16.msrb.mxu3 %v6221_v26  ;;  %v5296_v17 = vld [vmem:[%s7403_s10 + $0x6d0] sm:$0xf]  ;;  %v5041_v25 = vor.u32 %v6636_v15, %v5040_v14  ;;  %v3547_v35 = vadd.f32 %v3546_v31, %v3534_v22  ;;  %v3561_v31 = vpop.f32.mrf.mxu2 }
 0x1fc   : > { %3766 = vmatmul.bf16.vlgmr.msrb.gmra.mxu2 %v7636_v46  ;;  %v6700_v18 = vld [vmem:[%s7403_s10 + $0x6ec] sm:$0xf0]  ;;  %v3598_v31 = vpop.f32.mrf.mxu1 }
 0x1fd   : > { %3810 = vmatpush.bf16.msra.mxu2 %v5169_v27  ;;  %3785 = vmatpush.bf16.msra.mxu0 %v4625_v38  ;;  %v4496_v23 = vld [vmem:[%s7403_s10 + $0x90] sm:$0xf]  ;;  %v5297_v30 = vor.u32 %v6700_v18, %v5296_v17  ;;  %v3560_v52 = vadd.f32 %v3559_v47, %v3547_v35 }
 0x1fe   : > { %3779 = vmatmul.bf16.vlgmr.msrb.gmra.mxu3 %v7638_v48  ;;  %v4752_v26 = vld [vmem:[%s7403_s10 + $0x290] sm:$0xf]  ;;  %v4497_v7 = vor.u32 %v6500_v24, %v4496_v23 }
 0x1ff   : > { %3823 = vmatpush.bf16.msra.mxu3 %v5425_v33  ;;  %3798 = vmatpush.bf16.msra.mxu1 %v4881_v40  ;;  %v6564_v27 = vld [vmem:[%s7403_s10 + $0x2ac] sm:$0xf0] }
 0x200   : > { %v5008_v32 = vld [vmem:[%s7403_s10 + $0x490] sm:$0xf]  ;;  %v4753_v38 = vor.u32 %v6564_v27, %v4752_v26 }
 0x201   : > { %3811 = vmatpush.bf16.msra.mxu2 %v5137_v45  ;;  %3786 = vmatpush.bf16.msra.mxu0 %v4593_v53  ;;  %v6628_v33 = vld [vmem:[%s7403_s10 + $0x4ac] sm:$0xf0]  ;;  %v3572_v53 = vpop.f32.mrf.mxu3 }
 0x202   : > { %v5264_v36 = vld [vmem:[%s7403_s10 + $0x690] sm:$0xf]  ;;  %v5009_v40 = vor.u32 %v6628_v33, %v5008_v32  ;;  %v8107_v0 = vadd.f32 %v3572_v53, %v3560_v52 }
 0x203   : > { %3824 = vmatpush.bf16.msra.mxu3 %v5393_v50  ;;  %3799 = vmatpush.bf16.msra.mxu1 %v4849_v57  ;;  %v6692_v37 = vld [vmem:[%s7403_s10 + $0x6ac] sm:$0xf0] }
 0x204   : > { %v4464_v39 = vld [vmem:[%s7403_s10 + $0x50] sm:$0xf]  ;;  %v5265_v45 = vor.u32 %v6692_v37, %v5264_v36 }
 0x205   : > { %3812 = vmatpush.bf16.msra.mxu2 %v5105_v60  ;;  %3787 = vmatpush.bf16.msra.mxu0 %v4561_v2  ;;  %v6492_v42 = vld [vmem:[%s7403_s10 + $0x6c] sm:$0xf0] }
 0x206   : > { %v4720_v43 = vld [vmem:[%s7403_s10 + $0x250] sm:$0xf]  ;;  %v4465_v55 = vor.u32 %v6492_v42, %v4464_v39 }
 0x207   : > { %3825 = vmatpush.bf16.msra.mxu3 %v5361_v63  ;;  %3800 = vmatpush.bf16.msra.mxu1 %v4817_v5  ;;  %v6556_v44 = vld [vmem:[%s7403_s10 + $0x26c] sm:$0xf0] }
 0x208   : > { %v4976_v49 = vld [vmem:[%s7403_s10 + $0x450] sm:$0xf]  ;;  %v4721_v60 = vor.u32 %v6556_v44, %v4720_v43 }
 0x209   : > { %3813 = vmatpush.bf16.msra.mxu2 %v5073_v10  ;;  %3788 = vmatpush.bf16.msra.mxu0 %v4529_v16  ;;  %v6620_v50 = vld [vmem:[%s7403_s10 + $0x46c] sm:$0xf0] }
 0x20a   : > { %v5232_v51 = vld [vmem:[%s7403_s10 + $0x650] sm:$0xf]  ;;  %v4977_v1 = vor.u32 %v6620_v50, %v4976_v49 }
 0x20b   : > { %3826 = vmatpush.bf16.msra.mxu3 %v5329_v13  ;;  %3801 = vmatpush.bf16.msra.mxu1 %v4785_v21  ;;  %v6684_v56 = vld [vmem:[%s7403_s10 + $0x66c] sm:$0xf0] }
 0x20c   : > { %v4432_v57 = vld [vmem:[%s7403_s10 + $0x10] sm:$0xf]  ;;  %v5233_v5 = vor.u32 %v6684_v56, %v5232_v51 }
 0x20d   : > { %3814 = vmatpush.bf16.msra.mxu2 %v5041_v25  ;;  %3789 = vmatpush.bf16.msra.mxu0 %v4497_v7  ;;  %v6484_v58 = vld [vmem:[%s7403_s10 + $0x2c] sm:$0xf0]  ;;  %v3574_v7 = vpop.f32.mrf.mxu3 }
 0x20e   : > { %v4688_v61 = vld [vmem:[%s7403_s10 + $0x210] sm:$0xf]  ;;  %v4433_v12 = vor.u32 %v6484_v58, %v4432_v57 }
 0x20f   : > { %3827 = vmatpush.bf16.msra.mxu3 %v5297_v30  ;;  %3802 = vmatpush.bf16.msra.mxu1 %v4753_v38  ;;  %v6548_v62 = vld [vmem:[%s7403_s10 + $0x22c] sm:$0xf0] }
 0x210   : > { %v4944_v63 = vld [vmem:[%s7403_s10 + $0x410] sm:$0xf]  ;;  %v4689_v16 = vor.u32 %v6548_v62, %v4688_v61 }
 0x211   : > { %3815 = vmatpush.bf16.msra.mxu2 %v5009_v40  ;;  %v6612_v2 = vld [vmem:[%s7403_s10 + $0x42c] sm:$0xf0]  ;;  %3790 = vmatpush.bf16.msra.mxu0 %v4465_v55 }
 0x212   : > { %v5680_v3 = vld [vmem:[%s7403_s10 + $0x9d0] sm:$0xf]  ;;  %v4945_v21 = vor.u32 %v6612_v2, %v4944_v63 }
 0x213   : > { %v6796_v4 = vld [vmem:[%s7403_s10 + $0x9ec] sm:$0xf0]  ;;  %3828 = vmatpush.bf16.msra.mxu3 %v5265_v45  ;;  %3803 = vmatpush.bf16.msra.mxu1 %v4721_v60 }
 0x214   : > { %v5200_v8 = vld [vmem:[%s7403_s10 + $0x610] sm:$0xf]  ;;  %v5681_v17 = vor.u32 %v6796_v4, %v5680_v3 }
 0x215   : > { %v5936_v9 = vld [vmem:[%s7403_s10 + $0xbd0] sm:$0xf]  ;;  %3816 = vmatpush.bf16.msra.mxu2 %v4977_v1  ;;  %3791 = vmatpush.bf16.msra.mxu0 %v4433_v12 }
 0x216   : > { %v6860_v10 = vld [vmem:[%s7403_s10 + $0xbec] sm:$0xf0] }
 0x217   : > { %v6676_v13 = vld [vmem:[%s7403_s10 + $0x62c] sm:$0xf0]  ;;  %v5937_v22 = vor.u32 %v6860_v10, %v5936_v9  ;;  %3829 = vmatpush.bf16.msra.mxu3 %v5233_v5  ;;  %3804 = vmatpush.bf16.msra.mxu1 %v4689_v16 }
 0x218   : > { %v6192_v14 = vld [vmem:[%s7403_s10 + $0xdd0] sm:$0xf]  ;;  %v5201_v25 = vor.u32 %v6676_v13, %v5200_v8  ;;  %3792 = vmatmul.bf16.vlgmr.msra.gmra.mxu0 %v7574_v28 }
 0x219   : > { %v6924_v15 = vld [vmem:[%s7403_s10 + $0xdec] sm:$0xf0]  ;;  %3836 = vmatpush.bf16.msrb.mxu0 %v5681_v17  ;;  %3817 = vmatpush.bf16.msra.mxu2 %v4945_v21 }
 0x21a   : > { %v6448_v18 = vld [vmem:[%s7403_s10 + $0xfd0] sm:$0xf]  ;;  %v6193_v26 = vor.u32 %v6924_v15, %v6192_v14  ;;  %3805 = vmatmul.bf16.vlgmr.msra.gmra.mxu1 %v7581_v34 }
 0x21b   : > { %v6988_v19 = vld [vmem:[%s7403_s10 + $0xfec] sm:$0xf0]  ;;  %3849 = vmatpush.bf16.msrb.mxu1 %v5937_v22  ;;  %3830 = vmatpush.bf16.msra.mxu3 %v5201_v25 }
 0x21c   : > { %v5648_v23 = vld [vmem:[%s7403_s10 + $0x990] sm:$0xf]  ;;  %v6449_v32 = vor.u32 %v6988_v19, %v6448_v18  ;;  %3818 = vmatmul.bf16.vlgmr.msra.gmra.mxu2 %v7566_v20  ;;  %v3585_v18 = vpop.f32.mrf.mxu0 }
 0x21d   : > { %v6788_v24 = vld [vmem:[%s7403_s10 + $0x9ac] sm:$0xf0]  ;;  %3862 = vmatpush.bf16.msrb.mxu2 %v6193_v26  ;;  %v3599_v7 = vadd.f32 %v3598_v31, %v3585_v18  ;;  %v5426_v18 = vld [vmem:[%s7403_s10 + $0x7f0] sm:$0xf0] }
 0x21e   : > { %v5904_v27 = vld [vmem:[%s7403_s10 + $0xb90] sm:$0xf]  ;;  %v5649_v36 = vor.u32 %v6788_v24, %v5648_v23  ;;  %3831 = vmatmul.bf16.vlgmr.msra.gmra.mxu3 %v7576_v29 }
 0x21f   : > { %v6852_v30 = vld [vmem:[%s7403_s10 + $0xbac] sm:$0xf0]  ;;  %3875 = vmatpush.bf16.msrb.mxu3 %v6449_v32 }
 0x220   : > { %v6160_v33 = vld [vmem:[%s7403_s10 + $0xd90] sm:$0xf]  ;;  %v5905_v39 = vor.u32 %v6852_v30, %v5904_v27  ;;  %3837 = vmatpush.bf16.msrb.mxu0 %v5649_v36 }
 0x221   : > { %v6916_v35 = vld [vmem:[%s7403_s10 + $0xdac] sm:$0xf0] }
 0x222   : > { %v6416_v37 = vld [vmem:[%s7403_s10 + $0xf90] sm:$0xf]  ;;  %v6161_v43 = vor.u32 %v6916_v35, %v6160_v33  ;;  %3850 = vmatpush.bf16.msrb.mxu1 %v5905_v39 }
 0x223   : > { %v6980_v38 = vld [vmem:[%s7403_s10 + $0xfac] sm:$0xf0] }
 0x224   : > { %v5616_v42 = vld [vmem:[%s7403_s10 + $0x950] sm:$0xf]  ;;  %v6417_v47 = vor.u32 %v6980_v38, %v6416_v37  ;;  %3863 = vmatpush.bf16.msrb.mxu2 %v6161_v43 }
 0x225   : > { %v6780_v40 = vld [vmem:[%s7403_s10 + $0x96c] sm:$0xf0] }
 0x226   : > { %v5872_v44 = vld [vmem:[%s7403_s10 + $0xb50] sm:$0xf]  ;;  %v5617_v51 = vor.u32 %v6780_v40, %v5616_v42  ;;  %3876 = vmatpush.bf16.msrb.mxu3 %v6417_v47 }
 0x227   : > { %v6844_v45 = vld [vmem:[%s7403_s10 + $0xb6c] sm:$0xf0] }
 0x228   : > { %v6128_v49 = vld [vmem:[%s7403_s10 + $0xd50] sm:$0xf]  ;;  %v5873_v55 = vor.u32 %v6844_v45, %v5872_v44  ;;  %3838 = vmatpush.bf16.msrb.mxu0 %v5617_v51 }
 0x229   : > { %v6908_v50 = vld [vmem:[%s7403_s10 + $0xd6c] sm:$0xf0] }
 0x22a   : > { %v6384_v52 = vld [vmem:[%s7403_s10 + $0xf50] sm:$0xf]  ;;  %v6129_v58 = vor.u32 %v6908_v50, %v6128_v49  ;;  %3851 = vmatpush.bf16.msrb.mxu1 %v5873_v55  ;;  %v3611_v49 = vpop.f32.mrf.mxu2 }
 0x22b   : > { %v6972_v53 = vld [vmem:[%s7403_s10 + $0xf6c] sm:$0xf0]  ;;  %v3612_v55 = vadd.f32 %v3611_v49, %v3599_v7  ;;  %v5106_v49 = vld [vmem:[%s7403_s10 + $0x570] sm:$0xf0] }
 0x22c   : > { %v5584_v56 = vld [vmem:[%s7403_s10 + $0x910] sm:$0xf]  ;;  %v6385_v61 = vor.u32 %v6972_v53, %v6384_v52  ;;  %3864 = vmatpush.bf16.msrb.mxu2 %v6129_v58 }
 0x22d   : > { %v6772_v57 = vld [vmem:[%s7403_s10 + $0x92c] sm:$0xf0] }
 0x22e   : > { %v5840_v59 = vld [vmem:[%s7403_s10 + $0xb10] sm:$0xf]  ;;  %v5585_v1 = vor.u32 %v6772_v57, %v5584_v56  ;;  %3877 = vmatpush.bf16.msrb.mxu3 %v6385_v61  ;;  %v3624_v56 = vpop.f32.mrf.mxu3  ;;  %v3587_v57 = vpop.f32.mrf.mxu0 }
 0x22f   : > { %v6836_v60 = vld [vmem:[%s7403_s10 + $0xb2c] sm:$0xf0] }
 0x230   : > { %v6096_v62 = vld [vmem:[%s7403_s10 + $0xd10] sm:$0xf]  ;;  %v5841_v4 = vor.u32 %v6836_v60, %v5840_v59  ;;  %3839 = vmatpush.bf16.msrb.mxu0 %v5585_v1  ;;  %v6536_v1 = vld [vmem:[%s7403_s10 + $0x1d4] sm:$0xf] }
 0x231   : > { %v6900_v63 = vld [vmem:[%s7403_s10 + $0xd2c] sm:$0xf0] }
 0x232   : > { %v6352_v2 = vld [vmem:[%s7403_s10 + $0xf10] sm:$0xf]  ;;  %v6097_v9 = vor.u32 %v6900_v63, %v6096_v62  ;;  %3852 = vmatpush.bf16.msrb.mxu1 %v5841_v4 }
 0x233   : > { %v6964_v3 = vld [vmem:[%s7403_s10 + $0xf2c] sm:$0xf0] }
 0x234   : > { %v5552_v5 = vld [vmem:[%s7403_s10 + $0x8d0] sm:$0xf]  ;;  %v6353_v12 = vor.u32 %v6964_v3, %v6352_v2  ;;  %3865 = vmatpush.bf16.msrb.mxu2 %v6097_v9  ;;  %v4658_v2 = vld [vmem:[%s7403_s10 + $0x1f0] sm:$0xf0]  ;;  %v8180_v3 = vadd.f32 %v3624_v56, %v3612_v55 }
 0x235   : > { %v6764_v8 = vld [vmem:[%s7403_s10 + $0x8ec] sm:$0xf0]  ;;  %v4914_v9 = vld [vmem:[%s7403_s10 + $0x3f0] sm:$0xf0] }
 0x236   : > { %v5808_v10 = vld [vmem:[%s7403_s10 + $0xad0] sm:$0xf]  ;;  %v5553_v15 = vor.u32 %v6764_v8, %v5552_v5  ;;  %3878 = vmatpush.bf16.msrb.mxu3 %v6353_v12  ;;  %v6600_v8 = vld [vmem:[%s7403_s10 + $0x3d4] sm:$0xf] }
 0x237   : > { %v6828_v11 = vld [vmem:[%s7403_s10 + $0xaec] sm:$0xf0]  ;;  %v6512_v55 = vld [vmem:[%s7403_s10 + $0x114] sm:$0xf] }
 0x238   : > { %v6064_v13 = vld [vmem:[%s7403_s10 + $0xcd0] sm:$0xf]  ;;  %v5809_v19 = vor.u32 %v6828_v11, %v5808_v10  ;;  %3840 = vmatpush.bf16.msrb.mxu0 %v5553_v15  ;;  %v3600_v10 = vpop.f32.mrf.mxu1  ;;  %v4562_v56 = vld [vmem:[%s7403_s10 + $0x130] sm:$0xf0] }
 0x239   : > { %v6892_v14 = vld [vmem:[%s7403_s10 + $0xcec] sm:$0xf0]  ;;  %v6568_v10 = vld [vmem:[%s7403_s10 + $0x2d4] sm:$0xf] }
 0x23a   : > { %v6320_v16 = vld [vmem:[%s7403_s10 + $0xed0] sm:$0xf]  ;;  %v6065_v23 = vor.u32 %v6892_v14, %v6064_v13  ;;  %3853 = vmatpush.bf16.msrb.mxu1 %v5809_v19  ;;  %v6664_v13 = vld [vmem:[%s7403_s10 + $0x5d4] sm:$0xf] }
 0x23b   : > { %v6956_v17 = vld [vmem:[%s7403_s10 + $0xeec] sm:$0xf0]  ;;  %v5170_v14 = vld [vmem:[%s7403_s10 + $0x5f0] sm:$0xf0] }
 0x23c   : > { %v5520_v21 = vld [vmem:[%s7403_s10 + $0x890] sm:$0xf]  ;;  %v6321_v26 = vor.u32 %v6956_v17, %v6320_v16  ;;  %3866 = vmatpush.bf16.msrb.mxu2 %v6065_v23  ;;  %v4661_v16 = vor.u32 %v6536_v1, %v4658_v2  ;;  %v6728_v17 = vld [vmem:[%s7403_s10 + $0x7d4] sm:$0xf] }
 0x23d   : > { %v6756_v22 = vld [vmem:[%s7403_s10 + $0x8ac] sm:$0xf0]  ;;  %v4626_v23 = vld [vmem:[%s7403_s10 + $0x1b0] sm:$0xf0]  ;;  %v5429_v31 = vor.u32 %v6728_v17, %v5426_v18  ;;  %v3637_v18 = vpop.f32.mrf.mxu0 }
 0x23e   : > { %v5776_v24 = vld [vmem:[%s7403_s10 + $0xa90] sm:$0xf]  ;;  %v5521_v32 = vor.u32 %v6756_v22, %v5520_v21  ;;  %3879 = vmatpush.bf16.msrb.mxu3 %v6321_v26  ;;  %v4917_v21 = vor.u32 %v6600_v8, %v4914_v9  ;;  %v6528_v22 = vld [vmem:[%s7403_s10 + $0x194] sm:$0xf] }
 0x23f   : > { %v6820_v25 = vld [vmem:[%s7403_s10 + $0xaac] sm:$0xf0]  ;;  %v6592_v26 = vld [vmem:[%s7403_s10 + $0x394] sm:$0xf]  ;;  %v4629_v7 = vor.u32 %v6528_v22, %v4626_v23 }
 0x240   : > { %v6032_v27 = vld [vmem:[%s7403_s10 + $0xc90] sm:$0xf]  ;;  %v5777_v36 = vor.u32 %v6820_v25, %v5776_v24  ;;  %3841 = vmatpush.bf16.msrb.mxu0 %v5521_v32  ;;  %v5173_v25 = vor.u32 %v6664_v13, %v5170_v14  ;;  %v6656_v32 = vld [vmem:[%s7403_s10 + $0x594] sm:$0xf] }
 0x241   : > { %v6884_v30 = vld [vmem:[%s7403_s10 + $0xcac] sm:$0xf0]  ;;  %v6704_v1 = vld [vmem:[%s7403_s10 + $0x714] sm:$0xf] }
 0x242   : > { %v6288_v33 = vld [vmem:[%s7403_s10 + $0xe90] sm:$0xf]  ;;  %v6033_v39 = vor.u32 %v6884_v30, %v6032_v27  ;;  %3854 = vmatpush.bf16.msrb.mxu1 %v5777_v36  ;;  %v4882_v27 = vld [vmem:[%s7403_s10 + $0x3b0] sm:$0xf0]  ;;  %v3613_v30 = vpop.f32.mrf.mxu2 }
 0x243   : > { %v6948_v35 = vld [vmem:[%s7403_s10 + $0xeac] sm:$0xf0]  ;;  %v6720_v36 = vld [vmem:[%s7403_s10 + $0x794] sm:$0xf]  ;;  %v3650_v30 = vpop.f32.mrf.mxu1 }
 0x244   : > { %v5488_v37 = vld [vmem:[%s7403_s10 + $0x850] sm:$0xf]  ;;  %v6289_v43 = vor.u32 %v6948_v35, %v6288_v33  ;;  %3867 = vmatpush.bf16.msrb.mxu2 %v6033_v39  ;;  %v5138_v33 = vld [vmem:[%s7403_s10 + $0x5b0] sm:$0xf0]  ;;  %v3626_v35 = vpop.f32.mrf.mxu3 }
 0x245   : > { %v6748_v38 = vld [vmem:[%s7403_s10 + $0x86c] sm:$0xf0]  ;;  %v6520_v39 = vld [vmem:[%s7403_s10 + $0x154] sm:$0xf] }
 0x246   : > { %v5744_v42 = vld [vmem:[%s7403_s10 + $0xa50] sm:$0xf]  ;;  %v5489_v50 = vor.u32 %v6748_v38, %v5488_v37  ;;  %3880 = vmatpush.bf16.msrb.mxu3 %v6289_v43  ;;  %v5394_v37 = vld [vmem:[%s7403_s10 + $0x7b0] sm:$0xf0]  ;;  %v4885_v38 = vor.u32 %v6592_v26, %v4882_v27 }
 0x247   : > { %v6812_v40 = vld [vmem:[%s7403_s10 + $0xa6c] sm:$0xf0]  ;;  %v6584_v43 = vld [vmem:[%s7403_s10 + $0x354] sm:$0xf] }
 0x248   : > { %v6000_v44 = vld [vmem:[%s7403_s10 + $0xc50] sm:$0xf]  ;;  %v5745_v58 = vor.u32 %v6812_v40, %v5744_v42  ;;  %3842 = vmatpush.bf16.msrb.mxu0 %v5489_v50  ;;  %v4594_v42 = vld [vmem:[%s7403_s10 + $0x170] sm:$0xf0]  ;;  %v5141_v40 = vor.u32 %v6656_v32, %v5138_v33 }
 0x249   : > { %v6876_v45 = vld [vmem:[%s7403_s10 + $0xc6c] sm:$0xf0]  ;;  %v4597_v50 = vor.u32 %v6520_v39, %v4594_v42  ;;  %v5330_v2 = vld [vmem:[%s7403_s10 + $0x730] sm:$0xf0] }
 0x24a   : > { %v6256_v47 = vld [vmem:[%s7403_s10 + $0xe50] sm:$0xf]  ;;  %v6001_v62 = vor.u32 %v6876_v45, %v6000_v44  ;;  %3855 = vmatpush.bf16.msrb.mxu1 %v5745_v58  ;;  %v4850_v44 = vld [vmem:[%s7403_s10 + $0x370] sm:$0xf0]  ;;  %v5397_v45 = vor.u32 %v6720_v36, %v5394_v37 }
 0x24b   : > { %v6940_v51 = vld [vmem:[%s7403_s10 + $0xe6c] sm:$0xf0]  ;;  %v6576_v58 = vld [vmem:[%s7403_s10 + $0x314] sm:$0xf] }
 0x24c   : > { %v5456_v52 = vld [vmem:[%s7403_s10 + $0x810] sm:$0xf]  ;;  %v6257_v4 = vor.u32 %v6940_v51, %v6256_v47  ;;  %3868 = vmatpush.bf16.msrb.mxu2 %v6001_v62  ;;  %v6648_v47 = vld [vmem:[%s7403_s10 + $0x554] sm:$0xf] }
 0x24d   : > { %v6740_v53 = vld [vmem:[%s7403_s10 + $0x82c] sm:$0xf0]  ;;  %v6712_v51 = vld [vmem:[%s7403_s10 + $0x754] sm:$0xf]  ;;  %v5109_v57 = vor.u32 %v6648_v47, %v5106_v49 }
 0x24e   : > { %v5712_v59 = vld [vmem:[%s7403_s10 + $0xa10] sm:$0xf]  ;;  %v5457_v11 = vor.u32 %v6740_v53, %v5456_v52  ;;  %3881 = vmatpush.bf16.msrb.mxu3 %v6257_v4  ;;  %v5362_v52 = vld [vmem:[%s7403_s10 + $0x770] sm:$0xf0]  ;;  %v4853_v53 = vor.u32 %v6584_v43, %v4850_v44  ;;  %v3663_v44 = vpop.f32.mrf.mxu2 }
 0x24f   : > { %v6804_v60 = vld [vmem:[%s7403_s10 + $0xa2c] sm:$0xf0]  ;;  %v5074_v62 = vld [vmem:[%s7403_s10 + $0x530] sm:$0xf0] }
 0x250   : > { %v5968_v61 = vld [vmem:[%s7403_s10 + $0xc10] sm:$0xf]  ;;  %v5713_v15 = vor.u32 %v6804_v60, %v5712_v59  ;;  %3843 = vmatpush.bf16.msrb.mxu0 %v5457_v11  ;;  %v4818_v59 = vld [vmem:[%s7403_s10 + $0x330] sm:$0xf0]  ;;  %v5365_v60 = vor.u32 %v6712_v51, %v5362_v52  ;;  %v3676_v51 = vpop.f32.mrf.mxu3 }
 0x251   : > { %v6868_v63 = vld [vmem:[%s7403_s10 + $0xc2c] sm:$0xf0]  ;;  %v4821_v4 = vor.u32 %v6576_v58, %v4818_v59  ;;  %v4530_v8 = vld [vmem:[%s7403_s10 + $0xf0] sm:$0xf0] }
 0x252   : > { %v6224_v5 = vld [vmem:[%s7403_s10 + $0xe10] sm:$0xf]  ;;  %v5969_v19 = vor.u32 %v6868_v63, %v5968_v61  ;;  %3856 = vmatpush.bf16.msrb.mxu1 %v5713_v15  ;;  %v6640_v61 = vld [vmem:[%s7403_s10 + $0x514] sm:$0xf]  ;;  %v4565_v63 = vor.u32 %v6512_v55, %v4562_v56 }
 0x253   : > { %v6932_v12 = vld [vmem:[%s7403_s10 + $0xe2c] sm:$0xf0]  ;;  %3844 = vmatmul.bf16.vlgmr.msrb.gmra.mxu0 %v7631_v41  ;;  %v5077_v9 = vor.u32 %v6640_v61, %v5074_v62  ;;  %v4786_v11 = vld [vmem:[%s7403_s10 + $0x2f0] sm:$0xf0] }
 0x254   : > { %v6225_v24 = vor.u32 %v6932_v12, %v6224_v5  ;;  %3888 = vmatpush.bf16.msra.mxu0 %v4661_v16  ;;  %3869 = vmatpush.bf16.msrb.mxu2 %v5969_v19  ;;  %v6504_v5 = vld [vmem:[%s7403_s10 + $0xd4] sm:$0xf]  ;;  %v5333_v12 = vor.u32 %v6704_v1, %v5330_v2  ;;  %v4789_v19 = vor.u32 %v6568_v10, %v4786_v11  ;;  %v3652_v11 = vpop.f32.mrf.mxu1 }
 0x255   : > { %3857 = vmatmul.bf16.vlgmr.msrb.gmra.mxu1 %v7644_v54  ;;  %v6632_v13 = vld [vmem:[%s7403_s10 + $0x4d4] sm:$0xf]  ;;  %v4533_v15 = vor.u32 %v6504_v5, %v4530_v8 }
 0x256   : > { %3901 = vmatpush.bf16.msra.mxu1 %v4917_v21  ;;  %3882 = vmatpush.bf16.msrb.mxu3 %v6225_v24  ;;  %v5042_v14 = vld [vmem:[%s7403_s10 + $0x4f0] sm:$0xf0]  ;;  %v3638_v21 = vadd.f32 %v3637_v18, %v8180_v3 }
 0x257   : > { %3870 = vmatmul.bf16.vlgmr.msrb.gmra.mxu2 %v7636_v46  ;;  %v6696_v16 = vld [vmem:[%s7403_s10 + $0x6d4] sm:$0xf]  ;;  %v5045_v24 = vor.u32 %v6632_v13, %v5042_v14 }
 0x258   : > { %3914 = vmatpush.bf16.msra.mxu2 %v5173_v25  ;;  %3889 = vmatpush.bf16.msra.mxu0 %v4629_v7  ;;  %v5298_v17 = vld [vmem:[%s7403_s10 + $0x6f0] sm:$0xf0]  ;;  %v3651_v33 = vadd.f32 %v3650_v30, %v3638_v21 }
 0x259   : > { %3883 = vmatmul.bf16.vlgmr.msrb.gmra.mxu3 %v7638_v48  ;;  %v6496_v22 = vld [vmem:[%s7403_s10 + $0x94] sm:$0xf]  ;;  %v5301_v27 = vor.u32 %v6696_v16, %v5298_v17 }
 0x25a   : > { %3927 = vmatpush.bf16.msra.mxu3 %v5429_v31  ;;  %3902 = vmatpush.bf16.msra.mxu1 %v4885_v38  ;;  %v4498_v23 = vld [vmem:[%s7403_s10 + $0xb0] sm:$0xf0] }
 0x25b   : > { %v6560_v25 = vld [vmem:[%s7403_s10 + $0x294] sm:$0xf]  ;;  %v4501_v3 = vor.u32 %v6496_v22, %v4498_v23 }
 0x25c   : > { %3915 = vmatpush.bf16.msra.mxu2 %v5141_v40  ;;  %3890 = vmatpush.bf16.msra.mxu0 %v4597_v50  ;;  %v4754_v26 = vld [vmem:[%s7403_s10 + $0x2b0] sm:$0xf0]  ;;  %v3664_v50 = vadd.f32 %v3663_v44, %v3651_v33 }
 0x25d   : > { %v6624_v31 = vld [vmem:[%s7403_s10 + $0x494] sm:$0xf]  ;;  %v4757_v36 = vor.u32 %v6560_v25, %v4754_v26 }
 0x25e   : > { %3928 = vmatpush.bf16.msra.mxu3 %v5397_v45  ;;  %3903 = vmatpush.bf16.msra.mxu1 %v4853_v53  ;;  %v5010_v32 = vld [vmem:[%s7403_s10 + $0x4b0] sm:$0xf0]  ;;  %v8248_v62 = vadd.f32 %v3676_v51, %v3664_v50 }
 0x25f   : > { %v6688_v35 = vld [vmem:[%s7403_s10 + $0x694] sm:$0xf]  ;;  %v5013_v39 = vor.u32 %v6624_v31, %v5010_v32  ;;  %v3665_v31 = vpop.f32.mrf.mxu2 }
 0x260   : > { %3916 = vmatpush.bf16.msra.mxu2 %v5109_v57  ;;  %3891 = vmatpush.bf16.msra.mxu0 %v4565_v63  ;;  %v5266_v7 = vld [vmem:[%s7403_s10 + $0x6b0] sm:$0xf0]  ;;  %v3639_v57 = vpop.f32.mrf.mxu0 }
 0x261   : > { %v6488_v37 = vld [vmem:[%s7403_s10 + $0x54] sm:$0xf]  ;;  %v5269_v43 = vor.u32 %v6688_v35, %v5266_v7  ;;  %v3678_v35 = vpop.f32.mrf.mxu3 }
 0x262   : > { %3929 = vmatpush.bf16.msra.mxu3 %v5365_v60  ;;  %3904 = vmatpush.bf16.msra.mxu1 %v4821_v4  ;;  %v4466_v38 = vld [vmem:[%s7403_s10 + $0x70] sm:$0xf0] }
 0x263   : > { %v6552_v42 = vld [vmem:[%s7403_s10 + $0x254] sm:$0xf]  ;;  %v4469_v52 = vor.u32 %v6488_v37, %v4466_v38 }
 0x264   : > { %3917 = vmatpush.bf16.msra.mxu2 %v5077_v9  ;;  %3892 = vmatpush.bf16.msra.mxu0 %v4533_v15  ;;  %v4722_v40 = vld [vmem:[%s7403_s10 + $0x270] sm:$0xf0] }
 0x265   : > { %v6616_v45 = vld [vmem:[%s7403_s10 + $0x454] sm:$0xf]  ;;  %v4725_v58 = vor.u32 %v6552_v42, %v4722_v40 }
 0x266   : > { %3930 = vmatpush.bf16.msra.mxu3 %v5333_v12  ;;  %3905 = vmatpush.bf16.msra.mxu1 %v4789_v19  ;;  %v4978_v47 = vld [vmem:[%s7403_s10 + $0x470] sm:$0xf0] }
 0x267   : > { %v6680_v49 = vld [vmem:[%s7403_s10 + $0x654] sm:$0xf]  ;;  %v4981_v63 = vor.u32 %v6616_v45, %v4978_v47 }
 0x268   : > { %3918 = vmatpush.bf16.msra.mxu2 %v5045_v24  ;;  %3893 = vmatpush.bf16.msra.mxu0 %v4501_v3  ;;  %v5234_v53 = vld [vmem:[%s7403_s10 + $0x670] sm:$0xf0] }
 0x269   : > { %v6480_v55 = vld [vmem:[%s7403_s10 + $0x14] sm:$0xf]  ;;  %v5237_v5 = vor.u32 %v6680_v49, %v5234_v53 }
 0x26a   : > { %3931 = vmatpush.bf16.msra.mxu3 %v5301_v27  ;;  %v4434_v56 = vld [vmem:[%s7403_s10 + $0x30] sm:$0xf0]  ;;  %3906 = vmatpush.bf16.msra.mxu1 %v4757_v36 }
 0x26b   : > { %v6544_v59 = vld [vmem:[%s7403_s10 + $0x214] sm:$0xf]  ;;  %v4437_v12 = vor.u32 %v6480_v55, %v4434_v56 }
 0x26c   : > { %v4690_v60 = vld [vmem:[%s7403_s10 + $0x230] sm:$0xf0]  ;;  %3919 = vmatpush.bf16.msra.mxu2 %v5013_v39  ;;  %3894 = vmatpush.bf16.msra.mxu0 %v4469_v52 }
 0x26d   : > { %v6608_v61 = vld [vmem:[%s7403_s10 + $0x414] sm:$0xf]  ;;  %v4693_v16 = vor.u32 %v6544_v59, %v4690_v60 }
 0x26e   : > { %v4946_v1 = vld [vmem:[%s7403_s10 + $0x430] sm:$0xf0]  ;;  %3932 = vmatpush.bf16.msra.mxu3 %v5269_v43  ;;  %3907 = vmatpush.bf16.msra.mxu1 %v4725_v58 }
 0x26f   : > { %v6792_v2 = vld [vmem:[%s7403_s10 + $0x9d4] sm:$0xf]  ;;  %v4949_v21 = vor.u32 %v6608_v61, %v4946_v1 }
 0x270   : > { %v5682_v4 = vld [vmem:[%s7403_s10 + $0x9f0] sm:$0xf0]  ;;  %3920 = vmatpush.bf16.msra.mxu2 %v4981_v63  ;;  %3895 = vmatpush.bf16.msra.mxu0 %v4437_v12 }
 0x271   : > { %v6672_v8 = vld [vmem:[%s7403_s10 + $0x614] sm:$0xf]  ;;  %v5685_v17 = vor.u32 %v6792_v2, %v5682_v4 }
 0x272   : > { %v6856_v9 = vld [vmem:[%s7403_s10 + $0xbd4] sm:$0xf]  ;;  %3933 = vmatpush.bf16.msra.mxu3 %v5237_v5  ;;  %3908 = vmatpush.bf16.msra.mxu1 %v4693_v16 }
 0x273   : > { %v5938_v10 = vld [vmem:[%s7403_s10 + $0xbf0] sm:$0xf0]  ;;  %3896 = vmatmul.bf16.vlgmr.msra.gmra.mxu0 %v7574_v28 }
 0x274   : > { %v5202_v13 = vld [vmem:[%s7403_s10 + $0x630] sm:$0xf0]  ;;  %v5941_v22 = vor.u32 %v6856_v9, %v5938_v10  ;;  %3940 = vmatpush.bf16.msrb.mxu0 %v5685_v17  ;;  %3921 = vmatpush.bf16.msra.mxu2 %v4949_v21 }
 0x275   : > { %v6920_v14 = vld [vmem:[%s7403_s10 + $0xdd4] sm:$0xf]  ;;  %v5205_v25 = vor.u32 %v6672_v8, %v5202_v13  ;;  %3909 = vmatmul.bf16.vlgmr.msra.gmra.mxu1 %v7581_v34 }
 0x276   : > { %v6194_v15 = vld [vmem:[%s7403_s10 + $0xdf0] sm:$0xf0]  ;;  %3953 = vmatpush.bf16.msrb.mxu1 %v5941_v22 }
 0x277   : > { %v6984_v18 = vld [vmem:[%s7403_s10 + $0xfd4] sm:$0xf]  ;;  %v6197_v26 = vor.u32 %v6920_v14, %v6194_v15  ;;  %3934 = vmatpush.bf16.msra.mxu3 %v5205_v25  ;;  %3922 = vmatmul.bf16.vlgmr.msra.gmra.mxu2 %v7566_v20 }
 0x278   : > { %v6450_v19 = vld [vmem:[%s7403_s10 + $0xff0] sm:$0xf0] }
 0x279   : > { %v6784_v23 = vld [vmem:[%s7403_s10 + $0x994] sm:$0xf]  ;;  %v6453_v32 = vor.u32 %v6984_v18, %v6450_v19  ;;  %3966 = vmatpush.bf16.msrb.mxu2 %v6197_v26  ;;  %v3689_v19 = vpop.f32.mrf.mxu0 }
 0x27a   : > { %v5650_v24 = vld [vmem:[%s7403_s10 + $0x9b0] sm:$0xf0]  ;;  %3935 = vmatmul.bf16.vlgmr.msra.gmra.mxu3 %v7576_v29 }
 0x27b   : > { %v6848_v27 = vld [vmem:[%s7403_s10 + $0xb94] sm:$0xf]  ;;  %v5653_v7 = vor.u32 %v6784_v23, %v5650_v24  ;;  %3979 = vmatpush.bf16.msrb.mxu3 %v6453_v32  ;;  %v3702_v32 = vpop.f32.mrf.mxu1 }
 0x27c   : > { %v5906_v30 = vld [vmem:[%s7403_s10 + $0xbb0] sm:$0xf0] }
 0x27d   : > { %v6912_v33 = vld [vmem:[%s7403_s10 + $0xd94] sm:$0xf]  ;;  %v5909_v38 = vor.u32 %v6848_v27, %v5906_v30  ;;  %3941 = vmatpush.bf16.msrb.mxu0 %v5653_v7  ;;  %v3703_v7 = vadd.f32 %v3702_v32, %v3689_v19  ;;  %v5432_v19 = vld [vmem:[%s7403_s10 + $0x7d8] sm:$0xf] }
 0x27e   : > { %v6162_v3 = vld [vmem:[%s7403_s10 + $0xdb0] sm:$0xf0] }
 0x27f   : > { %v6976_v36 = vld [vmem:[%s7403_s10 + $0xf94] sm:$0xf]  ;;  %v6165_v40 = vor.u32 %v6912_v33, %v6162_v3  ;;  %3954 = vmatpush.bf16.msrb.mxu1 %v5909_v38 }
 0x280   : > { %v6418_v37 = vld [vmem:[%s7403_s10 + $0xfb0] sm:$0xf0] }
 0x281   : > { %v6776_v39 = vld [vmem:[%s7403_s10 + $0x954] sm:$0xf]  ;;  %v6421_v45 = vor.u32 %v6976_v36, %v6418_v37  ;;  %3967 = vmatpush.bf16.msrb.mxu2 %v6165_v40 }
 0x282   : > { %v5618_v42 = vld [vmem:[%s7403_s10 + $0x970] sm:$0xf0] }
 0x283   : > { %v6840_v43 = vld [vmem:[%s7403_s10 + $0xb54] sm:$0xf]  ;;  %v5621_v50 = vor.u32 %v6776_v39, %v5618_v42  ;;  %3980 = vmatpush.bf16.msrb.mxu3 %v6421_v45 }
 0x284   : > { %v5874_v44 = vld [vmem:[%s7403_s10 + $0xb70] sm:$0xf0] }
 0x285   : > { %v6904_v47 = vld [vmem:[%s7403_s10 + $0xd54] sm:$0xf]  ;;  %v5877_v53 = vor.u32 %v6840_v43, %v5874_v44  ;;  %3942 = vmatpush.bf16.msrb.mxu0 %v5621_v50 }
 0x286   : > { %v6130_v49 = vld [vmem:[%s7403_s10 + $0xd70] sm:$0xf0] }
 0x287   : > { %v6968_v51 = vld [vmem:[%s7403_s10 + $0xf54] sm:$0xf]  ;;  %v6133_v57 = vor.u32 %v6904_v47, %v6130_v49  ;;  %3955 = vmatpush.bf16.msrb.mxu1 %v5877_v53  ;;  %v3715_v49 = vpop.f32.mrf.mxu2 }
 0x288   : > { %v6386_v52 = vld [vmem:[%s7403_s10 + $0xf70] sm:$0xf0] }
 0x289   : > { %v6768_v55 = vld [vmem:[%s7403_s10 + $0x914] sm:$0xf]  ;;  %v6389_v60 = vor.u32 %v6968_v51, %v6386_v52  ;;  %3968 = vmatpush.bf16.msrb.mxu2 %v6133_v57  ;;  %v3691_v57 = vpop.f32.mrf.mxu0 }
 0x28a   : > { %v5586_v56 = vld [vmem:[%s7403_s10 + $0x930] sm:$0xf0]  ;;  %v6517_v57 = vld [vmem:[%s7403_s10 + $0x134] sm:$0xf0] }
 0x28b   : > { %v6832_v58 = vld [vmem:[%s7403_s10 + $0xb14] sm:$0xf]  ;;  %v5589_v1 = vor.u32 %v6768_v55, %v5586_v56  ;;  %3981 = vmatpush.bf16.msrb.mxu3 %v6389_v60  ;;  %v3716_v55 = vadd.f32 %v3715_v49, %v3703_v7  ;;  %v3728_v56 = vpop.f32.mrf.mxu3  ;;  %v5112_v49 = vld [vmem:[%s7403_s10 + $0x558] sm:$0xf] }
 0x28c   : > { %v5842_v59 = vld [vmem:[%s7403_s10 + $0xb30] sm:$0xf0] }
 0x28d   : > { %v6896_v61 = vld [vmem:[%s7403_s10 + $0xd14] sm:$0xf]  ;;  %v5845_v5 = vor.u32 %v6832_v58, %v5842_v59  ;;  %3943 = vmatpush.bf16.msrb.mxu0 %v5589_v1 }
 0x28e   : > { %v6098_v63 = vld [vmem:[%s7403_s10 + $0xd30] sm:$0xf0] }
 0x28f   : > { %v6960_v2 = vld [vmem:[%s7403_s10 + $0xf14] sm:$0xf]  ;;  %v6101_v10 = vor.u32 %v6896_v61, %v6098_v63  ;;  %3956 = vmatpush.bf16.msrb.mxu1 %v5845_v5  ;;  %v8321_v5 = vadd.f32 %v3728_v56, %v3716_v55  ;;  %v3717_v32 = vpop.f32.mrf.mxu2  ;;  %v4568_v56 = vld [vmem:[%s7403_s10 + $0x118] sm:$0xf] }
 0x290   : > { %v6354_v4 = vld [vmem:[%s7403_s10 + $0xf30] sm:$0xf0] }
 0x291   : > { %v6760_v8 = vld [vmem:[%s7403_s10 + $0x8d4] sm:$0xf]  ;;  %v6357_v13 = vor.u32 %v6960_v2, %v6354_v4  ;;  %3969 = vmatpush.bf16.msrb.mxu2 %v6101_v10  ;;  %v4664_v2 = vld [vmem:[%s7403_s10 + $0x1d8] sm:$0xf] }
 0x292   : > { %v5554_v9 = vld [vmem:[%s7403_s10 + $0x8f0] sm:$0xf0]  ;;  %v6541_v4 = vld [vmem:[%s7403_s10 + $0x1f4] sm:$0xf0] }
 0x293   : > { %v6824_v11 = vld [vmem:[%s7403_s10 + $0xad4] sm:$0xf]  ;;  %v5557_v16 = vor.u32 %v6760_v8, %v5554_v9  ;;  %3982 = vmatpush.bf16.msrb.mxu3 %v6357_v13  ;;  %v4920_v10 = vld [vmem:[%s7403_s10 + $0x3d8] sm:$0xf]  ;;  %v3730_v7 = vpop.f32.mrf.mxu3 }
 0x294   : > { %v5810_v12 = vld [vmem:[%s7403_s10 + $0xaf0] sm:$0xf0] }
 0x295   : > { %v6888_v14 = vld [vmem:[%s7403_s10 + $0xcd4] sm:$0xf]  ;;  %v5813_v21 = vor.u32 %v6824_v11, %v5810_v12  ;;  %3944 = vmatpush.bf16.msrb.mxu0 %v5557_v16  ;;  %v6605_v11 = vld [vmem:[%s7403_s10 + $0x3f4] sm:$0xf0]  ;;  %v3704_v12 = vpop.f32.mrf.mxu1 }
 0x296   : > { %v6066_v15 = vld [vmem:[%s7403_s10 + $0xcf0] sm:$0xf0]  ;;  %v6669_v16 = vld [vmem:[%s7403_s10 + $0x5f4] sm:$0xf0] }
 0x297   : > { %v6952_v17 = vld [vmem:[%s7403_s10 + $0xed4] sm:$0xf]  ;;  %v6069_v24 = vor.u32 %v6888_v14, %v6066_v15  ;;  %3957 = vmatpush.bf16.msrb.mxu1 %v5813_v21  ;;  %v5176_v15 = vld [vmem:[%s7403_s10 + $0x5d8] sm:$0xf] }
 0x298   : > { %v6322_v18 = vld [vmem:[%s7403_s10 + $0xef0] sm:$0xf0]  ;;  %v6733_v21 = vld [vmem:[%s7403_s10 + $0x7f4] sm:$0xf0] }
 0x299   : > { %v6752_v22 = vld [vmem:[%s7403_s10 + $0x894] sm:$0xf]  ;;  %v6325_v27 = vor.u32 %v6952_v17, %v6322_v18  ;;  %3970 = vmatpush.bf16.msrb.mxu2 %v6069_v24  ;;  %v4665_v18 = vor.u32 %v6541_v4, %v4664_v2  ;;  %v4632_v24 = vld [vmem:[%s7403_s10 + $0x198] sm:$0xf]  ;;  %v4569_v2 = vor.u32 %v6517_v57, %v4568_v56 }
 0x29a   : > { %v5522_v23 = vld [vmem:[%s7403_s10 + $0x8b0] sm:$0xf0]  ;;  %v5336_v4 = vld [vmem:[%s7403_s10 + $0x718] sm:$0xf] }
 0x29b   : > { %v6816_v25 = vld [vmem:[%s7403_s10 + $0xa94] sm:$0xf]  ;;  %v5525_v33 = vor.u32 %v6752_v22, %v5522_v23  ;;  %3983 = vmatpush.bf16.msrb.mxu3 %v6325_v27  ;;  %v4921_v23 = vor.u32 %v6605_v11, %v4920_v10  ;;  %v5177_v27 = vor.u32 %v6669_v16, %v5176_v15  ;;  %v4536_v10 = vld [vmem:[%s7403_s10 + $0xd8] sm:$0xf] }
 0x29c   : > { %v5778_v26 = vld [vmem:[%s7403_s10 + $0xab0] sm:$0xf0]  ;;  %v6509_v11 = vld [vmem:[%s7403_s10 + $0xf4] sm:$0xf0] }
 0x29d   : > { %v6880_v30 = vld [vmem:[%s7403_s10 + $0xc94] sm:$0xf]  ;;  %v5781_v36 = vor.u32 %v6816_v25, %v5778_v26  ;;  %3945 = vmatpush.bf16.msrb.mxu0 %v5525_v33  ;;  %v6533_v25 = vld [vmem:[%s7403_s10 + $0x1b4] sm:$0xf0]  ;;  %v5433_v33 = vor.u32 %v6733_v21, %v5432_v19 }
 0x29e   : > { %v6034_v31 = vld [vmem:[%s7403_s10 + $0xcb0] sm:$0xf0]  ;;  %v5048_v16 = vld [vmem:[%s7403_s10 + $0x4d8] sm:$0xf] }
 0x29f   : > { %v6944_v3 = vld [vmem:[%s7403_s10 + $0xe94] sm:$0xf]  ;;  %v6037_v39 = vor.u32 %v6880_v30, %v6034_v31  ;;  %3958 = vmatpush.bf16.msrb.mxu1 %v5781_v36  ;;  %v4888_v30 = vld [vmem:[%s7403_s10 + $0x398] sm:$0xf]  ;;  %v4633_v36 = vor.u32 %v6533_v25, %v4632_v24 }
 0x2a0   : > { %v6290_v35 = vld [vmem:[%s7403_s10 + $0xeb0] sm:$0xf0]  ;;  %v6597_v31 = vld [vmem:[%s7403_s10 + $0x3b4] sm:$0xf0] }
 0x2a1   : > { %v6744_v37 = vld [vmem:[%s7403_s10 + $0x854] sm:$0xf]  ;;  %v6293_v43 = vor.u32 %v6944_v3, %v6290_v35  ;;  %3971 = vmatpush.bf16.msrb.mxu2 %v6037_v39  ;;  %v5144_v3 = vld [vmem:[%s7403_s10 + $0x598] sm:$0xf]  ;;  %v4889_v39 = vor.u32 %v6597_v31, %v4888_v30 }
 0x2a2   : > { %v5490_v38 = vld [vmem:[%s7403_s10 + $0x870] sm:$0xf0]  ;;  %v6661_v35 = vld [vmem:[%s7403_s10 + $0x5b4] sm:$0xf0] }
 0x2a3   : > { %v6808_v42 = vld [vmem:[%s7403_s10 + $0xa54] sm:$0xf]  ;;  %v5493_v50 = vor.u32 %v6744_v37, %v5490_v38  ;;  %3984 = vmatpush.bf16.msrb.mxu3 %v6293_v43  ;;  %v5400_v37 = vld [vmem:[%s7403_s10 + $0x798] sm:$0xf]  ;;  %v5145_v43 = vor.u32 %v6661_v35, %v5144_v3 }
 0x2a4   : > { %v5746_v40 = vld [vmem:[%s7403_s10 + $0xa70] sm:$0xf0]  ;;  %v6725_v38 = vld [vmem:[%s7403_s10 + $0x7b4] sm:$0xf0] }
 0x2a5   : > { %v6872_v44 = vld [vmem:[%s7403_s10 + $0xc54] sm:$0xf]  ;;  %v5749_v58 = vor.u32 %v6808_v42, %v5746_v40  ;;  %3946 = vmatpush.bf16.msrb.mxu0 %v5493_v50  ;;  %v4600_v42 = vld [vmem:[%s7403_s10 + $0x158] sm:$0xf] }
 0x2a6   : > { %v6002_v45 = vld [vmem:[%s7403_s10 + $0xc70] sm:$0xf0]  ;;  %v6525_v40 = vld [vmem:[%s7403_s10 + $0x174] sm:$0xf0] }
 0x2a7   : > { %v6936_v47 = vld [vmem:[%s7403_s10 + $0xe54] sm:$0xf]  ;;  %v6005_v63 = vor.u32 %v6872_v44, %v6002_v45  ;;  %3959 = vmatpush.bf16.msrb.mxu1 %v5749_v58  ;;  %v4856_v44 = vld [vmem:[%s7403_s10 + $0x358] sm:$0xf] }
 0x2a8   : > { %v6258_v51 = vld [vmem:[%s7403_s10 + $0xe70] sm:$0xf0]  ;;  %v6589_v45 = vld [vmem:[%s7403_s10 + $0x374] sm:$0xf0] }
 0x2a9   : > { %v6736_v52 = vld [vmem:[%s7403_s10 + $0x814] sm:$0xf]  ;;  %v6261_v8 = vor.u32 %v6936_v47, %v6258_v51  ;;  %3972 = vmatpush.bf16.msrb.mxu2 %v6005_v63  ;;  %v5401_v47 = vor.u32 %v6725_v38, %v5400_v37  ;;  %v6653_v50 = vld [vmem:[%s7403_s10 + $0x574] sm:$0xf0]  ;;  %v4601_v51 = vor.u32 %v6525_v40, %v4600_v42  ;;  %v4857_v55 = vor.u32 %v6589_v45, %v4856_v44 }
 0x2aa   : > { %v5458_v53 = vld [vmem:[%s7403_s10 + $0x830] sm:$0xf0]  ;;  %v5113_v58 = vor.u32 %v6653_v50, %v5112_v49  ;;  %v5080_v63 = vld [vmem:[%s7403_s10 + $0x518] sm:$0xf] }
 0x2ab   : > { %v6800_v59 = vld [vmem:[%s7403_s10 + $0xa14] sm:$0xf]  ;;  %v5461_v13 = vor.u32 %v6736_v52, %v5458_v53  ;;  %3985 = vmatpush.bf16.msrb.mxu3 %v6261_v8  ;;  %v5368_v52 = vld [vmem:[%s7403_s10 + $0x758] sm:$0xf] }
 0x2ac   : > { %v5714_v60 = vld [vmem:[%s7403_s10 + $0xa30] sm:$0xf0]  ;;  %v6717_v53 = vld [vmem:[%s7403_s10 + $0x774] sm:$0xf0] }
 0x2ad   : > { %v6864_v61 = vld [vmem:[%s7403_s10 + $0xc14] sm:$0xf]  ;;  %v5717_v17 = vor.u32 %v6800_v59, %v5714_v60  ;;  %3947 = vmatpush.bf16.msrb.mxu0 %v5461_v13  ;;  %v4824_v59 = vld [vmem:[%s7403_s10 + $0x318] sm:$0xf] }
 0x2ae   : > { %v5970_v1 = vld [vmem:[%s7403_s10 + $0xc30] sm:$0xf0]  ;;  %v6581_v60 = vld [vmem:[%s7403_s10 + $0x334] sm:$0xf0] }
 0x2af   : > { %v6928_v9 = vld [vmem:[%s7403_s10 + $0xe14] sm:$0xf]  ;;  %v5973_v22 = vor.u32 %v6864_v61, %v5970_v1  ;;  %3960 = vmatpush.bf16.msrb.mxu1 %v5717_v17  ;;  %v5369_v61 = vor.u32 %v6717_v53, %v5368_v52  ;;  %v6645_v1 = vld [vmem:[%s7403_s10 + $0x534] sm:$0xf0]  ;;  %v3780_v53 = vpop.f32.mrf.mxu3 }
 0x2b0   : > { %v6226_v14 = vld [vmem:[%s7403_s10 + $0xe30] sm:$0xf0]  ;;  %3948 = vmatmul.bf16.vlgmr.msrb.gmra.mxu0 %v7631_v41  ;;  %v6709_v8 = vld [vmem:[%s7403_s10 + $0x734] sm:$0xf0]  ;;  %v5081_v12 = vor.u32 %v6645_v1, %v5080_v63 }
 0x2b1   : > { %v6229_v26 = vor.u32 %v6928_v9, %v6226_v14  ;;  %3992 = vmatpush.bf16.msra.mxu0 %v4665_v18  ;;  %3973 = vmatpush.bf16.msrb.mxu2 %v5973_v22  ;;  %v4825_v9 = vor.u32 %v6581_v60, %v4824_v59  ;;  %v4792_v13 = vld [vmem:[%s7403_s10 + $0x2d8] sm:$0xf]  ;;  %v5337_v15 = vor.u32 %v6709_v8, %v5336_v4  ;;  %v3741_v22 = vpop.f32.mrf.mxu0 }
 0x2b2   : > { %3961 = vmatmul.bf16.vlgmr.msrb.gmra.mxu1 %v7644_v54  ;;  %v6573_v14 = vld [vmem:[%s7403_s10 + $0x2f4] sm:$0xf0]  ;;  %v4537_v18 = vor.u32 %v6509_v11, %v4536_v10  ;;  %v3742_v24 = vadd.f32 %v3741_v22, %v8321_v5 }
 0x2b3   : > { %4005 = vmatpush.bf16.msra.mxu1 %v4921_v23  ;;  %3986 = vmatpush.bf16.msrb.mxu3 %v6229_v26  ;;  %v6637_v17 = vld [vmem:[%s7403_s10 + $0x4f4] sm:$0xf0]  ;;  %v4793_v23 = vor.u32 %v6573_v14, %v4792_v13 }
 0x2b4   : > { %3974 = vmatmul.bf16.vlgmr.msrb.gmra.mxu2 %v7636_v46  ;;  %v5304_v19 = vld [vmem:[%s7403_s10 + $0x6d8] sm:$0xf] }
 0x2b5   : > { %4018 = vmatpush.bf16.msra.mxu2 %v5177_v27  ;;  %3993 = vmatpush.bf16.msra.mxu0 %v4633_v36  ;;  %v6701_v21 = vld [vmem:[%s7403_s10 + $0x6f4] sm:$0xf0]  ;;  %v5049_v27 = vor.u32 %v6637_v17, %v5048_v16 }
 0x2b6   : > { %3987 = vmatmul.bf16.vlgmr.msrb.gmra.mxu3 %v7638_v48  ;;  %v4504_v25 = vld [vmem:[%s7403_s10 + $0x98] sm:$0xf]  ;;  %v5305_v32 = vor.u32 %v6701_v21, %v5304_v19 }
 0x2b7   : > { %4031 = vmatpush.bf16.msra.mxu3 %v5433_v33  ;;  %4006 = vmatpush.bf16.msra.mxu1 %v4889_v39  ;;  %v6501_v26 = vld [vmem:[%s7403_s10 + $0xb4] sm:$0xf0]  ;;  %v3754_v33 = vpop.f32.mrf.mxu1 }
 0x2b8   : > { %v4760_v30 = vld [vmem:[%s7403_s10 + $0x298] sm:$0xf]  ;;  %v3755_v7 = vadd.f32 %v3754_v33, %v3742_v24  ;;  %v4505_v5 = vor.u32 %v6501_v26, %v4504_v25 }
 0x2b9   : > { %4019 = vmatpush.bf16.msra.mxu2 %v5145_v43  ;;  %3994 = vmatpush.bf16.msra.mxu0 %v4601_v51  ;;  %v6565_v31 = vld [vmem:[%s7403_s10 + $0x2b4] sm:$0xf0]  ;;  %v3743_v59 = vpop.f32.mrf.mxu0 }
 0x2ba   : > { %v5016_v3 = vld [vmem:[%s7403_s10 + $0x498] sm:$0xf]  ;;  %v4761_v38 = vor.u32 %v6565_v31, %v4760_v30 }
 0x2bb   : > { %4032 = vmatpush.bf16.msra.mxu3 %v5401_v47  ;;  %4007 = vmatpush.bf16.msra.mxu1 %v4857_v55  ;;  %v6629_v35 = vld [vmem:[%s7403_s10 + $0x4b4] sm:$0xf0]  ;;  %v3767_v47 = vpop.f32.mrf.mxu2 }
 0x2bc   : > { %v5272_v36 = vld [vmem:[%s7403_s10 + $0x698] sm:$0xf]  ;;  %v5017_v40 = vor.u32 %v6629_v35, %v5016_v3  ;;  %v3768_v52 = vadd.f32 %v3767_v47, %v3755_v7 }
 0x2bd   : > { %4020 = vmatpush.bf16.msra.mxu2 %v5113_v58  ;;  %3995 = vmatpush.bf16.msra.mxu0 %v4569_v2  ;;  %v6693_v37 = vld [vmem:[%s7403_s10 + $0x6b4] sm:$0xf0] }
 0x2be   : > { %v4472_v39 = vld [vmem:[%s7403_s10 + $0x58] sm:$0xf]  ;;  %v5273_v45 = vor.u32 %v6693_v37, %v5272_v36  ;;  %v8389_v2 = vadd.f32 %v3780_v53, %v3768_v52  ;;  %v3782_v37 = vpop.f32.mrf.mxu3 }
 0x2bf   : > { %4033 = vmatpush.bf16.msra.mxu3 %v5369_v61  ;;  %4008 = vmatpush.bf16.msra.mxu1 %v4825_v9  ;;  %v6493_v42 = vld [vmem:[%s7403_s10 + $0x74] sm:$0xf0] }
 0x2c0   : > { %v4728_v43 = vld [vmem:[%s7403_s10 + $0x258] sm:$0xf]  ;;  %v4473_v55 = vor.u32 %v6493_v42, %v4472_v39 }
 0x2c1   : > { %4021 = vmatpush.bf16.msra.mxu2 %v5081_v12  ;;  %3996 = vmatpush.bf16.msra.mxu0 %v4537_v18  ;;  %v6557_v44 = vld [vmem:[%s7403_s10 + $0x274] sm:$0xf0] }
 0x2c2   : > { %v4984_v49 = vld [vmem:[%s7403_s10 + $0x458] sm:$0xf]  ;;  %v4729_v60 = vor.u32 %v6557_v44, %v4728_v43 }
 0x2c3   : > { %4034 = vmatpush.bf16.msra.mxu3 %v5337_v15  ;;  %4009 = vmatpush.bf16.msra.mxu1 %v4793_v23  ;;  %v6621_v50 = vld [vmem:[%s7403_s10 + $0x474] sm:$0xf0]  ;;  %v3756_v15 = vpop.f32.mrf.mxu1  ;;  %v3769_v35 = vpop.f32.mrf.mxu2 }
 0x2c4   : > { %v5240_v51 = vld [vmem:[%s7403_s10 + $0x658] sm:$0xf]  ;;  %v4985_v4 = vor.u32 %v6621_v50, %v4984_v49 }
 0x2c5   : > { %4022 = vmatpush.bf16.msra.mxu2 %v5049_v27  ;;  %3997 = vmatpush.bf16.msra.mxu0 %v4505_v5  ;;  %v6685_v56 = vld [vmem:[%s7403_s10 + $0x674] sm:$0xf0] }
 0x2c6   : > { %v4440_v57 = vld [vmem:[%s7403_s10 + $0x18] sm:$0xf]  ;;  %v5241_v11 = vor.u32 %v6685_v56, %v5240_v51 }
 0x2c7   : > { %4035 = vmatpush.bf16.msra.mxu3 %v5305_v32  ;;  %v6485_v58 = vld [vmem:[%s7403_s10 + $0x34] sm:$0xf0]  ;;  %4010 = vmatpush.bf16.msra.mxu1 %v4761_v38 }
 0x2c8   : > { %v4696_v61 = vld [vmem:[%s7403_s10 + $0x218] sm:$0xf]  ;;  %v4441_v16 = vor.u32 %v6485_v58, %v4440_v57 }
 0x2c9   : > { %v6549_v63 = vld [vmem:[%s7403_s10 + $0x234] sm:$0xf0]  ;;  %4023 = vmatpush.bf16.msra.mxu2 %v5017_v40  ;;  %3998 = vmatpush.bf16.msra.mxu0 %v4473_v55 }
 0x2ca   : > { %v4952_v1 = vld [vmem:[%s7403_s10 + $0x418] sm:$0xf]  ;;  %v4697_v21 = vor.u32 %v6549_v63, %v4696_v61 }
 0x2cb   : > { %v6613_v8 = vld [vmem:[%s7403_s10 + $0x434] sm:$0xf0]  ;;  %4036 = vmatpush.bf16.msra.mxu3 %v5273_v45  ;;  %4011 = vmatpush.bf16.msra.mxu1 %v4729_v60 }
 0x2cc   : > { %v5688_v9 = vld [vmem:[%s7403_s10 + $0x9d8] sm:$0xf]  ;;  %v4953_v25 = vor.u32 %v6613_v8, %v4952_v1 }
 0x2cd   : > { %v6797_v10 = vld [vmem:[%s7403_s10 + $0x9f4] sm:$0xf0]  ;;  %4024 = vmatpush.bf16.msra.mxu2 %v4985_v4  ;;  %3999 = vmatpush.bf16.msra.mxu0 %v4441_v16 }
 0x2ce   : > { %v5208_v12 = vld [vmem:[%s7403_s10 + $0x618] sm:$0xf]  ;;  %v5689_v22 = vor.u32 %v6797_v10, %v5688_v9 }
 0x2cf   : > { %v5944_v13 = vld [vmem:[%s7403_s10 + $0xbd8] sm:$0xf]  ;;  %4037 = vmatpush.bf16.msra.mxu3 %v5241_v11  ;;  %4012 = vmatpush.bf16.msra.mxu1 %v4697_v21 }
 0x2d0   : > { %v6861_v14 = vld [vmem:[%s7403_s10 + $0xbf4] sm:$0xf0]  ;;  %4000 = vmatmul.bf16.vlgmr.msra.gmra.mxu0 %v7574_v28 }
 0x2d1   : > { %v6677_v17 = vld [vmem:[%s7403_s10 + $0x634] sm:$0xf0]  ;;  %v5945_v26 = vor.u32 %v6861_v14, %v5944_v13  ;;  %4044 = vmatpush.bf16.msrb.mxu0 %v5689_v22  ;;  %4025 = vmatpush.bf16.msra.mxu2 %v4953_v25  ;;  %v3793_v25 = vpop.f32.mrf.mxu0 }
 0x2d2   : > { %v6200_v18 = vld [vmem:[%s7403_s10 + $0xdd8] sm:$0xf]  ;;  %v5209_v31 = vor.u32 %v6677_v17, %v5208_v12  ;;  %4013 = vmatmul.bf16.vlgmr.msra.gmra.mxu1 %v7581_v34 }
 0x2d3   : > { %v6925_v19 = vld [vmem:[%s7403_s10 + $0xdf4] sm:$0xf0]  ;;  %4057 = vmatpush.bf16.msrb.mxu1 %v5945_v26 }
 0x2d4   : > { %v6456_v23 = vld [vmem:[%s7403_s10 + $0xfd8] sm:$0xf]  ;;  %v6201_v32 = vor.u32 %v6925_v19, %v6200_v18  ;;  %4038 = vmatpush.bf16.msra.mxu3 %v5209_v31  ;;  %4026 = vmatmul.bf16.vlgmr.msra.gmra.mxu2 %v7566_v20 }
 0x2d5   : > { %v6989_v24 = vld [vmem:[%s7403_s10 + $0xff4] sm:$0xf0] }
 0x2d6   : > { %v5656_v27 = vld [vmem:[%s7403_s10 + $0x998] sm:$0xf]  ;;  %v6457_v7 = vor.u32 %v6989_v24, %v6456_v23  ;;  %4070 = vmatpush.bf16.msrb.mxu2 %v6201_v32 }
 0x2d7   : > { %v6789_v30 = vld [vmem:[%s7403_s10 + $0x9b4] sm:$0xf0]  ;;  %4039 = vmatmul.bf16.vlgmr.msra.gmra.mxu3 %v7576_v29 }
 0x2d8   : > { %v5912_v33 = vld [vmem:[%s7403_s10 + $0xb98] sm:$0xf]  ;;  %v5657_v38 = vor.u32 %v6789_v30, %v5656_v27  ;;  %4083 = vmatpush.bf16.msrb.mxu3 %v6457_v7 }
 0x2d9   : > { %v6853_v3 = vld [vmem:[%s7403_s10 + $0xbb4] sm:$0xf0] }
 0x2da   : > { %v6168_v5 = vld [vmem:[%s7403_s10 + $0xd98] sm:$0xf]  ;;  %v5913_v40 = vor.u32 %v6853_v3, %v5912_v33  ;;  %4045 = vmatpush.bf16.msrb.mxu0 %v5657_v38 }
 0x2db   : > { %v6917_v36 = vld [vmem:[%s7403_s10 + $0xdb4] sm:$0xf0] }
 0x2dc   : > { %v6424_v39 = vld [vmem:[%s7403_s10 + $0xf98] sm:$0xf]  ;;  %v6169_v45 = vor.u32 %v6917_v36, %v6168_v5  ;;  %4058 = vmatpush.bf16.msrb.mxu1 %v5913_v40  ;;  %v3806_v5 = vpop.f32.mrf.mxu1 }
 0x2dd   : > { %v6981_v42 = vld [vmem:[%s7403_s10 + $0xfb4] sm:$0xf0] }
 0x2de   : > { %v5624_v43 = vld [vmem:[%s7403_s10 + $0x958] sm:$0xf]  ;;  %v6425_v50 = vor.u32 %v6981_v42, %v6424_v39  ;;  %4071 = vmatpush.bf16.msrb.mxu2 %v6169_v45  ;;  %v3807_v39 = vadd.f32 %v3806_v5, %v3793_v25  ;;  %v4890_v5 = vld [vmem:[%s7403_s10 + $0x3b8] sm:$0xf0] }
 0x2df   : > { %v6781_v44 = vld [vmem:[%s7403_s10 + $0x974] sm:$0xf0] }
 0x2e0   : > { %v5880_v47 = vld [vmem:[%s7403_s10 + $0xb58] sm:$0xf]  ;;  %v5625_v53 = vor.u32 %v6781_v44, %v5624_v43  ;;  %4084 = vmatpush.bf16.msrb.mxu3 %v6425_v50 }
 0x2e1   : > { %v6845_v49 = vld [vmem:[%s7403_s10 + $0xb74] sm:$0xf0] }
 0x2e2   : > { %v6136_v51 = vld [vmem:[%s7403_s10 + $0xd58] sm:$0xf]  ;;  %v5881_v57 = vor.u32 %v6845_v49, %v5880_v47  ;;  %4046 = vmatpush.bf16.msrb.mxu0 %v5625_v53  ;;  %v3819_v53 = vpop.f32.mrf.mxu2 }
 0x2e3   : > { %v6909_v52 = vld [vmem:[%s7403_s10 + $0xd74] sm:$0xf0] }
 0x2e4   : > { %v6392_v55 = vld [vmem:[%s7403_s10 + $0xf58] sm:$0xf]  ;;  %v6137_v60 = vor.u32 %v6909_v52, %v6136_v51  ;;  %4059 = vmatpush.bf16.msrb.mxu1 %v5881_v57 }
 0x2e5   : > { %v6973_v56 = vld [vmem:[%s7403_s10 + $0xf74] sm:$0xf0] }
 0x2e6   : > { %v5592_v58 = vld [vmem:[%s7403_s10 + $0x918] sm:$0xf]  ;;  %v6393_v1 = vor.u32 %v6973_v56, %v6392_v55  ;;  %4072 = vmatpush.bf16.msrb.mxu2 %v6137_v60  ;;  %v3832_v60 = vpop.f32.mrf.mxu3 }
 0x2e7   : > { %v6773_v59 = vld [vmem:[%s7403_s10 + $0x934] sm:$0xf0] }
 0x2e8   : > { %v5848_v61 = vld [vmem:[%s7403_s10 + $0xb18] sm:$0xf]  ;;  %v5593_v9 = vor.u32 %v6773_v59, %v5592_v58  ;;  %4085 = vmatpush.bf16.msrb.mxu3 %v6393_v1  ;;  %v3820_v59 = vadd.f32 %v3819_v53, %v3807_v39  ;;  %v5146_v39 = vld [vmem:[%s7403_s10 + $0x5b8] sm:$0xf0] }
 0x2e9   : > { %v6837_v63 = vld [vmem:[%s7403_s10 + $0xb34] sm:$0xf0] }
 0x2ea   : > { %v6104_v4 = vld [vmem:[%s7403_s10 + $0xd18] sm:$0xf]  ;;  %v5849_v12 = vor.u32 %v6837_v63, %v5848_v61  ;;  %4047 = vmatpush.bf16.msrb.mxu0 %v5593_v9  ;;  %v3795_v61 = vpop.f32.mrf.mxu0 }
 0x2eb   : > { %v6901_v8 = vld [vmem:[%s7403_s10 + $0xd34] sm:$0xf0]  ;;  %v6513_v61 = vld [vmem:[%s7403_s10 + $0x11c] sm:$0xf] }
 0x2ec   : > { %v6360_v10 = vld [vmem:[%s7403_s10 + $0xf18] sm:$0xf]  ;;  %v6105_v15 = vor.u32 %v6901_v8, %v6104_v4  ;;  %4060 = vmatpush.bf16.msrb.mxu1 %v5849_v12  ;;  %v4666_v12 = vld [vmem:[%s7403_s10 + $0x1f8] sm:$0xf0] }
 0x2ed   : > { %v6965_v11 = vld [vmem:[%s7403_s10 + $0xf34] sm:$0xf0] }
 0x2ee   : > { %v5560_v13 = vld [vmem:[%s7403_s10 + $0x8d8] sm:$0xf]  ;;  %v6361_v18 = vor.u32 %v6965_v11, %v6360_v10  ;;  %4073 = vmatpush.bf16.msrb.mxu2 %v6105_v15  ;;  %v6537_v11 = vld [vmem:[%s7403_s10 + $0x1dc] sm:$0xf] }
 0x2ef   : > { %v6765_v14 = vld [vmem:[%s7403_s10 + $0x8f4] sm:$0xf0]  ;;  %v4669_v25 = vor.u32 %v6537_v11, %v4666_v12  ;;  %v5082_v11 = vld [vmem:[%s7403_s10 + $0x538] sm:$0xf0] }
 0x2f0   : > { %v5816_v16 = vld [vmem:[%s7403_s10 + $0xad8] sm:$0xf]  ;;  %v5561_v22 = vor.u32 %v6765_v14, %v5560_v13  ;;  %4086 = vmatpush.bf16.msrb.mxu3 %v6361_v18  ;;  %v8462_v13 = vadd.f32 %v3832_v60, %v3820_v59  ;;  %v3808_v18 = vpop.f32.mrf.mxu1  ;;  %v5370_v59 = vld [vmem:[%s7403_s10 + $0x778] sm:$0xf0] }
 0x2f1   : > { %v6829_v17 = vld [vmem:[%s7403_s10 + $0xaf4] sm:$0xf0]  ;;  %v4538_v18 = vld [vmem:[%s7403_s10 + $0xf8] sm:$0xf0] }
 0x2f2   : > { %v6072_v19 = vld [vmem:[%s7403_s10 + $0xcd8] sm:$0xf]  ;;  %v5817_v26 = vor.u32 %v6829_v17, %v5816_v16  ;;  %4048 = vmatpush.bf16.msrb.mxu0 %v5561_v22  ;;  %v6601_v16 = vld [vmem:[%s7403_s10 + $0x3dc] sm:$0xf] }
 0x2f3   : > { %v6893_v21 = vld [vmem:[%s7403_s10 + $0xcf4] sm:$0xf0]  ;;  %v4922_v17 = vld [vmem:[%s7403_s10 + $0x3f8] sm:$0xf0] }
 0x2f4   : > { %v6328_v23 = vld [vmem:[%s7403_s10 + $0xed8] sm:$0xf]  ;;  %v6073_v31 = vor.u32 %v6893_v21, %v6072_v19  ;;  %4061 = vmatpush.bf16.msrb.mxu1 %v5817_v26  ;;  %v6665_v22 = vld [vmem:[%s7403_s10 + $0x5dc] sm:$0xf] }
 0x2f5   : > { %v6957_v24 = vld [vmem:[%s7403_s10 + $0xef4] sm:$0xf0]  ;;  %v6729_v26 = vld [vmem:[%s7403_s10 + $0x7dc] sm:$0xf] }
 0x2f6   : > { %v5528_v27 = vld [vmem:[%s7403_s10 + $0x898] sm:$0xf]  ;;  %v6329_v3 = vor.u32 %v6957_v24, %v6328_v23  ;;  %4074 = vmatpush.bf16.msrb.mxu2 %v6073_v31  ;;  %v5178_v23 = vld [vmem:[%s7403_s10 + $0x5f8] sm:$0xf0]  ;;  %v4925_v31 = vor.u32 %v6601_v16, %v4922_v17 }
 0x2f7   : > { %v6757_v30 = vld [vmem:[%s7403_s10 + $0x8b4] sm:$0xf0]  ;;  %v6505_v17 = vld [vmem:[%s7403_s10 + $0xdc] sm:$0xf] }
 0x2f8   : > { %v5784_v32 = vld [vmem:[%s7403_s10 + $0xa98] sm:$0xf]  ;;  %v5529_v36 = vor.u32 %v6757_v30, %v5528_v27  ;;  %4087 = vmatpush.bf16.msrb.mxu3 %v6329_v3  ;;  %v5434_v27 = vld [vmem:[%s7403_s10 + $0x7f8] sm:$0xf0] }
 0x2f9   : > { %v6821_v33 = vld [vmem:[%s7403_s10 + $0xab4] sm:$0xf0] }
 0x2fa   : > { %v6040_v35 = vld [vmem:[%s7403_s10 + $0xc98] sm:$0xf]  ;;  %v5785_v42 = vor.u32 %v6821_v33, %v5784_v32  ;;  %4049 = vmatpush.bf16.msrb.mxu0 %v5529_v36  ;;  %v6529_v32 = vld [vmem:[%s7403_s10 + $0x19c] sm:$0xf]  ;;  %v3821_v36 = vpop.f32.mrf.mxu2 }
 0x2fb   : > { %v6885_v7 = vld [vmem:[%s7403_s10 + $0xcb4] sm:$0xf0]  ;;  %v4634_v33 = vld [vmem:[%s7403_s10 + $0x1b8] sm:$0xf0] }
 0x2fc   : > { %v6296_v37 = vld [vmem:[%s7403_s10 + $0xe98] sm:$0xf]  ;;  %v6041_v44 = vor.u32 %v6885_v7, %v6040_v35  ;;  %4062 = vmatpush.bf16.msrb.mxu1 %v5785_v42  ;;  %v5181_v35 = vor.u32 %v6665_v22, %v5178_v23  ;;  %v6593_v7 = vld [vmem:[%s7403_s10 + $0x39c] sm:$0xf]  ;;  %v3834_v42 = vpop.f32.mrf.mxu3 }
 0x2fd   : > { %v6949_v38 = vld [vmem:[%s7403_s10 + $0xeb4] sm:$0xf0]  ;;  %v4794_v22 = vld [vmem:[%s7403_s10 + $0x2f8] sm:$0xf0] }
 0x2fe   : > { %v5496_v40 = vld [vmem:[%s7403_s10 + $0x858] sm:$0xf]  ;;  %v6297_v49 = vor.u32 %v6949_v38, %v6296_v37  ;;  %4075 = vmatpush.bf16.msrb.mxu2 %v6041_v44  ;;  %v5437_v37 = vor.u32 %v6729_v26, %v5434_v27  ;;  %v6657_v38 = vld [vmem:[%s7403_s10 + $0x59c] sm:$0xf]  ;;  %v4541_v26 = vor.u32 %v6505_v17, %v4538_v18 }
 0x2ff   : > { %v6749_v43 = vld [vmem:[%s7403_s10 + $0x874] sm:$0xf0]  ;;  %v5402_v44 = vld [vmem:[%s7403_s10 + $0x7b8] sm:$0xf0] }
 0x300   : > { %v5752_v45 = vld [vmem:[%s7403_s10 + $0xa58] sm:$0xf]  ;;  %v5497_v55 = vor.u32 %v6749_v43, %v5496_v40  ;;  %4088 = vmatpush.bf16.msrb.mxu3 %v6297_v49  ;;  %v4637_v40 = vor.u32 %v6529_v32, %v4634_v33  ;;  %v6721_v43 = vld [vmem:[%s7403_s10 + $0x79c] sm:$0xf] }
 0x301   : > { %v6813_v47 = vld [vmem:[%s7403_s10 + $0xa74] sm:$0xf0]  ;;  %v4602_v49 = vld [vmem:[%s7403_s10 + $0x178] sm:$0xf0]  ;;  %v5405_v53 = vor.u32 %v6721_v43, %v5402_v44 }
 0x302   : > { %v6008_v50 = vld [vmem:[%s7403_s10 + $0xc58] sm:$0xf]  ;;  %v5753_v63 = vor.u32 %v6813_v47, %v5752_v45  ;;  %4050 = vmatpush.bf16.msrb.mxu0 %v5497_v55  ;;  %v4893_v45 = vor.u32 %v6593_v7, %v4890_v5  ;;  %v6521_v47 = vld [vmem:[%s7403_s10 + $0x15c] sm:$0xf] }
 0x303   : > { %v6877_v51 = vld [vmem:[%s7403_s10 + $0xc74] sm:$0xf0]  ;;  %v6649_v55 = vld [vmem:[%s7403_s10 + $0x55c] sm:$0xf] }
 0x304   : > { %v6264_v52 = vld [vmem:[%s7403_s10 + $0xe58] sm:$0xf]  ;;  %v6009_v9 = vor.u32 %v6877_v51, %v6008_v50  ;;  %4063 = vmatpush.bf16.msrb.mxu1 %v5753_v63  ;;  %v5149_v50 = vor.u32 %v6657_v38, %v5146_v39  ;;  %v6585_v51 = vld [vmem:[%s7403_s10 + $0x35c] sm:$0xf]  ;;  %v3858_v38 = vpop.f32.mrf.mxu1 }
 0x305   : > { %v6941_v56 = vld [vmem:[%s7403_s10 + $0xe74] sm:$0xf0]  ;;  %v4570_v63 = vld [vmem:[%s7403_s10 + $0x138] sm:$0xf0] }
 0x306   : > { %v5464_v57 = vld [vmem:[%s7403_s10 + $0x818] sm:$0xf]  ;;  %v6265_v14 = vor.u32 %v6941_v56, %v6264_v52  ;;  %4076 = vmatpush.bf16.msrb.mxu2 %v6009_v9  ;;  %v4858_v52 = vld [vmem:[%s7403_s10 + $0x378] sm:$0xf0]  ;;  %v4573_v12 = vor.u32 %v6513_v61, %v4570_v63 }
 0x307   : > { %v6741_v58 = vld [vmem:[%s7403_s10 + $0x834] sm:$0xf0]  ;;  %v5114_v56 = vld [vmem:[%s7403_s10 + $0x578] sm:$0xf0]  ;;  %v4861_v60 = vor.u32 %v6585_v51, %v4858_v52 }
 0x308   : > { %v5720_v1 = vld [vmem:[%s7403_s10 + $0xa18] sm:$0xf]  ;;  %v5465_v19 = vor.u32 %v6741_v58, %v5464_v57  ;;  %4089 = vmatpush.bf16.msrb.mxu3 %v6265_v14  ;;  %v4605_v57 = vor.u32 %v6521_v47, %v4602_v49  ;;  %v6713_v58 = vld [vmem:[%s7403_s10 + $0x75c] sm:$0xf] }
 0x309   : > { %v6805_v4 = vld [vmem:[%s7403_s10 + $0xa34] sm:$0xf0]  ;;  %v5373_v9 = vor.u32 %v6713_v58, %v5370_v59  ;;  %v6705_v14 = vld [vmem:[%s7403_s10 + $0x71c] sm:$0xf] }
 0x30a   : > { %v5976_v8 = vld [vmem:[%s7403_s10 + $0xc18] sm:$0xf]  ;;  %v5721_v24 = vor.u32 %v6805_v4, %v5720_v1  ;;  %4051 = vmatpush.bf16.msrb.mxu0 %v5465_v19  ;;  %v5117_v1 = vor.u32 %v6649_v55, %v5114_v56  ;;  %v6577_v4 = vld [vmem:[%s7403_s10 + $0x31c] sm:$0xf]  ;;  %v3871_v55 = vpop.f32.mrf.mxu2 }
 0x30b   : > { %v6869_v10 = vld [vmem:[%s7403_s10 + $0xc34] sm:$0xf0]  ;;  %v6697_v27 = vld [vmem:[%s7403_s10 + $0x6dc] sm:$0xf] }
 0x30c   : > { %v6232_v15 = vld [vmem:[%s7403_s10 + $0xe18] sm:$0xf]  ;;  %v5977_v30 = vor.u32 %v6869_v10, %v5976_v8  ;;  %4064 = vmatpush.bf16.msrb.mxu1 %v5721_v24  ;;  %v4826_v8 = vld [vmem:[%s7403_s10 + $0x338] sm:$0xf0] }
 0x30d   : > { %v6933_v21 = vld [vmem:[%s7403_s10 + $0xe34] sm:$0xf0]  ;;  %4052 = vmatmul.bf16.vlgmr.msrb.gmra.mxu0 %v7631_v41  ;;  %v6641_v10 = vld [vmem:[%s7403_s10 + $0x51c] sm:$0xf]  ;;  %v4829_v16 = vor.u32 %v6577_v4, %v4826_v8 }
 0x30e   : > { %v6233_v3 = vor.u32 %v6933_v21, %v6232_v15  ;;  %4096 = vmatpush.bf16.msra.mxu0 %v4669_v25  ;;  %4077 = vmatpush.bf16.msrb.mxu2 %v5977_v30  ;;  %v5338_v15 = vld [vmem:[%s7403_s10 + $0x738] sm:$0xf0]  ;;  %v5085_v19 = vor.u32 %v6641_v10, %v5082_v11 }
 0x30f   : > { %4065 = vmatmul.bf16.vlgmr.msrb.gmra.mxu1 %v7644_v54  ;;  %v6569_v21 = vld [vmem:[%s7403_s10 + $0x2dc] sm:$0xf]  ;;  %v5341_v23 = vor.u32 %v6705_v14, %v5338_v15 }
 0x310   : > { %4109 = vmatpush.bf16.msra.mxu1 %v4925_v31  ;;  %4090 = vmatpush.bf16.msrb.mxu3 %v6233_v3  ;;  %v6633_v24 = vld [vmem:[%s7403_s10 + $0x4dc] sm:$0xf]  ;;  %v3845_v31 = vpop.f32.mrf.mxu0  ;;  %v4797_v32 = vor.u32 %v6569_v21, %v4794_v22 }
 0x311   : > { %4078 = vmatmul.bf16.vlgmr.msrb.gmra.mxu2 %v7636_v46  ;;  %v5050_v25 = vld [vmem:[%s7403_s10 + $0x4f8] sm:$0xf0]  ;;  %v3846_v33 = vadd.f32 %v3845_v31, %v8462_v13 }
 0x312   : > { %4122 = vmatpush.bf16.msra.mxu2 %v5181_v35  ;;  %4097 = vmatpush.bf16.msra.mxu0 %v4637_v40  ;;  %v5306_v30 = vld [vmem:[%s7403_s10 + $0x6f8] sm:$0xf0]  ;;  %v5053_v7 = vor.u32 %v6633_v24, %v5050_v25  ;;  %v3860_v24 = vpop.f32.mrf.mxu1 }
 0x313   : > { %4091 = vmatmul.bf16.vlgmr.msrb.gmra.mxu3 %v7638_v48  ;;  %v6497_v3 = vld [vmem:[%s7403_s10 + $0x9c] sm:$0xf]  ;;  %v3859_v40 = vadd.f32 %v3858_v38, %v3846_v33 }
 0x314   : > { %4135 = vmatpush.bf16.msra.mxu3 %v5437_v37  ;;  %4110 = vmatpush.bf16.msra.mxu1 %v4893_v45  ;;  %v4506_v35 = vld [vmem:[%s7403_s10 + $0xb8] sm:$0xf0]  ;;  %v5309_v37 = vor.u32 %v6697_v27, %v5306_v30 }
 0x315   : > { %v6561_v5 = vld [vmem:[%s7403_s10 + $0x29c] sm:$0xf]  ;;  %v4509_v13 = vor.u32 %v6497_v3, %v4506_v35  ;;  %v3872_v59 = vadd.f32 %v3871_v55, %v3859_v40  ;;  %v3873_v40 = vpop.f32.mrf.mxu2 }
 0x316   : > { %4123 = vmatpush.bf16.msra.mxu2 %v5149_v50  ;;  %4098 = vmatpush.bf16.msra.mxu0 %v4605_v57  ;;  %v4762_v36 = vld [vmem:[%s7403_s10 + $0x2b8] sm:$0xf0] }
 0x317   : > { %v6625_v39 = vld [vmem:[%s7403_s10 + $0x49c] sm:$0xf]  ;;  %v4765_v45 = vor.u32 %v6561_v5, %v4762_v36 }
 0x318   : > { %4136 = vmatpush.bf16.msra.mxu3 %v5405_v53  ;;  %4111 = vmatpush.bf16.msra.mxu1 %v4861_v60  ;;  %v5018_v42 = vld [vmem:[%s7403_s10 + $0x4b8] sm:$0xf0]  ;;  %v3884_v60 = vpop.f32.mrf.mxu3  ;;  %v3847_v8 = vpop.f32.mrf.mxu0 }
 0x319   : > { %v6689_v43 = vld [vmem:[%s7403_s10 + $0x69c] sm:$0xf]  ;;  %v5021_v50 = vor.u32 %v6625_v39, %v5018_v42  ;;  %v8530_v14 = vadd.f32 %v3884_v60, %v3872_v59 }
 0x31a   : > { %4124 = vmatpush.bf16.msra.mxu2 %v5117_v1  ;;  %4099 = vmatpush.bf16.msra.mxu0 %v4573_v12  ;;  %v5274_v44 = vld [vmem:[%s7403_s10 + $0x6b8] sm:$0xf0] }
 0x31b   : > { %v6489_v47 = vld [vmem:[%s7403_s10 + $0x5c] sm:$0xf]  ;;  %v5277_v53 = vor.u32 %v6689_v43, %v5274_v44 }
 0x31c   : > { %4137 = vmatpush.bf16.msra.mxu3 %v5373_v9  ;;  %4112 = vmatpush.bf16.msra.mxu1 %v4829_v16  ;;  %v4474_v49 = vld [vmem:[%s7403_s10 + $0x78] sm:$0xf0] }
 0x31d   : > { %v6553_v51 = vld [vmem:[%s7403_s10 + $0x25c] sm:$0xf]  ;;  %v4477_v61 = vor.u32 %v6489_v47, %v4474_v49 }
 0x31e   : > { %4125 = vmatpush.bf16.msra.mxu2 %v5085_v19  ;;  %4100 = vmatpush.bf16.msra.mxu0 %v4541_v26  ;;  %v4730_v52 = vld [vmem:[%s7403_s10 + $0x278] sm:$0xf0] }
 0x31f   : > { %v6617_v56 = vld [vmem:[%s7403_s10 + $0x45c] sm:$0xf]  ;;  %v4733_v9 = vor.u32 %v6553_v51, %v4730_v52 }
 0x320   : > { %4138 = vmatpush.bf16.msra.mxu3 %v5341_v23  ;;  %4113 = vmatpush.bf16.msra.mxu1 %v4797_v32  ;;  %v4986_v57 = vld [vmem:[%s7403_s10 + $0x478] sm:$0xf0] }
 0x321   : > { %v6681_v58 = vld [vmem:[%s7403_s10 + $0x65c] sm:$0xf]  ;;  %v4989_v15 = vor.u32 %v6617_v56, %v4986_v57 }
 0x322   : > { %4126 = vmatpush.bf16.msra.mxu2 %v5053_v7  ;;  %4101 = vmatpush.bf16.msra.mxu0 %v4509_v13  ;;  %v5242_v63 = vld [vmem:[%s7403_s10 + $0x678] sm:$0xf0] }
 0x323   : > { %v6481_v1 = vld [vmem:[%s7403_s10 + $0x1c] sm:$0xf]  ;;  %v5245_v19 = vor.u32 %v6681_v58, %v5242_v63 }
 0x324   : > { %4139 = vmatpush.bf16.msra.mxu3 %v5309_v37  ;;  %v4442_v4 = vld [vmem:[%s7403_s10 + $0x38] sm:$0xf0]  ;;  %4114 = vmatpush.bf16.msra.mxu1 %v4765_v45  ;;  %v3886_v45 = vpop.f32.mrf.mxu3 }
 0x325   : > { %v6545_v10 = vld [vmem:[%s7403_s10 + $0x21c] sm:$0xf]  ;;  %v4445_v25 = vor.u32 %v6481_v1, %v4442_v4 }
 0x326   : > { %v4698_v11 = vld [vmem:[%s7403_s10 + $0x238] sm:$0xf0]  ;;  %4127 = vmatpush.bf16.msra.mxu2 %v5021_v50  ;;  %4102 = vmatpush.bf16.msra.mxu0 %v4477_v61 }
 0x327   : > { %v6609_v12 = vld [vmem:[%s7403_s10 + $0x41c] sm:$0xf]  ;;  %v4701_v31 = vor.u32 %v6545_v10, %v4698_v11 }
 0x328   : > { %v4954_v16 = vld [vmem:[%s7403_s10 + $0x438] sm:$0xf0]  ;;  %4140 = vmatpush.bf16.msra.mxu3 %v5277_v53  ;;  %4115 = vmatpush.bf16.msra.mxu1 %v4733_v9 }
 0x329   : > { %v6793_v17 = vld [vmem:[%s7403_s10 + $0x9dc] sm:$0xf]  ;;  %v4957_v35 = vor.u32 %v6609_v12, %v4954_v16 }
 0x32a   : > { %v5690_v18 = vld [vmem:[%s7403_s10 + $0x9f8] sm:$0xf0]  ;;  %4128 = vmatpush.bf16.msra.mxu2 %v4989_v15  ;;  %4103 = vmatpush.bf16.msra.mxu0 %v4445_v25 }
 0x32b   : > { %v6673_v21 = vld [vmem:[%s7403_s10 + $0x61c] sm:$0xf]  ;;  %v5693_v32 = vor.u32 %v6793_v17, %v5690_v18 }
 0x32c   : > { %v6857_v22 = vld [vmem:[%s7403_s10 + $0xbdc] sm:$0xf]  ;;  %4141 = vmatpush.bf16.msra.mxu3 %v5245_v19  ;;  %4116 = vmatpush.bf16.msra.mxu1 %v4701_v31 }
 0x32d   : > { %v5946_v23 = vld [vmem:[%s7403_s10 + $0xbf8] sm:$0xf0]  ;;  %4104 = vmatmul.bf16.vlgmr.msra.gmra.mxu0 %v7574_v28 }
 0x32e   : > { %v5210_v26 = vld [vmem:[%s7403_s10 + $0x638] sm:$0xf0]  ;;  %v5949_v7 = vor.u32 %v6857_v22, %v5946_v23  ;;  %4148 = vmatpush.bf16.msrb.mxu0 %v5693_v32  ;;  %4129 = vmatpush.bf16.msra.mxu2 %v4957_v35  ;;  %v3897_v32 = vpop.f32.mrf.mxu0 }
 0x32f   : > { %v6921_v27 = vld [vmem:[%s7403_s10 + $0xddc] sm:$0xf]  ;;  %v5213_v37 = vor.u32 %v6673_v21, %v5210_v26  ;;  %4117 = vmatmul.bf16.vlgmr.msra.gmra.mxu1 %v7581_v34 }
 0x330   : > { %v6202_v30 = vld [vmem:[%s7403_s10 + $0xdf8] sm:$0xf0]  ;;  %4161 = vmatpush.bf16.msrb.mxu1 %v5949_v7 }
 0x331   : > { %v6985_v33 = vld [vmem:[%s7403_s10 + $0xfdc] sm:$0xf]  ;;  %v6205_v38 = vor.u32 %v6921_v27, %v6202_v30  ;;  %4142 = vmatpush.bf16.msra.mxu3 %v5213_v37  ;;  %4130 = vmatmul.bf16.vlgmr.msra.gmra.mxu2 %v7566_v20 }
 0x332   : > { %v6458_v3 = vld [vmem:[%s7403_s10 + $0xff8] sm:$0xf0] }
 0x333   : > { %v6785_v5 = vld [vmem:[%s7403_s10 + $0x99c] sm:$0xf]  ;;  %v6461_v13 = vor.u32 %v6985_v33, %v6458_v3  ;;  %4174 = vmatpush.bf16.msrb.mxu2 %v6205_v38 }
 0x334   : > { %v5658_v36 = vld [vmem:[%s7403_s10 + $0x9b8] sm:$0xf0]  ;;  %4143 = vmatmul.bf16.vlgmr.msra.gmra.mxu3 %v7576_v29 }
 0x335   : > { %v6849_v39 = vld [vmem:[%s7403_s10 + $0xb9c] sm:$0xf]  ;;  %v5661_v47 = vor.u32 %v6785_v5, %v5658_v36  ;;  %4187 = vmatpush.bf16.msrb.mxu3 %v6461_v13 }
 0x336   : > { %v5914_v42 = vld [vmem:[%s7403_s10 + $0xbb8] sm:$0xf0] }
 0x337   : > { %v6913_v43 = vld [vmem:[%s7403_s10 + $0xd9c] sm:$0xf]  ;;  %v5917_v51 = vor.u32 %v6849_v39, %v5914_v42  ;;  %4149 = vmatpush.bf16.msrb.mxu0 %v5661_v47  ;;  %v3910_v42 = vpop.f32.mrf.mxu1 }
 0x338   : > { %v6170_v44 = vld [vmem:[%s7403_s10 + $0xdb8] sm:$0xf0] }
 0x339   : > { %v6977_v49 = vld [vmem:[%s7403_s10 + $0xf9c] sm:$0xf]  ;;  %v6173_v55 = vor.u32 %v6913_v43, %v6170_v44  ;;  %4162 = vmatpush.bf16.msrb.mxu1 %v5917_v51  ;;  %v3911_v44 = vadd.f32 %v3910_v42, %v3897_v32 }
 0x33a   : > { %v6426_v50 = vld [vmem:[%s7403_s10 + $0xfb8] sm:$0xf0] }
 0x33b   : > { %v6777_v52 = vld [vmem:[%s7403_s10 + $0x95c] sm:$0xf]  ;;  %v6429_v58 = vor.u32 %v6977_v49, %v6426_v50  ;;  %4175 = vmatpush.bf16.msrb.mxu2 %v6173_v55 }
 0x33c   : > { %v5626_v53 = vld [vmem:[%s7403_s10 + $0x978] sm:$0xf0] }
 0x33d   : > { %v6841_v56 = vld [vmem:[%s7403_s10 + $0xb5c] sm:$0xf]  ;;  %v5629_v61 = vor.u32 %v6777_v52, %v5626_v53  ;;  %4188 = vmatpush.bf16.msrb.mxu3 %v6429_v58 }
 0x33e   : > { %v5882_v57 = vld [vmem:[%s7403_s10 + $0xb78] sm:$0xf0] }
 0x33f   : > { %v6905_v59 = vld [vmem:[%s7403_s10 + $0xd5c] sm:$0xf]  ;;  %v5885_v4 = vor.u32 %v6841_v56, %v5882_v57  ;;  %4150 = vmatpush.bf16.msrb.mxu0 %v5629_v61  ;;  %v3923_v57 = vpop.f32.mrf.mxu2 }
 0x340   : > { %v6138_v60 = vld [vmem:[%s7403_s10 + $0xd78] sm:$0xf0]  ;;  %v3924_v61 = vadd.f32 %v3923_v57, %v3911_v44 }
 0x341   : > { %v6969_v63 = vld [vmem:[%s7403_s10 + $0xf5c] sm:$0xf]  ;;  %v6141_v28 = vor.u32 %v6905_v59, %v6138_v60  ;;  %4163 = vmatpush.bf16.msrb.mxu1 %v5885_v4 }
 0x342   : > { %v6394_v1 = vld [vmem:[%s7403_s10 + $0xf78] sm:$0xf0] }
 0x343   : > { %v6769_v8 = vld [vmem:[%s7403_s10 + $0x91c] sm:$0xf]  ;;  %v6397_v20 = vor.u32 %v6969_v63, %v6394_v1  ;;  %4176 = vmatpush.bf16.msrb.mxu2 %v6141_v28  ;;  %v3936_v63 = vpop.f32.mrf.mxu3  ;;  %v3899_v1 = vpop.f32.mrf.mxu0 }
 0x344   : > { %v5594_v9 = vld [vmem:[%s7403_s10 + $0x938] sm:$0xf0] }
 0x345   : > { %v6833_v10 = vld [vmem:[%s7403_s10 + $0xb1c] sm:$0xf]  ;;  %v5597_v29 = vor.u32 %v6769_v8, %v5594_v9  ;;  %4189 = vmatpush.bf16.msrb.mxu3 %v6397_v20  ;;  %v3937_v20 = vadd.f32 %v3936_v63, %v3924_v61 }
 0x346   : > { %v5850_v11 = vld [vmem:[%s7403_s10 + $0xb38] sm:$0xf0] }
 0x347   : > { %v6897_v12 = vld [vmem:[%s7403_s10 + $0xd1c] sm:$0xf]  ;;  %v5853_v18 = vor.u32 %v6833_v10, %v5850_v11  ;;  %4151 = vmatpush.bf16.msrb.mxu0 %v5597_v29 }
 0x348   : > { %v6106_v15 = vld [vmem:[%s7403_s10 + $0xd38] sm:$0xf0] }
 0x349   : > { %v6961_v16 = vld [vmem:[%s7403_s10 + $0xf1c] sm:$0xf]  ;;  %v6109_v34 = vor.u32 %v6897_v12, %v6106_v15  ;;  %4164 = vmatpush.bf16.msrb.mxu1 %v5853_v18 }
 0x34a   : > { %v6362_v17 = vld [vmem:[%s7403_s10 + $0xf38] sm:$0xf0] }
 0x34b   : > { %v6761_v19 = vld [vmem:[%s7403_s10 + $0x8dc] sm:$0xf]  ;;  %v6365_v24 = vor.u32 %v6961_v16, %v6362_v17  ;;  %4177 = vmatpush.bf16.msrb.mxu2 %v6109_v34  ;;  %v3912_v16 = vpop.f32.mrf.mxu1 }
 0x34c   : > { %v5562_v21 = vld [vmem:[%s7403_s10 + $0x8f8] sm:$0xf0] }
 0x34d   : > { %v6825_v22 = vld [vmem:[%s7403_s10 + $0xadc] sm:$0xf]  ;;  %v5565_v27 = vor.u32 %v6761_v19, %v5562_v21  ;;  %4190 = vmatpush.bf16.msrb.mxu3 %v6365_v24  ;;  %v3938_v24 = vpop.f32.mrf.mxu3 }
 0x34e   : > { %v5818_v23 = vld [vmem:[%s7403_s10 + $0xaf8] sm:$0xf0] }
 0x34f   : > { %v6889_v25 = vld [vmem:[%s7403_s10 + $0xcdc] sm:$0xf]  ;;  %v5821_v33 = vor.u32 %v6825_v22, %v5818_v23  ;;  %4152 = vmatpush.bf16.msrb.mxu0 %v5565_v27  ;;  %v3925_v23 = vpop.f32.mrf.mxu2 }
 0x350   : > { %v6074_v26 = vld [vmem:[%s7403_s10 + $0xcf8] sm:$0xf0] }
 0x351   : > { %v6953_v30 = vld [vmem:[%s7403_s10 + $0xedc] sm:$0xf]  ;;  %v6077_v7 = vor.u32 %v6889_v25, %v6074_v26  ;;  %4165 = vmatpush.bf16.msrb.mxu1 %v5821_v33  ;;  %v3949_v25 = vpop.f32.mrf.mxu0 }
 0x352   : > { %v6330_v31 = vld [vmem:[%s7403_s10 + $0xef8] sm:$0xf0]  ;;  %v3950_v26 = vadd.f32 %v3949_v25, %v3937_v20 }
 0x353   : > { %v6753_v3 = vld [vmem:[%s7403_s10 + $0x89c] sm:$0xf]  ;;  %v6333_v37 = vor.u32 %v6953_v30, %v6330_v31  ;;  %4178 = vmatpush.bf16.msrb.mxu2 %v6077_v7  ;;  %v3962_v27 = vpop.f32.mrf.mxu1 }
 0x354   : > { %v5530_v35 = vld [vmem:[%s7403_s10 + $0x8b8] sm:$0xf0]  ;;  %v3963_v30 = vadd.f32 %v3962_v27, %v3950_v26 }
 0x355   : > { %v6817_v5 = vld [vmem:[%s7403_s10 + $0xa9c] sm:$0xf]  ;;  %v5533_v40 = vor.u32 %v6753_v3, %v5530_v35  ;;  %4191 = vmatpush.bf16.msrb.mxu3 %v6333_v37  ;;  %v3988_v33 = vpop.f32.mrf.mxu3 }
 0x356   : > { %v5786_v36 = vld [vmem:[%s7403_s10 + $0xab8] sm:$0xf0] }
 0x357   : > { %v6881_v38 = vld [vmem:[%s7403_s10 + $0xc9c] sm:$0xf]  ;;  %v5789_v45 = vor.u32 %v6817_v5, %v5786_v36  ;;  %4153 = vmatpush.bf16.msrb.mxu0 %v5533_v40  ;;  %v3975_v31 = vpop.f32.mrf.mxu2 }
 0x358   : > { %v6042_v39 = vld [vmem:[%s7403_s10 + $0xcb8] sm:$0xf0]  ;;  %v3976_v32 = vadd.f32 %v3975_v31, %v3963_v30 }
 0x359   : > { %v6945_v13 = vld [vmem:[%s7403_s10 + $0xe9c] sm:$0xf]  ;;  %v6045_v50 = vor.u32 %v6881_v38, %v6042_v39  ;;  %4166 = vmatpush.bf16.msrb.mxu1 %v5789_v45  ;;  %v3951_v3 = vpop.f32.mrf.mxu0 }
 0x35a   : > { %v6298_v43 = vld [vmem:[%s7403_s10 + $0xeb8] sm:$0xf0]  ;;  %v8607_v35 = vadd.f32 %v3988_v33, %v3976_v32 }
 0x35b   : > { %v6745_v47 = vld [vmem:[%s7403_s10 + $0x85c] sm:$0xf]  ;;  %v6301_v53 = vor.u32 %v6945_v13, %v6298_v43  ;;  %4179 = vmatpush.bf16.msrb.mxu2 %v6045_v50  ;;  %v3964_v7 = vpop.f32.mrf.mxu1 }
 0x35c   : > { %v5498_v49 = vld [vmem:[%s7403_s10 + $0x878] sm:$0xf0] }
 0x35d   : > { %v6809_v51 = vld [vmem:[%s7403_s10 + $0xa5c] sm:$0xf]  ;;  %v5501_v58 = vor.u32 %v6745_v47, %v5498_v49  ;;  %4192 = vmatpush.bf16.msrb.mxu3 %v6301_v53  ;;  %v3990_v36 = vpop.f32.mrf.mxu3 }
 0x35e   : > { %v5754_v52 = vld [vmem:[%s7403_s10 + $0xa78] sm:$0xf0] }
 0x35f   : > { %v6873_v55 = vld [vmem:[%s7403_s10 + $0xc5c] sm:$0xf]  ;;  %v5757_v4 = vor.u32 %v6809_v51, %v5754_v52  ;;  %4154 = vmatpush.bf16.msrb.mxu0 %v5501_v58  ;;  %v3977_v5 = vpop.f32.mrf.mxu2 }
 0x360   : > { %v6010_v56 = vld [vmem:[%s7403_s10 + $0xc78] sm:$0xf0] }
 0x361   : > { %v6937_v59 = vld [vmem:[%s7403_s10 + $0xe5c] sm:$0xf]  ;;  %v6013_v28 = vor.u32 %v6873_v55, %v6010_v56  ;;  %4167 = vmatpush.bf16.msrb.mxu1 %v5757_v4 }
 0x362   : > { %v6266_v60 = vld [vmem:[%s7403_s10 + $0xe78] sm:$0xf0] }
 0x363   : > { %v6737_v8 = vld [vmem:[%s7403_s10 + $0x81c] sm:$0xf]  ;;  %v6269_v12 = vor.u32 %v6937_v59, %v6266_v60  ;;  %4180 = vmatpush.bf16.msrb.mxu2 %v6013_v28  ;;  %v4014_v37 = vpop.f32.mrf.mxu1 }
 0x364   : > { %v5466_v9 = vld [vmem:[%s7403_s10 + $0x838] sm:$0xf0] }
 0x365   : > { %v6801_v10 = vld [vmem:[%s7403_s10 + $0xa1c] sm:$0xf]  ;;  %v5469_v17 = vor.u32 %v6737_v8, %v5466_v9  ;;  %4193 = vmatpush.bf16.msrb.mxu3 %v6269_v12  ;;  %v4040_v39 = vpop.f32.mrf.mxu3 }
 0x366   : > { %v5722_v11 = vld [vmem:[%s7403_s10 + $0xa38] sm:$0xf0] }
 0x367   : > { %v6865_v15 = vld [vmem:[%s7403_s10 + $0xc1c] sm:$0xf]  ;;  %v5725_v21 = vor.u32 %v6801_v10, %v5722_v11  ;;  %4155 = vmatpush.bf16.msrb.mxu0 %v5469_v17  ;;  %v4027_v38 = vpop.f32.mrf.mxu2 }
 0x368   : > { %v5978_v29 = vld [vmem:[%s7403_s10 + $0xc38] sm:$0xf0] }
 0x369   : > { %v6929_v18 = vld [vmem:[%s7403_s10 + $0xe1c] sm:$0xf]  ;;  %v5981_v34 = vor.u32 %v6865_v15, %v5978_v29  ;;  %4168 = vmatpush.bf16.msrb.mxu1 %v5725_v21 }
 0x36a   : > { %v6234_v19 = vld [vmem:[%s7403_s10 + $0xe38] sm:$0xf0]  ;;  %4156 = vmatmul.bf16.vlgmr.msrb.gmra.mxu0 %v7631_v41  ;;  %v4001_v41 = vpop.f32.mrf.mxu0 }
 0x36b   : > { %v6237_v22 = vor.u32 %v6929_v18, %v6234_v19  ;;  %4181 = vmatpush.bf16.msrb.mxu2 %v5981_v34  ;;  %v4016_v40 = vpop.f32.mrf.mxu1 }
 0x36c   : > { %4169 = vmatmul.bf16.vlgmr.msrb.gmra.mxu1 %v7644_v54  ;;  %v4015_v54 = vadd.f32 %v4014_v37, %v4001_v41 }
 0x36d   : > { %4194 = vmatpush.bf16.msrb.mxu3 %v6237_v22  ;;  %v4042_v43 = vpop.f32.mrf.mxu3 }
 0x36e   : > { %4182 = vmatmul.bf16.vlgmr.msrb.gmra.mxu2 %v7636_v46  ;;  %v4028_v46 = vadd.f32 %v4027_v38, %v4015_v54 }
 0x36f   : > { %v4029_v13 = vpop.f32.mrf.mxu2 }
 0x370   : > { %4195 = vmatmul.bf16.vlgmr.msrb.gmra.mxu3 %v7638_v48  ;;  %v4041_v42 = vadd.f32 %v4040_v39, %v4028_v46 }
 0x372   : > { %v4003_v48 = vpop.f32.mrf.mxu0 }
 0x38a   : > { %v4053_v44 = vpop.f32.mrf.mxu0 }
 0x38b   : > { %v4054_v45 = vadd.f32 %v4053_v44, %v4041_v42 }
 0x38c   : > { %v4066_v47 = vpop.f32.mrf.mxu1 }
 0x38d   : > { %v4067_v49 = vadd.f32 %v4066_v47, %v4054_v45 }
 0x392   : > { %v4055_v53 = vpop.f32.mrf.mxu0 }
 0x394   : > { %v4079_v50 = vpop.f32.mrf.mxu2  ;;  %v4068_v56 = vpop.f32.mrf.mxu1 }
 0x395   : > { %v4080_v51 = vadd.f32 %v4079_v50, %v4067_v49 }
 0x396   : > { %v4092_v52 = vpop.f32.mrf.mxu3 }
 0x397   : > { %v4093_v55 = vadd.f32 %v4092_v52, %v4080_v51 }
 0x39c   : > { %v4081_v57 = vpop.f32.mrf.mxu2 }
 0x39e   : > { %v4094_v58 = vpop.f32.mrf.mxu3 }
 0x3aa   : > { %v4105_v59 = vpop.f32.mrf.mxu0 }
 0x3ac   : > { %v4118_v60 = vpop.f32.mrf.mxu1 }
 0x3ad   : > { %v4119_v28 = vadd.f32 %v4118_v60, %v4105_v59 }
 0x3b2   : > { %v4107_v1 = vpop.f32.mrf.mxu0 }
 0x3b4   : > { %v4131_v61 = vpop.f32.mrf.mxu2  ;;  %v4120_v4 = vpop.f32.mrf.mxu1 }
 0x3b5   : > { %v4132_v10 = vadd.f32 %v4131_v61, %v4119_v28 }
 0x3b7   : > { %v4144_v63 = vpop.f32.mrf.mxu3 }
 0x3b8   : > { %v4145_v20 = vadd.f32 %v4144_v63, %v4132_v10 }
 0x3bc   : > { %v4133_v8 = vpop.f32.mrf.mxu2 }
 0x3bf   : > { %v4146_v9 = vpop.f32.mrf.mxu3 }
 0x3e7   : > { %v4157_v11 = vpop.f32.mrf.mxu0 }
 0x3e8   : > { %v4158_v15 = vadd.f32 %v4157_v11, %v4145_v20 }
 0x3e9   : > { %v4170_v12 = vpop.f32.mrf.mxu1 }
 0x3ea   : > { %v4171_v29 = vadd.f32 %v4170_v12, %v4158_v15 }
 0x3ef   : > { %v4159_v17 = vpop.f32.mrf.mxu0 }
 0x3f1   : > { %v4183_v16 = vpop.f32.mrf.mxu2  ;;  %v4172_v21 = vpop.f32.mrf.mxu1 }
 0x3f2   : > { %v4184_v18 = vadd.f32 %v4183_v16, %v4171_v29 }
 0x3f3   : > { %v4196_v19 = vpop.f32.mrf.mxu3 }
 0x3f4   : > { %v4197_v34 = vadd.f32 %v4196_v19, %v4184_v18 }
 0x3f7   : > { %4203 = sbr.rel (%p6462_p11) target bundleno = 1028 (0x404), region = 48 }
 0x3f9   : > { %v4185_v22 = vpop.f32.mrf.mxu2 }
 0x3fb   : > { %v4198_v23 = vpop.f32.mrf.mxu3 }
 0x3fc   : > { %4204 = vst [vmem:[#allocation3 + $0x30] sm:$0xff] %v7966_v6 }
 0x3fd   : > { %4205 = vst [vmem:[#allocation3] sm:$0xff] %v8107_v0 }
 0x3fe   : > { %4206 = vst [vmem:[#allocation3 + $0x18] sm:$0xff] %v8248_v62 }
 0x3ff   : > { %4207 = vst [vmem:[#allocation3 + $0x10] sm:$0xff] %v8389_v2 }
 0x400   : > { %4208 = vst [vmem:[#allocation3 + $0x8] sm:$0xff] %v8530_v14 }
 0x401   : > { %4209 = vst [vmem:[#allocation3 + $0x20] sm:$0xff] %v8607_v35 }
 0x402   : > { %4210 = vst [vmem:[#allocation3 + $0x28] sm:$0xff] %v4093_v55 }
 0x403   : > { %4211 = vst [vmem:[#allocation3 + $0x38] sm:$0xff] %v4197_v34 }
 0x404 PF: > { %p6463_p8 = scmp.ne.s32.totalorder %s7466_s18, 0 }
 0x406   : > { %4215 = sbr.rel (%p6463_p8) target bundleno = 1046 (0x416), region = 52 }
 0x40b   : > { %v4216_v24 = vld [vmem:[#allocation3 + $0x30] sm:$0xff]  ;;  %v4217_v25 = vld [vmem:[#allocation3] sm:$0xff]  ;;  %v4218_v26 = vld [vmem:[#allocation3 + $0x18] sm:$0xff] }
 0x40c   : > { %v4224_v27 = vadd.f32 %v4216_v24, %v7966_v6  ;;  %v4225_v30 = vadd.f32 %v4217_v25, %v8107_v0  ;;  %v4226_v31 = vadd.f32 %v4218_v26, %v8248_v62  ;;  %v4219_v32 = vld [vmem:[#allocation3 + $0x10] sm:$0xff]  ;;  %v4220_v33 = vld [vmem:[#allocation3 + $0x8] sm:$0xff]  ;;  %v4221_v3 = vld [vmem:[#allocation3 + $0x20] sm:$0xff] }
 0x40d   : > { %v4227_v7 = vadd.f32 %v4219_v32, %v8389_v2  ;;  %v4222_v5 = vld [vmem:[#allocation3 + $0x28] sm:$0xff]  ;;  %v4228_v36 = vadd.f32 %v4220_v33, %v8530_v14  ;;  %v4223_v41 = vld [vmem:[#allocation3 + $0x38] sm:$0xff]  ;;  %v4229_v37 = vadd.f32 %v4221_v3, %v8607_v35 }
 0x40e   : > { %4232 = vst [vmem:[#allocation3 + $0x30] sm:$0xff] %v4224_v27  ;;  %v4230_v54 = vadd.f32 %v4222_v5, %v4093_v55  ;;  %v4231_v6 = vadd.f32 %v4223_v41, %v4197_v34 }
 0x40f   : > { %4233 = vst [vmem:[#allocation3] sm:$0xff] %v4225_v30 }
 0x410   : > { %4234 = vst [vmem:[#allocation3 + $0x18] sm:$0xff] %v4226_v31 }
 0x411   : > { %4235 = vst [vmem:[#allocation3 + $0x10] sm:$0xff] %v4227_v7 }
 0x412   : > { %4236 = vst [vmem:[#allocation3 + $0x8] sm:$0xff] %v4228_v36 }
 0x413   : > { %4237 = vst [vmem:[#allocation3 + $0x20] sm:$0xff] %v4229_v37 }
 0x414   : > { %4238 = vst [vmem:[#allocation3 + $0x28] sm:$0xff] %v4230_v54 }
 0x415   : > { %4239 = vst [vmem:[#allocation3 + $0x38] sm:$0xff] %v4231_v6 }
 0x416 PF: > { %p4240_p12 = scmp.eq.s32.totalorder %s7471_s26, 1  ;;  %p4241_p13 = scmp.eq.s32.totalorder %s7480_s25, 0 }
 0x418   : > { %p4242_p0 = pnand %p4241_p13, %p4240_p12 }
 0x419   : > { %s6990_s10 = sshll.u32 (!%p4242_p0), %s7461_s30, 6 }
 0x41a   : > { %4245 = sbr.rel (%p4242_p0) target bundleno = 1070 (0x42e), region = 56  ;;  %s4290_s12 = scalar_lea.vmem (!%p4242_p0), [#allocation2], %s6990_s10 }
 0x41f   : > { %v4246_v0 = vld [vmem:[#allocation3 + $0x30] sm:$0xff]  ;;  %v4254_v62 = vld [vmem:[%s211_s7] sm:$0xff]  ;;  %v4248_v38 = vld [vmem:[#allocation3 + $0x18] sm:$0xff] }
 0x420   : > { %v4247_v2 = vld [vmem:[#allocation3] sm:$0xff]  ;;  %v4256_v14 = vperm.slane %v4254_v62, 0  ;;  %v4257_v35 = vperm.slane %v4254_v62, 1  ;;  %v4258_v46 = vperm.slane %v4254_v62, 2  ;;  %v4249_v39 = vld [vmem:[#allocation3 + $0x10] sm:$0xff]  ;;  %v4259_v48 = vperm.slane %v4254_v62, 3 }
 0x421   : > { %v4250_v42 = vld [vmem:[#allocation3 + $0x8] sm:$0xff]  ;;  %v4260_v40 = vperm.slane %v4254_v62, 4  ;;  %v4251_v13 = vld [vmem:[#allocation3 + $0x20] sm:$0xff]  ;;  %v4261_v43 = vperm.slane %v4254_v62, 5  ;;  %v4262_v50 = vperm.slane %v4254_v62, 6  ;;  %v4253_v51 = vld [vmem:[#allocation3 + $0x38] sm:$0xff] }
 0x422   : > { %v4252_v44 = vld [vmem:[#allocation3 + $0x28] sm:$0xff]  ;;  %v4272_v45 = vadd.f32 %v4256_v14, %v4246_v0  ;;  %v4273_v47 = vadd.f32 %v4257_v35, %v4247_v2  ;;  %v4274_v49 = vadd.f32 %v4258_v46, %v4248_v38  ;;  %v4275_v52 = vadd.f32 %v4259_v48, %v4249_v39 }
 0x423   : > { %v4276_v53 = vadd.f32 %v4260_v40, %v4250_v42  ;;  %v4277_v55 = vadd.f32 %v4261_v43, %v4251_v13  ;;  %v4263_v56 = vperm.slane %v4254_v62, 7  ;;  %v4278_v60 = vadd.f32 %v4262_v50, %v4252_v44 }
 0x424   : > { %v4280_v57 = vmax.f32 %v4272_v45, 0.0  ;;  %v4281_v58 = vmax.f32 %v4273_v47, 0.0  ;;  %v4282_v59 = vmax.f32 %v4274_v49, 0.0  ;;  %v4283_v61 = vmax.f32 %v4275_v52, 0.0 }
 0x425   : > { %v4279_v63 = vadd.f32 %v4263_v56, %v4253_v51  ;;  %v4284_v1 = vmax.f32 %v4276_v53, 0.0  ;;  %v4285_v4 = vmax.f32 %v4277_v55, 0.0  ;;  %v4286_v8 = vmax.f32 %v4278_v60, 0.0 }
 0x426   : > { %4291 = vst [vmem:[%s4290_s12] sm:$0xff] %v4280_v57 }
 0x427   : > { %4292 = vst [vmem:[%s4290_s12 + $0x8] sm:$0xff] %v4281_v58  ;;  %v4287_v9 = vmax.f32 %v4279_v63, 0.0 }
 0x428   : > { %4293 = vst [vmem:[%s4290_s12 + $0x10] sm:$0xff] %v4282_v59 }
 0x429   : > { %4294 = vst [vmem:[%s4290_s12 + $0x18] sm:$0xff] %v4283_v61 }
 0x42a   : > { %4295 = vst [vmem:[%s4290_s12 + $0x20] sm:$0xff] %v4284_v1 }
 0x42b   : > { %4296 = vst [vmem:[%s4290_s12 + $0x28] sm:$0xff] %v4285_v4 }
 0x42c   : > { %4297 = vst [vmem:[%s4290_s12 + $0x30] sm:$0xff] %v4286_v8 }
 0x42d   : > { %4298 = vst [vmem:[%s4290_s12 + $0x38] sm:$0xff] %v4287_v9 }
 0x42e PF: > { %p4299_p2 = scmp.eq.s32.totalorder %s7480_s25, 1 }
 0x430   : > { %p4300_p3 = pnand %p4299_p2, %p4240_p12 }
 0x432   : > { %4303 = sbr.rel (%p4300_p3) target bundleno = 1095 (0x447), region = 60 }
 0x437   : > { %v4304_v28 = vld [vmem:[#allocation3 + $0x30] sm:$0xff]  ;;  %v4308_v10 = vld [vmem:[%s211_s7] sm:$0xff]  ;;  %v4306_v15 = vld [vmem:[#allocation3 + $0x18] sm:$0xff] }
 0x438   : > { %v4305_v11 = vld [vmem:[#allocation3] sm:$0xff]  ;;  %v4310_v20 = vperm.slane %v4308_v10, 0  ;;  %v4311_v12 = vperm.slane %v4308_v10, 1  ;;  %v4312_v29 = vperm.slane %v4308_v10, 2  ;;  %v4307_v16 = vld [vmem:[#allocation3 + $0x10] sm:$0xff]  ;;  %v4313_v17 = vperm.slane %v4308_v10, 3 }
 0x43a   : > { %v4318_v18 = vadd.f32 %v4310_v20, %v4304_v28  ;;  %v4319_v19 = vadd.f32 %v4311_v12, %v4305_v11  ;;  %v4320_v21 = vadd.f32 %v4312_v29, %v4306_v15  ;;  %v4321_v34 = vadd.f32 %v4313_v17, %v4307_v16 }
 0x43c   : > { %7067 = vtanh.f32 %v4318_v18 }
 0x43d   : > { %7069 = vtanh.f32 %v4319_v19 }
 0x43e   : > { %7071 = vtanh.f32 %v4320_v21 }
 0x43f   : > { %7073 = vtanh.f32 %v4321_v34 }
 0x442   : > { %v7068_v22 = vpop.eup %7067 }
 0x443   : > { %v7070_v23 = vpop.eup %7069  ;;  %4326 = vst [vmem:[%s8673_s5] sm:$0xff] %v7068_v22 }
 0x444   : > { %v7072_v24 = vpop.eup %7071  ;;  %4327 = vst [vmem:[%s8673_s5 + $0x8] sm:$0xff] %v7070_v23 }
 0x445   : > { %v7074_v25 = vpop.eup %7073  ;;  %4328 = vst [vmem:[%s8673_s5 + $0x10] sm:$0xff] %v7072_v24 }
 0x446   : > { %4329 = vst [vmem:[%s8673_s5 + $0x18] sm:$0xff] %v7074_v25 }
 0x447 PF: > { %p31_p1 = scmp.ge.s32.totalorder %s7301_s6, 88   ;;  %s8682_s26 = smov %s7203_s0 }
 0x448   : > { %s8683_s0 = smov %s7207_s27  ;;  %s8684_s27 = smov %s7380_s23 }
 0x449   : > { %s8685_s1 = smov %s7215_s28  ;;  %s8686_s28 = smov %s7219_s29 }
 0x44a   : > { %s8687_s29 = smov %s7312_s9  ;;  %s8688_s30 = smov %s7301_s6 }
 0x44b   :  { %33 = sbr.rel (!%p31_p1) target bundleno = 15 (0xf), region = 103 }
 0x450   :  { %4341 = vsyncpa [#allocation8], 1 }
 0x451   :  { %4343 = vsyncpa [#allocation8 + $0x1], 1 }
 0x452   :  { %4344 = vsyncpa [#allocation10], 1 }
 0x453   :  { %4346 = vsyncpa [#allocation10 + $0x1], 1 }

</bundles_post_ra>
